<compile_context>
chip_gen: v7x
topology: tpu7x:2x2x1
jax: 0.10.0
libtpu: 0.0.40
codegen_flags: <defaults>
</compile_context>

<pallas_src>
import functools

import jax
import jax.numpy as jnp
from jax import lax
from jax.experimental import pallas as pl
from jax.experimental.pallas import tpu as pltpu

_MM_DTYPE = jnp.bfloat16   # MXU operand dtype; accumulation stays float32.
_LANE = 128                # logits slab padded to a multiple of the lane width.


# ----------------------------- in-kernel helpers ----------------------------

def _mm(a, w_bf16):
    """Matmul: activation cast to bf16, weight already bf16, f32 accumulation."""
    return jnp.dot(a.astype(_MM_DTYPE), w_bf16, preferred_element_type=jnp.float32)


def _ln(x, g, b, eps=1e-5):
    mu = jnp.mean(x, axis=-1, keepdims=True)
    var = jnp.mean(jnp.square(x - mu), axis=-1, keepdims=True)
    return (x - mu) * lax.rsqrt(var + eps) * g + b


def _gelu(x):
    # Exact (erf) GELU, matching torch.nn.GELU default.
    return 0.5 * x * (1.0 + lax.erf(x * 0.7071067811865476))


def _mha_out(q, k, v, w_out, heads, dim_head):
    """softmax(q k^T) v for all heads, fused with the output projection.

    Avoids lane-concatenating 16-wide per-head outputs by folding the output
    projection into the head loop:  concat_h(o_h) @ W == sum_h o_h @ W[h].
    q is pre-scaled (the attention scale is folded into the q weights)."""
    out = None
    for h in range(heads):
        sl = slice(h * dim_head, (h + 1) * dim_head)
        qh = q[:, sl].astype(_MM_DTYPE)
        kh = k[:, sl].astype(_MM_DTYPE)
        vh = v[:, sl].astype(_MM_DTYPE)
        s = lax.dot_general(qh, kh, (((1,), (1,)), ((), ())),
                            preferred_element_type=jnp.float32)
        s = s - jnp.max(s, axis=-1, keepdims=True)
        e = jnp.exp(s)
        p = e / jnp.sum(e, axis=-1, keepdims=True)      # exact softmax
        oh = jnp.dot(p.astype(_MM_DTYPE), vh, preferred_element_type=jnp.float32)
        contrib = _mm(oh, w_out[sl, :])
        out = contrib if out is None else out + contrib
    return out


def _embed(patches, ep):
    # patch-embed linear + cls concat + positional add.
    emb = _mm(patches, ep['to_embed']['w']) + ep['to_embed']['b']   # (n, D)
    tok = jnp.concatenate([ep['cls'], emb], axis=0)                 # (n+1, D)
    return tok + ep['pos']


def _attn_block(x, ap, heads, dim_head):
    inner = heads * dim_head
    xn = _ln(x, ap['norm']['g'], ap['norm']['b'])
    qkv = _mm(xn, ap['w_qkv'])                     # scale folded into q columns
    q = qkv[:, :inner]
    k = qkv[:, inner:2 * inner]
    v = qkv[:, 2 * inner:]
    return _mha_out(q, k, v, ap['w_out'], heads, dim_head) + ap['b_out']


def _ffn_block(x, lyr):
    xn = _ln(x, lyr['ff_norm']['g'], lyr['ff_norm']['b'])
    h = _gelu(_mm(xn, lyr['ff1']['w']) + lyr['ff1']['b'])
    return _mm(h, lyr['ff2']['w']) + lyr['ff2']['b']


def _encoder(x, tp, heads, dim_head):
    for lyr in tp['layers']:
        x = x + _attn_block(x, lyr['attn'], heads, dim_head)   # PreNorm residuals
        x = x + _ffn_block(x, lyr)
    return _ln(x, tp['final_norm']['g'], tp['final_norm']['b'])


def _cross_attend(cls_tok, ctx, cp, heads, dim_head):
    """ProjectInOut(PreNorm(Attention)) with kv_include_self, plus residual."""
    inner = heads * dim_head
    ap = cp['attn']
    x = _mm(cls_tok, cp['proj_in']['w']) + cp['proj_in']['b']   # project in
    xn = _ln(x, ap['norm']['g'], ap['norm']['b'])
    kv_in = jnp.concatenate([xn, ctx], axis=0)                  # kv_include_self
    q = _mm(xn, ap['w_q'])                                      # scale folded in
    kv = _mm(kv_in, ap['w_kv'])
    k = kv[:, :inner]
    v = kv[:, inner:]
    attn_out = _mha_out(q, k, v, ap['w_out'], heads, dim_head) + ap['b_out']
    return _mm(attn_out, cp['proj_out']['w']) + cp['proj_out']['b'] + cls_tok


def _head(cls_row, hp):
    # LN + Linear; weights are zero-padded to a lane-dense (D, ncp) slab.
    return _mm(_ln(cls_row, hp['norm']['g'], hp['norm']['b']), hp['w']) + hp['b']


# ------------------------------ the fused kernel -----------------------------

def _fused_vit_kernel(sm_ref, lg_ref, *rest, treedef, chunk, sm_hd, lg_hd, cr_hd):
    out_ref = rest[-1]
    # Reconstruct the parameter pytree from the flat list of refs and load each
    # weight exactly once (bf16 matrices, f32 vectors) into VMEM-resident values.
    p = jax.tree_util.tree_unflatten(treedef, rest[:-1])
    p = jax.tree_util.tree_map(lambda r: r[...], p)

    for i in range(chunk):   # static loop over samples in this batch chunk
        sm_tok = _embed(sm_ref[i].astype(jnp.float32), p['sm_embed'])
        lg_tok = _embed(lg_ref[i].astype(jnp.float32), p['lg_embed'])
        for layer in p['ms_layers']:
            sm_tok = _encoder(sm_tok, layer['sm_enc'], *sm_hd)
            lg_tok = _encoder(lg_tok, layer['lg_enc'], *lg_hd)
            sm_cls, sm_pat = sm_tok[:1], sm_tok[1:]
            lg_cls, lg_pat = lg_tok[:1], lg_tok[1:]
            for cl in layer['cross']:
                sm_cls = _cross_attend(sm_cls, lg_pat, cl['sm'], *cr_hd)
                lg_cls = _cross_attend(lg_cls, sm_pat, cl['lg'], *cr_hd)
            sm_tok = jnp.concatenate([sm_cls, sm_pat], axis=0)
            lg_tok = jnp.concatenate([lg_cls, lg_pat], axis=0)
        logits = _head(sm_tok[:1], p['sm_head']) + _head(lg_tok[:1], p['lg_head'])
        out_ref[i] = logits.astype(out_ref.dtype)        # lane-dense (1, ncp) store


# ------------------------------ kernel wrapper --------------------------------

def _patchify(img, ps):
    # 'b c (h p1) (w p2) -> b (h w) (p1 p2 c)'  (one-time XLA reshape/transpose)
    B, C, H, W = img.shape
    h, w = H // ps, W // ps
    x = img.reshape(B, C, h, ps, w, ps).transpose(0, 2, 4, 3, 5, 1)
    return x.reshape(B, h * w, ps * ps * C)


def _const_spec(shape):
    nd = len(shape)
    return pl.BlockSpec(shape, lambda b: (0,) * nd)   # weight: same block every step


def cross_efficient_vit_fwd(dev_params, cfg, img):
    B = img.shape[0]
    sm_patches = _patchify(img, cfg['sm_patch_size'])
    lg_patches = _patchify(img, cfg['lg_patch_size'])

    leaves, treedef = jax.tree_util.tree_flatten(dev_params)

    # Two chunks when B is even: both v7x TensorCores get work, and on v5e/v6e
    # it is only two serial grid steps (per-step overhead amortized).
    num_chunks = 2 if (B >= 2 and B % 2 == 0) else 1
    chunk = B // num_chunks
    ncp = cfg['ncp']

    kern = functools.partial(
        _fused_vit_kernel, treedef=treedef, chunk=chunk,
        sm_hd=cfg['sm_hd'], lg_hd=cfg['lg_hd'], cr_hd=cfg['cross_hd'])

    in_specs = [
        pl.BlockSpec((chunk,) + sm_patches.shape[1:], lambda b: (b, 0, 0)),
        pl.BlockSpec((chunk,) + lg_patches.shape[1:], lambda b: (b, 0, 0)),
    ] + [_const_spec(l.shape) for l in leaves]

    out = pl.pallas_call(
        kern,
        grid=(num_chunks,),
        in_specs=in_specs,
        out_specs=pl.BlockSpec((chunk, 1, ncp), lambda b: (b, 0, 0)),
        out_shape=jax.ShapeDtypeStruct((B, 1, ncp), jnp.float32),
        compiler_params=pltpu.CompilerParams(
            dimension_semantics=("parallel",),
            vmem_limit_bytes=32 * 1024 * 1024),
    )(sm_patches, lg_patches, *leaves)

    return out[:, 0, :cfg['num_classes']]   # slice the lane-dense slab back in XLA


# ------------------------------ parameter init --------------------------------

class KeyGen:
    def __init__(self, seed):
        self.key = jax.random.PRNGKey(seed)

    def __call__(self):
        self.key, sub = jax.random.split(self.key)
        return sub


def init_linear_p(kg, din, dout):
    return {'w': jax.random.normal(kg(), (din, dout), jnp.float32) * 0.02,
            'b': jnp.zeros((dout,), jnp.float32)}


def init_ln_p(dim):
    return {'g': jnp.ones((dim,), jnp.float32), 'b': jnp.zeros((dim,), jnp.float32)}


def init_self_attention_p(kg, dim, heads, dim_head):
    inner = heads * dim_head
    return {'heads': heads, 'dim_head': dim_head, 'scale': dim_head ** -0.5,
            'norm': init_ln_p(dim),
            'w_qkv': jax.random.normal(kg(), (dim, 3 * inner), jnp.float32) * 0.02,
            'w_out': jax.random.normal(kg(), (inner, dim), jnp.float32) * 0.02,
            'b_out': jnp.zeros((dim,), jnp.float32)}


def init_cross_attention_p(kg, dim, heads, dim_head):
    inner = heads * dim_head
    return {'heads': heads, 'dim_head': dim_head, 'scale': dim_head ** -0.5,
            'norm': init_ln_p(dim),
            'w_q': jax.random.normal(kg(), (dim, inner), jnp.float32) * 0.02,
            'w_kv': jax.random.normal(kg(), (dim, 2 * inner), jnp.float32) * 0.02,
            'w_out': jax.random.normal(kg(), (inner, dim), jnp.float32) * 0.02,
            'b_out': jnp.zeros((dim,), jnp.float32)}


def init_transformer_p(kg, dim, depth, heads, dim_head, mlp_dim):
    layers = []
    for _ in range(depth):
        layers.append({'attn': init_self_attention_p(kg, dim, heads, dim_head),
                       'ff_norm': init_ln_p(dim),
                       'ff1': init_linear_p(kg, dim, mlp_dim),
                       'ff2': init_linear_p(kg, mlp_dim, dim)})
    return {'layers': layers, 'final_norm': init_ln_p(dim)}


def init_cross_transformer_p(kg, sm_dim, lg_dim, depth, heads, dim_head):
    layers = []
    for _ in range(depth):
        layers.append({
            'sm': {'proj_in': init_linear_p(kg, sm_dim, lg_dim),
                   'attn': init_cross_attention_p(kg, lg_dim, heads, dim_head),
                   'proj_out': init_linear_p(kg, lg_dim, sm_dim)},
            'lg': {'proj_in': init_linear_p(kg, lg_dim, sm_dim),
                   'attn': init_cross_attention_p(kg, sm_dim, heads, dim_head),
                   'proj_out': init_linear_p(kg, sm_dim, lg_dim)},
        })
    return layers


def init_image_embedder_p(kg, dim, image_size, patch_size, channels):
    num_patches = (image_size // patch_size) ** 2
    patch_dim = channels * patch_size ** 2
    return {'to_embed': init_linear_p(kg, patch_dim, dim),
            'pos': jax.random.normal(kg(), (1, num_patches + 1, dim), jnp.float32),
            'cls': jax.random.normal(kg(), (1, 1, dim), jnp.float32)}


def init_cross_efficient_vit(config, seed=0):
    m = config['model']
    kg = KeyGen(seed)
    params = {
        'sm_embed': init_image_embedder_p(kg, m['sm-dim'], m['image-size'],
                                          m['sm-patch-size'], m['sm-channels']),
        'lg_embed': init_image_embedder_p(kg, m['lg-dim'], m['image-size'],
                                          m['lg-patch-size'], m['lg-channels']),
        'ms_layers': [],
        'sm_head_norm': init_ln_p(m['sm-dim']),
        'sm_head': init_linear_p(kg, m['sm-dim'], m['num-classes']),
        'lg_head_norm': init_ln_p(m['lg-dim']),
        'lg_head': init_linear_p(kg, m['lg-dim'], m['num-classes']),
    }
    for _ in range(m['depth']):
        params['ms_layers'].append({
            'sm_enc': init_transformer_p(kg, m['sm-dim'], m['sm-enc-depth'],
                                         m['sm-enc-heads'], m['sm-enc-dim-head'],
                                         m['sm-enc-mlp-dim']),
            'lg_enc': init_transformer_p(kg, m['lg-dim'], m['lg-enc-depth'],
                                         m['lg-enc-heads'], m['lg-enc-dim-head'],
                                         m['lg-enc-mlp-dim']),
            'cross': init_cross_transformer_p(kg, m['sm-dim'], m['lg-dim'],
                                              m['cross-attn-depth'],
                                              m['cross-attn-heads'],
                                              m['cross-attn-dim-head']),
        })
    return params


# ------------------------- device-side parameter prep -------------------------

def _row(v):
    return v.reshape(1, -1)


def _prep_ln(p):
    return {'g': _row(p['g']), 'b': _row(p['b'])}


def _prep_linear(p):
    return {'w': p['w'].astype(_MM_DTYPE), 'b': _row(p['b'])}


def _prep_self_attn(p):
    inner = p['heads'] * p['dim_head']
    w_qkv = p['w_qkv'].at[:, :inner].multiply(p['scale'])    # fold scale into q
    return {'norm': _prep_ln(p['norm']),
            'w_qkv': w_qkv.astype(_MM_DTYPE),
            'w_out': p['w_out'].astype(_MM_DTYPE),
            'b_out': _row(p['b_out'])}


def _prep_cross_attn(p):
    return {'norm': _prep_ln(p['norm']),
            'w_q': (p['w_q'] * p['scale']).astype(_MM_DTYPE),  # fold scale into q
            'w_kv': p['w_kv'].astype(_MM_DTYPE),
            'w_out': p['w_out'].astype(_MM_DTYPE),
            'b_out': _row(p['b_out'])}


def _prep_encoder(p):
    return {'layers': [{'attn': _prep_self_attn(l['attn']),
                        'ff_norm': _prep_ln(l['ff_norm']),
                        'ff1': _prep_linear(l['ff1']),
                        'ff2': _prep_linear(l['ff2'])} for l in p['layers']],
            'final_norm': _prep_ln(p['final_norm'])}


def _prep_embed(p):
    dim = p['to_embed']['w'].shape[1]
    return {'to_embed': _prep_linear(p['to_embed']),
            'cls': p['cls'].reshape(1, dim),
            'pos': p['pos'][0]}


def _prep_head(norm_p, lin_p, ncp):
    nc = lin_p['w'].shape[1]
    w = jnp.pad(lin_p['w'], ((0, 0), (0, ncp - nc))).astype(_MM_DTYPE)
    b = _row(jnp.pad(lin_p['b'], (0, ncp - nc)))
    return {'norm': _prep_ln(norm_p), 'w': w, 'b': b}


def prepare_for_tpu(params, config):
    """bf16 weights, scale folded into q, vectors as (1, D) rows, lane-padded heads."""
    m = config['model']
    ncp = ((m['num-classes'] + _LANE - 1) // _LANE) * _LANE
    dev = {
        'sm_embed': _prep_embed(params['sm_embed']),
        'lg_embed': _prep_embed(params['lg_embed']),
        'ms_layers': [
            {'sm_enc': _prep_encoder(l['sm_enc']),
             'lg_enc': _prep_encoder(l['lg_enc']),
             'cross': [{'sm': {'proj_in': _prep_linear(c['sm']['proj_in']),
                               'attn': _prep_cross_attn(c['sm']['attn']),
                               'proj_out': _prep_linear(c['sm']['proj_out'])},
                        'lg': {'proj_in': _prep_linear(c['lg']['proj_in']),
                               'attn': _prep_cross_attn(c['lg']['attn']),
                               'proj_out': _prep_linear(c['lg']['proj_out'])}}
                       for c in l['cross']]}
            for l in params['ms_layers']],
        'sm_head': _prep_head(params['sm_head_norm'], params['sm_head'], ncp),
        'lg_head': _prep_head(params['lg_head_norm'], params['lg_head'], ncp),
    }
    cfg = {'sm_patch_size': m['sm-patch-size'],
           'lg_patch_size': m['lg-patch-size'],
           'num_classes': m['num-classes'],
           'ncp': ncp,
           'sm_hd': (m['sm-enc-heads'], m['sm-enc-dim-head']),
           'lg_hd': (m['lg-enc-heads'], m['lg-enc-dim-head']),
           'cross_hd': (m['cross-attn-heads'], m['cross-attn-dim-head'])}
    return dev, cfg


# ----------------------------------- main --------------------------------------

if __name__ == "__main__":
    config = {'model': {
        'image-size': 16, 'num-classes': 10,
        'sm-dim': 32, 'sm-channels': 4,
        'lg-dim': 64, 'lg-channels': 4,
        'sm-patch-size': 4, 'sm-enc-depth': 1, 'sm-enc-heads': 2,
        'sm-enc-mlp-dim': 64, 'sm-enc-dim-head': 16,
        'lg-patch-size': 8, 'lg-enc-depth': 1, 'lg-enc-heads': 2,
        'lg-enc-mlp-dim': 128, 'lg-enc-dim-head': 16,
        'cross-attn-depth': 1, 'cross-attn-heads': 2, 'cross-attn-dim-head': 16,
        'depth': 1, 'dropout': 0.0, 'emb-dropout': 0.0,
    }}

    raw_params = init_cross_efficient_vit(config, seed=0)
    dev_params, cfg = prepare_for_tpu(raw_params, config)

    img = jax.random.normal(jax.random.PRNGKey(0), (2, 4, 16, 16), jnp.float32)

    fwd = jax.jit(lambda p, x: cross_efficient_vit_fwd(p, cfg, x))
    logits = jax.block_until_ready(fwd(dev_params, img))

    assert logits.shape == (2, config['model']['num-classes'])
    assert bool(jnp.all(jnp.isfinite(logits)))
    print("KERNEL_OK")
</pallas_src>

<mosaic_0001>
module attributes {stable_mosaic.version = 11 : i64} {
  func.func @_fused_vit_kernel(%arg0: i32, %arg1: memref<1x16x64xf32, #tpu.memory_space<vmem>>, %arg2: memref<1x4x256xf32, #tpu.memory_space<vmem>>, %arg3: memref<1x64xf32, #tpu.memory_space<vmem>>, %arg4: memref<5x64xf32, #tpu.memory_space<vmem>>, %arg5: memref<1x64xf32, #tpu.memory_space<vmem>>, %arg6: memref<256x64xbf16, #tpu.memory_space<vmem>>, %arg7: memref<1x128xf32, #tpu.memory_space<vmem>>, %arg8: memref<1x64xf32, #tpu.memory_space<vmem>>, %arg9: memref<1x64xf32, #tpu.memory_space<vmem>>, %arg10: memref<64x128xbf16, #tpu.memory_space<vmem>>, %arg11: memref<1x32xf32, #tpu.memory_space<vmem>>, %arg12: memref<1x32xf32, #tpu.memory_space<vmem>>, %arg13: memref<1x32xf32, #tpu.memory_space<vmem>>, %arg14: memref<32x64xbf16, #tpu.memory_space<vmem>>, %arg15: memref<32x32xbf16, #tpu.memory_space<vmem>>, %arg16: memref<32x32xbf16, #tpu.memory_space<vmem>>, %arg17: memref<1x32xf32, #tpu.memory_space<vmem>>, %arg18: memref<64x32xbf16, #tpu.memory_space<vmem>>, %arg19: memref<1x64xf32, #tpu.memory_space<vmem>>, %arg20: memref<32x64xbf16, #tpu.memory_space<vmem>>, %arg21: memref<1x64xf32, #tpu.memory_space<vmem>>, %arg22: memref<1x64xf32, #tpu.memory_space<vmem>>, %arg23: memref<1x64xf32, #tpu.memory_space<vmem>>, %arg24: memref<64x64xbf16, #tpu.memory_space<vmem>>, %arg25: memref<32x64xbf16, #tpu.memory_space<vmem>>, %arg26: memref<64x32xbf16, #tpu.memory_space<vmem>>, %arg27: memref<1x64xf32, #tpu.memory_space<vmem>>, %arg28: memref<32x64xbf16, #tpu.memory_space<vmem>>, %arg29: memref<1x32xf32, #tpu.memory_space<vmem>>, %arg30: memref<64x32xbf16, #tpu.memory_space<vmem>>, %arg31: memref<1x64xf32, #tpu.memory_space<vmem>>, %arg32: memref<1x64xf32, #tpu.memory_space<vmem>>, %arg33: memref<1x64xf32, #tpu.memory_space<vmem>>, %arg34: memref<1x64xf32, #tpu.memory_space<vmem>>, %arg35: memref<1x64xf32, #tpu.memory_space<vmem>>, %arg36: memref<32x64xbf16, #tpu.memory_space<vmem>>, %arg37: memref<64x96xbf16, #tpu.memory_space<vmem>>, %arg38: memref<1x128xf32, #tpu.memory_space<vmem>>, %arg39: memref<64x128xbf16, #tpu.memory_space<vmem>>, %arg40: memref<1x64xf32, #tpu.memory_space<vmem>>, %arg41: memref<128x64xbf16, #tpu.memory_space<vmem>>, %arg42: memref<1x64xf32, #tpu.memory_space<vmem>>, %arg43: memref<1x64xf32, #tpu.memory_space<vmem>>, %arg44: memref<1x32xf32, #tpu.memory_space<vmem>>, %arg45: memref<1x32xf32, #tpu.memory_space<vmem>>, %arg46: memref<1x32xf32, #tpu.memory_space<vmem>>, %arg47: memref<1x32xf32, #tpu.memory_space<vmem>>, %arg48: memref<1x32xf32, #tpu.memory_space<vmem>>, %arg49: memref<32x32xbf16, #tpu.memory_space<vmem>>, %arg50: memref<32x96xbf16, #tpu.memory_space<vmem>>, %arg51: memref<1x64xf32, #tpu.memory_space<vmem>>, %arg52: memref<32x64xbf16, #tpu.memory_space<vmem>>, %arg53: memref<1x32xf32, #tpu.memory_space<vmem>>, %arg54: memref<64x32xbf16, #tpu.memory_space<vmem>>, %arg55: memref<1x32xf32, #tpu.memory_space<vmem>>, %arg56: memref<1x32xf32, #tpu.memory_space<vmem>>, %arg57: memref<1x32xf32, #tpu.memory_space<vmem>>, %arg58: memref<17x32xf32, #tpu.memory_space<vmem>>, %arg59: memref<1x32xf32, #tpu.memory_space<vmem>>, %arg60: memref<64x32xbf16, #tpu.memory_space<vmem>>, %arg61: memref<1x128xf32, #tpu.memory_space<vmem>>, %arg62: memref<1x32xf32, #tpu.memory_space<vmem>>, %arg63: memref<1x32xf32, #tpu.memory_space<vmem>>, %arg64: memref<32x128xbf16, #tpu.memory_space<vmem>>, %arg65: memref<1x1x128xf32, #tpu.memory_space<vmem>>) attributes {dimension_semantics = [#tpu.dimension_semantics<parallel>], iteration_bounds = array<i64: 2>, scalar_prefetch = 0 : i64, scratch_operands = 0 : i64, tpu.core_type = #tpu.core_type<tc>, window_params = [{transform_indices = @transform_0, window_bounds = array<i64: 1, 16, 64>}, {transform_indices = @transform_1, window_bounds = array<i64: 1, 4, 256>}, {pipeline_mode = #tpu.pipeline_mode<synchronous>, transform_indices = @transform_2, window_bounds = array<i64: 1, 64>}, {pipeline_mode = #tpu.pipeline_mode<synchronous>, transform_indices = @transform_3, window_bounds = array<i64: 5, 64>}, {pipeline_mode = #tpu.pipeline_mode<synchronous>, transform_indices = @transform_4, window_bounds = array<i64: 1, 64>}, {pipeline_mode = #tpu.pipeline_mode<synchronous>, transform_indices = @transform_5, window_bounds = array<i64: 256, 64>}, {pipeline_mode = #tpu.pipeline_mode<synchronous>, transform_indices = @transform_6, window_bounds = array<i64: 1, 128>}, {pipeline_mode = #tpu.pipeline_mode<synchronous>, transform_indices = @transform_7, window_bounds = array<i64: 1, 64>}, {pipeline_mode = #tpu.pipeline_mode<synchronous>, transform_indices = @transform_8, window_bounds = array<i64: 1, 64>}, {pipeline_mode = #tpu.pipeline_mode<synchronous>, transform_indices = @transform_9, window_bounds = array<i64: 64, 128>}, {pipeline_mode = #tpu.pipeline_mode<synchronous>, transform_indices = @transform_10, window_bounds = array<i64: 1, 32>}, {pipeline_mode = #tpu.pipeline_mode<synchronous>, transform_indices = @transform_11, window_bounds = array<i64: 1, 32>}, {pipeline_mode = #tpu.pipeline_mode<synchronous>, transform_indices = @transform_12, window_bounds = array<i64: 1, 32>}, {pipeline_mode = #tpu.pipeline_mode<synchronous>, transform_indices = @transform_13, window_bounds = array<i64: 32, 64>}, {pipeline_mode = #tpu.pipeline_mode<synchronous>, transform_indices = @transform_14, window_bounds = array<i64: 32, 32>}, {pipeline_mode = #tpu.pipeline_mode<synchronous>, transform_indices = @transform_15, window_bounds = array<i64: 32, 32>}, {pipeline_mode = #tpu.pipeline_mode<synchronous>, transform_indices = @transform_16, window_bounds = array<i64: 1, 32>}, {pipeline_mode = #tpu.pipeline_mode<synchronous>, transform_indices = @transform_17, window_bounds = array<i64: 64, 32>}, {pipeline_mode = #tpu.pipeline_mode<synchronous>, transform_indices = @transform_18, window_bounds = array<i64: 1, 64>}, {pipeline_mode = #tpu.pipeline_mode<synchronous>, transform_indices = @transform_19, window_bounds = array<i64: 32, 64>}, {pipeline_mode = #tpu.pipeline_mode<synchronous>, transform_indices = @transform_20, window_bounds = array<i64: 1, 64>}, {pipeline_mode = #tpu.pipeline_mode<synchronous>, transform_indices = @transform_21, window_bounds = array<i64: 1, 64>}, {pipeline_mode = #tpu.pipeline_mode<synchronous>, transform_indices = @transform_22, window_bounds = array<i64: 1, 64>}, {pipeline_mode = #tpu.pipeline_mode<synchronous>, transform_indices = @transform_23, window_bounds = array<i64: 64, 64>}, {pipeline_mode = #tpu.pipeline_mode<synchronous>, transform_indices = @transform_24, window_bounds = array<i64: 32, 64>}, {pipeline_mode = #tpu.pipeline_mode<synchronous>, transform_indices = @transform_25, window_bounds = array<i64: 64, 32>}, {pipeline_mode = #tpu.pipeline_mode<synchronous>, transform_indices = @transform_26, window_bounds = array<i64: 1, 64>}, {pipeline_mode = #tpu.pipeline_mode<synchronous>, transform_indices = @transform_27, window_bounds = array<i64: 32, 64>}, {pipeline_mode = #tpu.pipeline_mode<synchronous>, transform_indices = @transform_28, window_bounds = array<i64: 1, 32>}, {pipeline_mode = #tpu.pipeline_mode<synchronous>, transform_indices = @transform_29, window_bounds = array<i64: 64, 32>}, {pipeline_mode = #tpu.pipeline_mode<synchronous>, transform_indices = @transform_30, window_bounds = array<i64: 1, 64>}, {pipeline_mode = #tpu.pipeline_mode<synchronous>, transform_indices = @transform_31, window_bounds = array<i64: 1, 64>}, {pipeline_mode = #tpu.pipeline_mode<synchronous>, transform_indices = @transform_32, window_bounds = array<i64: 1, 64>}, {pipeline_mode = #tpu.pipeline_mode<synchronous>, transform_indices = @transform_33, window_bounds = array<i64: 1, 64>}, {pipeline_mode = #tpu.pipeline_mode<synchronous>, transform_indices = @transform_34, window_bounds = array<i64: 1, 64>}, {pipeline_mode = #tpu.pipeline_mode<synchronous>, transform_indices = @transform_35, window_bounds = array<i64: 32, 64>}, {pipeline_mode = #tpu.pipeline_mode<synchronous>, transform_indices = @transform_36, window_bounds = array<i64: 64, 96>}, {pipeline_mode = #tpu.pipeline_mode<synchronous>, transform_indices = @transform_37, window_bounds = array<i64: 1, 128>}, {pipeline_mode = #tpu.pipeline_mode<synchronous>, transform_indices = @transform_38, window_bounds = array<i64: 64, 128>}, {pipeline_mode = #tpu.pipeline_mode<synchronous>, transform_indices = @transform_39, window_bounds = array<i64: 1, 64>}, {pipeline_mode = #tpu.pipeline_mode<synchronous>, transform_indices = @transform_40, window_bounds = array<i64: 128, 64>}, {pipeline_mode = #tpu.pipeline_mode<synchronous>, transform_indices = @transform_41, window_bounds = array<i64: 1, 64>}, {pipeline_mode = #tpu.pipeline_mode<synchronous>, transform_indices = @transform_42, window_bounds = array<i64: 1, 64>}, {pipeline_mode = #tpu.pipeline_mode<synchronous>, transform_indices = @transform_43, window_bounds = array<i64: 1, 32>}, {pipeline_mode = #tpu.pipeline_mode<synchronous>, transform_indices = @transform_44, window_bounds = array<i64: 1, 32>}, {pipeline_mode = #tpu.pipeline_mode<synchronous>, transform_indices = @transform_45, window_bounds = array<i64: 1, 32>}, {pipeline_mode = #tpu.pipeline_mode<synchronous>, transform_indices = @transform_46, window_bounds = array<i64: 1, 32>}, {pipeline_mode = #tpu.pipeline_mode<synchronous>, transform_indices = @transform_47, window_bounds = array<i64: 1, 32>}, {pipeline_mode = #tpu.pipeline_mode<synchronous>, transform_indices = @transform_48, window_bounds = array<i64: 32, 32>}, {pipeline_mode = #tpu.pipeline_mode<synchronous>, transform_indices = @transform_49, window_bounds = array<i64: 32, 96>}, {pipeline_mode = #tpu.pipeline_mode<synchronous>, transform_indices = @transform_50, window_bounds = array<i64: 1, 64>}, {pipeline_mode = #tpu.pipeline_mode<synchronous>, transform_indices = @transform_51, window_bounds = array<i64: 32, 64>}, {pipeline_mode = #tpu.pipeline_mode<synchronous>, transform_indices = @transform_52, window_bounds = array<i64: 1, 32>}, {pipeline_mode = #tpu.pipeline_mode<synchronous>, transform_indices = @transform_53, window_bounds = array<i64: 64, 32>}, {pipeline_mode = #tpu.pipeline_mode<synchronous>, transform_indices = @transform_54, window_bounds = array<i64: 1, 32>}, {pipeline_mode = #tpu.pipeline_mode<synchronous>, transform_indices = @transform_55, window_bounds = array<i64: 1, 32>}, {pipeline_mode = #tpu.pipeline_mode<synchronous>, transform_indices = @transform_56, window_bounds = array<i64: 1, 32>}, {pipeline_mode = #tpu.pipeline_mode<synchronous>, transform_indices = @transform_57, window_bounds = array<i64: 17, 32>}, {pipeline_mode = #tpu.pipeline_mode<synchronous>, transform_indices = @transform_58, window_bounds = array<i64: 1, 32>}, {pipeline_mode = #tpu.pipeline_mode<synchronous>, transform_indices = @transform_59, window_bounds = array<i64: 64, 32>}, {pipeline_mode = #tpu.pipeline_mode<synchronous>, transform_indices = @transform_60, window_bounds = array<i64: 1, 128>}, {pipeline_mode = #tpu.pipeline_mode<synchronous>, transform_indices = @transform_61, window_bounds = array<i64: 1, 32>}, {pipeline_mode = #tpu.pipeline_mode<synchronous>, transform_indices = @transform_62, window_bounds = array<i64: 1, 32>}, {pipeline_mode = #tpu.pipeline_mode<synchronous>, transform_indices = @transform_63, window_bounds = array<i64: 32, 128>}, {transform_indices = @transform_64, window_bounds = array<i64: 1, 1, 128>}]} {
    %c0 = arith.constant 0 : index
    %c0_0 = arith.constant 0 : index
    %0 = vector.load %arg3[%c0, %c0_0] : memref<1x64xf32, #tpu.memory_space<vmem>>, vector<1x64xf32>
    %c0_1 = arith.constant 0 : index
    %c0_2 = arith.constant 0 : index
    %1 = vector.load %arg4[%c0_1, %c0_2] : memref<5x64xf32, #tpu.memory_space<vmem>>, vector<5x64xf32>
    %c0_3 = arith.constant 0 : index
    %c0_4 = arith.constant 0 : index
    %2 = vector.load %arg5[%c0_3, %c0_4] : memref<1x64xf32, #tpu.memory_space<vmem>>, vector<1x64xf32>
    %c0_5 = arith.constant 0 : index
    %c0_6 = arith.constant 0 : index
    %3 = vector.load %arg6[%c0_5, %c0_6] : memref<256x64xbf16, #tpu.memory_space<vmem>>, vector<256x64xbf16>
    %c0_7 = arith.constant 0 : index
    %c0_8 = arith.constant 0 : index
    %4 = vector.load %arg7[%c0_7, %c0_8] : memref<1x128xf32, #tpu.memory_space<vmem>>, vector<1x128xf32>
    %c0_9 = arith.constant 0 : index
    %c0_10 = arith.constant 0 : index
    %5 = vector.load %arg8[%c0_9, %c0_10] : memref<1x64xf32, #tpu.memory_space<vmem>>, vector<1x64xf32>
    %c0_11 = arith.constant 0 : index
    %c0_12 = arith.constant 0 : index
    %6 = vector.load %arg9[%c0_11, %c0_12] : memref<1x64xf32, #tpu.memory_space<vmem>>, vector<1x64xf32>
    %c0_13 = arith.constant 0 : index
    %c0_14 = arith.constant 0 : index
    %7 = vector.load %arg10[%c0_13, %c0_14] : memref<64x128xbf16, #tpu.memory_space<vmem>>, vector<64x128xbf16>
    %c0_15 = arith.constant 0 : index
    %c0_16 = arith.constant 0 : index
    %8 = vector.load %arg11[%c0_15, %c0_16] : memref<1x32xf32, #tpu.memory_space<vmem>>, vector<1x32xf32>
    %c0_17 = arith.constant 0 : index
    %c0_18 = arith.constant 0 : index
    %9 = vector.load %arg12[%c0_17, %c0_18] : memref<1x32xf32, #tpu.memory_space<vmem>>, vector<1x32xf32>
    %c0_19 = arith.constant 0 : index
    %c0_20 = arith.constant 0 : index
    %10 = vector.load %arg13[%c0_19, %c0_20] : memref<1x32xf32, #tpu.memory_space<vmem>>, vector<1x32xf32>
    %c0_21 = arith.constant 0 : index
    %c0_22 = arith.constant 0 : index
    %11 = vector.load %arg14[%c0_21, %c0_22] : memref<32x64xbf16, #tpu.memory_space<vmem>>, vector<32x64xbf16>
    %c0_23 = arith.constant 0 : index
    %c0_24 = arith.constant 0 : index
    %12 = vector.load %arg15[%c0_23, %c0_24] : memref<32x32xbf16, #tpu.memory_space<vmem>>, vector<32x32xbf16>
    %c0_25 = arith.constant 0 : index
    %c0_26 = arith.constant 0 : index
    %13 = vector.load %arg16[%c0_25, %c0_26] : memref<32x32xbf16, #tpu.memory_space<vmem>>, vector<32x32xbf16>
    %c0_27 = arith.constant 0 : index
    %c0_28 = arith.constant 0 : index
    %14 = vector.load %arg17[%c0_27, %c0_28] : memref<1x32xf32, #tpu.memory_space<vmem>>, vector<1x32xf32>
    %c0_29 = arith.constant 0 : index
    %c0_30 = arith.constant 0 : index
    %15 = vector.load %arg18[%c0_29, %c0_30] : memref<64x32xbf16, #tpu.memory_space<vmem>>, vector<64x32xbf16>
    %c0_31 = arith.constant 0 : index
    %c0_32 = arith.constant 0 : index
    %16 = vector.load %arg19[%c0_31, %c0_32] : memref<1x64xf32, #tpu.memory_space<vmem>>, vector<1x64xf32>
    %c0_33 = arith.constant 0 : index
    %c0_34 = arith.constant 0 : index
    %17 = vector.load %arg20[%c0_33, %c0_34] : memref<32x64xbf16, #tpu.memory_space<vmem>>, vector<32x64xbf16>
    %c0_35 = arith.constant 0 : index
    %c0_36 = arith.constant 0 : index
    %18 = vector.load %arg21[%c0_35, %c0_36] : memref<1x64xf32, #tpu.memory_space<vmem>>, vector<1x64xf32>
    %c0_37 = arith.constant 0 : index
    %c0_38 = arith.constant 0 : index
    %19 = vector.load %arg22[%c0_37, %c0_38] : memref<1x64xf32, #tpu.memory_space<vmem>>, vector<1x64xf32>
    %c0_39 = arith.constant 0 : index
    %c0_40 = arith.constant 0 : index
    %20 = vector.load %arg23[%c0_39, %c0_40] : memref<1x64xf32, #tpu.memory_space<vmem>>, vector<1x64xf32>
    %c0_41 = arith.constant 0 : index
    %c0_42 = arith.constant 0 : index
    %21 = vector.load %arg24[%c0_41, %c0_42] : memref<64x64xbf16, #tpu.memory_space<vmem>>, vector<64x64xbf16>
    %c0_43 = arith.constant 0 : index
    %c0_44 = arith.constant 0 : index
    %22 = vector.load %arg25[%c0_43, %c0_44] : memref<32x64xbf16, #tpu.memory_space<vmem>>, vector<32x64xbf16>
    %c0_45 = arith.constant 0 : index
    %c0_46 = arith.constant 0 : index
    %23 = vector.load %arg26[%c0_45, %c0_46] : memref<64x32xbf16, #tpu.memory_space<vmem>>, vector<64x32xbf16>
    %c0_47 = arith.constant 0 : index
    %c0_48 = arith.constant 0 : index
    %24 = vector.load %arg27[%c0_47, %c0_48] : memref<1x64xf32, #tpu.memory_space<vmem>>, vector<1x64xf32>
    %c0_49 = arith.constant 0 : index
    %c0_50 = arith.constant 0 : index
    %25 = vector.load %arg28[%c0_49, %c0_50] : memref<32x64xbf16, #tpu.memory_space<vmem>>, vector<32x64xbf16>
    %c0_51 = arith.constant 0 : index
    %c0_52 = arith.constant 0 : index
    %26 = vector.load %arg29[%c0_51, %c0_52] : memref<1x32xf32, #tpu.memory_space<vmem>>, vector<1x32xf32>
    %c0_53 = arith.constant 0 : index
    %c0_54 = arith.constant 0 : index
    %27 = vector.load %arg30[%c0_53, %c0_54] : memref<64x32xbf16, #tpu.memory_space<vmem>>, vector<64x32xbf16>
    %c0_55 = arith.constant 0 : index
    %c0_56 = arith.constant 0 : index
    %28 = vector.load %arg31[%c0_55, %c0_56] : memref<1x64xf32, #tpu.memory_space<vmem>>, vector<1x64xf32>
    %c0_57 = arith.constant 0 : index
    %c0_58 = arith.constant 0 : index
    %29 = vector.load %arg32[%c0_57, %c0_58] : memref<1x64xf32, #tpu.memory_space<vmem>>, vector<1x64xf32>
    %c0_59 = arith.constant 0 : index
    %c0_60 = arith.constant 0 : index
    %30 = vector.load %arg33[%c0_59, %c0_60] : memref<1x64xf32, #tpu.memory_space<vmem>>, vector<1x64xf32>
    %c0_61 = arith.constant 0 : index
    %c0_62 = arith.constant 0 : index
    %31 = vector.load %arg34[%c0_61, %c0_62] : memref<1x64xf32, #tpu.memory_space<vmem>>, vector<1x64xf32>
    %c0_63 = arith.constant 0 : index
    %c0_64 = arith.constant 0 : index
    %32 = vector.load %arg35[%c0_63, %c0_64] : memref<1x64xf32, #tpu.memory_space<vmem>>, vector<1x64xf32>
    %c0_65 = arith.constant 0 : index
    %c0_66 = arith.constant 0 : index
    %33 = vector.load %arg36[%c0_65, %c0_66] : memref<32x64xbf16, #tpu.memory_space<vmem>>, vector<32x64xbf16>
    %c0_67 = arith.constant 0 : index
    %c0_68 = arith.constant 0 : index
    %34 = vector.load %arg37[%c0_67, %c0_68] : memref<64x96xbf16, #tpu.memory_space<vmem>>, vector<64x96xbf16>
    %c0_69 = arith.constant 0 : index
    %c0_70 = arith.constant 0 : index
    %35 = vector.load %arg38[%c0_69, %c0_70] : memref<1x128xf32, #tpu.memory_space<vmem>>, vector<1x128xf32>
    %c0_71 = arith.constant 0 : index
    %c0_72 = arith.constant 0 : index
    %36 = vector.load %arg39[%c0_71, %c0_72] : memref<64x128xbf16, #tpu.memory_space<vmem>>, vector<64x128xbf16>
    %c0_73 = arith.constant 0 : index
    %c0_74 = arith.constant 0 : index
    %37 = vector.load %arg40[%c0_73, %c0_74] : memref<1x64xf32, #tpu.memory_space<vmem>>, vector<1x64xf32>
    %c0_75 = arith.constant 0 : index
    %c0_76 = arith.constant 0 : index
    %38 = vector.load %arg41[%c0_75, %c0_76] : memref<128x64xbf16, #tpu.memory_space<vmem>>, vector<128x64xbf16>
    %c0_77 = arith.constant 0 : index
    %c0_78 = arith.constant 0 : index
    %39 = vector.load %arg42[%c0_77, %c0_78] : memref<1x64xf32, #tpu.memory_space<vmem>>, vector<1x64xf32>
    %c0_79 = arith.constant 0 : index
    %c0_80 = arith.constant 0 : index
    %40 = vector.load %arg43[%c0_79, %c0_80] : memref<1x64xf32, #tpu.memory_space<vmem>>, vector<1x64xf32>
    %c0_81 = arith.constant 0 : index
    %c0_82 = arith.constant 0 : index
    %41 = vector.load %arg44[%c0_81, %c0_82] : memref<1x32xf32, #tpu.memory_space<vmem>>, vector<1x32xf32>
    %c0_83 = arith.constant 0 : index
    %c0_84 = arith.constant 0 : index
    %42 = vector.load %arg45[%c0_83, %c0_84] : memref<1x32xf32, #tpu.memory_space<vmem>>, vector<1x32xf32>
    %c0_85 = arith.constant 0 : index
    %c0_86 = arith.constant 0 : index
    %43 = vector.load %arg46[%c0_85, %c0_86] : memref<1x32xf32, #tpu.memory_space<vmem>>, vector<1x32xf32>
    %c0_87 = arith.constant 0 : index
    %c0_88 = arith.constant 0 : index
    %44 = vector.load %arg47[%c0_87, %c0_88] : memref<1x32xf32, #tpu.memory_space<vmem>>, vector<1x32xf32>
    %c0_89 = arith.constant 0 : index
    %c0_90 = arith.constant 0 : index
    %45 = vector.load %arg48[%c0_89, %c0_90] : memref<1x32xf32, #tpu.memory_space<vmem>>, vector<1x32xf32>
    %c0_91 = arith.constant 0 : index
    %c0_92 = arith.constant 0 : index
    %46 = vector.load %arg49[%c0_91, %c0_92] : memref<32x32xbf16, #tpu.memory_space<vmem>>, vector<32x32xbf16>
    %c0_93 = arith.constant 0 : index
    %c0_94 = arith.constant 0 : index
    %47 = vector.load %arg50[%c0_93, %c0_94] : memref<32x96xbf16, #tpu.memory_space<vmem>>, vector<32x96xbf16>
    %c0_95 = arith.constant 0 : index
    %c0_96 = arith.constant 0 : index
    %48 = vector.load %arg51[%c0_95, %c0_96] : memref<1x64xf32, #tpu.memory_space<vmem>>, vector<1x64xf32>
    %c0_97 = arith.constant 0 : index
    %c0_98 = arith.constant 0 : index
    %49 = vector.load %arg52[%c0_97, %c0_98] : memref<32x64xbf16, #tpu.memory_space<vmem>>, vector<32x64xbf16>
    %c0_99 = arith.constant 0 : index
    %c0_100 = arith.constant 0 : index
    %50 = vector.load %arg53[%c0_99, %c0_100] : memref<1x32xf32, #tpu.memory_space<vmem>>, vector<1x32xf32>
    %c0_101 = arith.constant 0 : index
    %c0_102 = arith.constant 0 : index
    %51 = vector.load %arg54[%c0_101, %c0_102] : memref<64x32xbf16, #tpu.memory_space<vmem>>, vector<64x32xbf16>
    %c0_103 = arith.constant 0 : index
    %c0_104 = arith.constant 0 : index
    %52 = vector.load %arg55[%c0_103, %c0_104] : memref<1x32xf32, #tpu.memory_space<vmem>>, vector<1x32xf32>
    %c0_105 = arith.constant 0 : index
    %c0_106 = arith.constant 0 : index
    %53 = vector.load %arg56[%c0_105, %c0_106] : memref<1x32xf32, #tpu.memory_space<vmem>>, vector<1x32xf32>
    %c0_107 = arith.constant 0 : index
    %c0_108 = arith.constant 0 : index
    %54 = vector.load %arg57[%c0_107, %c0_108] : memref<1x32xf32, #tpu.memory_space<vmem>>, vector<1x32xf32>
    %c0_109 = arith.constant 0 : index
    %c0_110 = arith.constant 0 : index
    %55 = vector.load %arg58[%c0_109, %c0_110] : memref<17x32xf32, #tpu.memory_space<vmem>>, vector<17x32xf32>
    %c0_111 = arith.constant 0 : index
    %c0_112 = arith.constant 0 : index
    %56 = vector.load %arg59[%c0_111, %c0_112] : memref<1x32xf32, #tpu.memory_space<vmem>>, vector<1x32xf32>
    %c0_113 = arith.constant 0 : index
    %c0_114 = arith.constant 0 : index
    %57 = vector.load %arg60[%c0_113, %c0_114] : memref<64x32xbf16, #tpu.memory_space<vmem>>, vector<64x32xbf16>
    %c0_115 = arith.constant 0 : index
    %c0_116 = arith.constant 0 : index
    %58 = vector.load %arg61[%c0_115, %c0_116] : memref<1x128xf32, #tpu.memory_space<vmem>>, vector<1x128xf32>
    %c0_117 = arith.constant 0 : index
    %c0_118 = arith.constant 0 : index
    %59 = vector.load %arg62[%c0_117, %c0_118] : memref<1x32xf32, #tpu.memory_space<vmem>>, vector<1x32xf32>
    %c0_119 = arith.constant 0 : index
    %c0_120 = arith.constant 0 : index
    %60 = vector.load %arg63[%c0_119, %c0_120] : memref<1x32xf32, #tpu.memory_space<vmem>>, vector<1x32xf32>
    %c0_121 = arith.constant 0 : index
    %c0_122 = arith.constant 0 : index
    %61 = vector.load %arg64[%c0_121, %c0_122] : memref<32x128xbf16, #tpu.memory_space<vmem>>, vector<32x128xbf16>
    %c0_123 = arith.constant 0 : index
    %c0_124 = arith.constant 0 : index
    %c0_125 = arith.constant 0 : index
    %62 = vector.load %arg1[%c0_123, %c0_124, %c0_125] : memref<1x16x64xf32, #tpu.memory_space<vmem>>, vector<1x16x64xf32>
    %63 = vector.shape_cast %62 : vector<1x16x64xf32> to vector<16x64xf32>
    %64 = arith.truncf %63 : vector<16x64xf32> to vector<16x64xbf16>
    %cst = arith.constant dense<0.000000e+00> : vector<16x32xf32>
    %65 = tpu.matmul %64, %57, %cst {dimension_numbers = #tpu.dot_dimension_numbers<[1], [0], [0], [1], [0, 0, 1, 1], [], []>} : vector<16x64xbf16>, vector<64x32xbf16>, vector<16x32xf32> -> vector<16x32xf32>
    %66 = vector.broadcast %56 : vector<1x32xf32> to vector<16x32xf32>
    %67 = arith.addf %65, %66 : vector<16x32xf32>
    %68 = tpu.concatenate %54, %67 in 0 : vector<1x32xf32>, vector<16x32xf32> -> vector<17x32xf32>
    %69 = arith.addf %68, %55 : vector<17x32xf32>
    %c0_126 = arith.constant 0 : index
    %c0_127 = arith.constant 0 : index
    %c0_128 = arith.constant 0 : index
    %70 = vector.load %arg2[%c0_126, %c0_127, %c0_128] : memref<1x4x256xf32, #tpu.memory_space<vmem>>, vector<1x4x256xf32>
    %71 = vector.shape_cast %70 : vector<1x4x256xf32> to vector<4x256xf32>
    %72 = arith.truncf %71 : vector<4x256xf32> to vector<4x256xbf16>
    %cst_129 = arith.constant dense<0.000000e+00> : vector<4x64xf32>
    %73 = tpu.matmul %72, %3, %cst_129 {dimension_numbers = #tpu.dot_dimension_numbers<[1], [0], [0], [1], [0, 0, 1, 1], [], []>} : vector<4x256xbf16>, vector<256x64xbf16>, vector<4x64xf32> -> vector<4x64xf32>
    %74 = vector.broadcast %2 : vector<1x64xf32> to vector<4x64xf32>
    %75 = arith.addf %73, %74 : vector<4x64xf32>
    %76 = tpu.concatenate %0, %75 in 0 : vector<1x64xf32>, vector<4x64xf32> -> vector<5x64xf32>
    %77 = arith.addf %76, %1 : vector<5x64xf32>
    %cst_130 = arith.constant dense<0.000000e+00> : vector<17xf32>
    %78 = vector.multi_reduction <add>, %69, %cst_130 [1] : vector<17x32xf32> to vector<17xf32>
    %79 = vector.shape_cast %78 : vector<17xf32> to vector<17x1xf32>
    %cst_131 = arith.constant 3.200000e+01 : f32
    %80 = vector.broadcast %cst_131 : f32 to vector<17x1xf32>
    %81 = arith.divf %79, %80 : vector<17x1xf32>
    %82 = vector.broadcast %81 : vector<17x1xf32> to vector<17x32xf32>
    %83 = arith.subf %69, %82 : vector<17x32xf32>
    %84 = arith.mulf %83, %83 : vector<17x32xf32>
    %cst_132 = arith.constant dense<0.000000e+00> : vector<17xf32>
    %85 = vector.multi_reduction <add>, %84, %cst_132 [1] : vector<17x32xf32> to vector<17xf32>
    %86 = vector.shape_cast %85 : vector<17xf32> to vector<17x1xf32>
    %cst_133 = arith.constant 3.200000e+01 : f32
    %87 = vector.broadcast %cst_133 : f32 to vector<17x1xf32>
    %88 = arith.divf %86, %87 : vector<17x1xf32>
    %89 = vector.broadcast %81 : vector<17x1xf32> to vector<17x32xf32>
    %90 = arith.subf %69, %89 : vector<17x32xf32>
    %cst_134 = arith.constant 9.99999974E-6 : f32
    %91 = vector.broadcast %cst_134 : f32 to vector<17x1xf32>
    %92 = arith.addf %88, %91 : vector<17x1xf32>
    %93 = math.rsqrt %92 : vector<17x1xf32>
    %94 = vector.broadcast %93 : vector<17x1xf32> to vector<17x32xf32>
    %95 = arith.mulf %90, %94 : vector<17x32xf32>
    %96 = vector.broadcast %45 : vector<1x32xf32> to vector<17x32xf32>
    %97 = arith.mulf %95, %96 : vector<17x32xf32>
    %98 = vector.broadcast %44 : vector<1x32xf32> to vector<17x32xf32>
    %99 = arith.addf %97, %98 : vector<17x32xf32>
    %100 = arith.truncf %99 : vector<17x32xf32> to vector<17x32xbf16>
    %cst_135 = arith.constant dense<0.000000e+00> : vector<17x96xf32>
    %101 = tpu.matmul %100, %47, %cst_135 {dimension_numbers = #tpu.dot_dimension_numbers<[1], [0], [0], [1], [0, 0, 1, 1], [], []>} : vector<17x32xbf16>, vector<32x96xbf16>, vector<17x96xf32> -> vector<17x96xf32>
    %102 = vector.extract_strided_slice %101 {offsets = [0, 0], sizes = [17, 32], strides = [1, 1]} : vector<17x96xf32> to vector<17x32xf32>
    %103 = vector.extract_strided_slice %101 {offsets = [0, 32], sizes = [17, 32], strides = [1, 1]} : vector<17x96xf32> to vector<17x32xf32>
    %104 = vector.extract_strided_slice %101 {offsets = [0, 64], sizes = [17, 32], strides = [1, 1]} : vector<17x96xf32> to vector<17x32xf32>
    %105 = vector.extract_strided_slice %102 {offsets = [0, 0], sizes = [17, 16], strides = [1, 1]} : vector<17x32xf32> to vector<17x16xf32>
    %106 = arith.truncf %105 : vector<17x16xf32> to vector<17x16xbf16>
    %107 = vector.extract_strided_slice %103 {offsets = [0, 0], sizes = [17, 16], strides = [1, 1]} : vector<17x32xf32> to vector<17x16xf32>
    %108 = arith.truncf %107 : vector<17x16xf32> to vector<17x16xbf16>
    %109 = vector.extract_strided_slice %104 {offsets = [0, 0], sizes = [17, 16], strides = [1, 1]} : vector<17x32xf32> to vector<17x16xf32>
    %110 = arith.truncf %109 : vector<17x16xf32> to vector<17x16xbf16>
    %cst_136 = arith.constant dense<0.000000e+00> : vector<17x17xf32>
    %111 = tpu.matmul %106, %108, %cst_136 {dimension_numbers = #tpu.dot_dimension_numbers<[1], [1], [0], [0], [0, 0, 1, 0], [], []>} : vector<17x16xbf16>, vector<17x16xbf16>, vector<17x17xf32> -> vector<17x17xf32>
    %cst_137 = arith.constant dense<0xFF800000> : vector<17xf32>
    %112 = vector.multi_reduction <maximumf>, %111, %cst_137 [1] : vector<17x17xf32> to vector<17xf32>
    %113 = vector.shape_cast %112 : vector<17xf32> to vector<17x1xf32>
    %114 = vector.broadcast %113 : vector<17x1xf32> to vector<17x17xf32>
    %115 = arith.subf %111, %114 : vector<17x17xf32>
    %116 = math.exp %115 : vector<17x17xf32>
    %cst_138 = arith.constant dense<0.000000e+00> : vector<17xf32>
    %117 = vector.multi_reduction <add>, %116, %cst_138 [1] : vector<17x17xf32> to vector<17xf32>
    %118 = vector.shape_cast %117 : vector<17xf32> to vector<17x1xf32>
    %119 = vector.broadcast %118 : vector<17x1xf32> to vector<17x17xf32>
    %120 = arith.divf %116, %119 : vector<17x17xf32>
    %121 = arith.truncf %120 : vector<17x17xf32> to vector<17x17xbf16>
    %cst_139 = arith.constant dense<0.000000e+00> : vector<17x16xf32>
    %122 = tpu.matmul %121, %110, %cst_139 {dimension_numbers = #tpu.dot_dimension_numbers<[1], [0], [0], [1], [0, 0, 1, 1], [], []>} : vector<17x17xbf16>, vector<17x16xbf16>, vector<17x16xf32> -> vector<17x16xf32>
    %123 = vector.extract_strided_slice %46 {offsets = [0, 0], sizes = [16, 32], strides = [1, 1]} : vector<32x32xbf16> to vector<16x32xbf16>
    %124 = arith.truncf %122 : vector<17x16xf32> to vector<17x16xbf16>
    %cst_140 = arith.constant dense<0.000000e+00> : vector<17x32xf32>
    %125 = tpu.matmul %124, %123, %cst_140 {dimension_numbers = #tpu.dot_dimension_numbers<[1], [0], [0], [1], [0, 0, 1, 1], [], []>} : vector<17x16xbf16>, vector<16x32xbf16>, vector<17x32xf32> -> vector<17x32xf32>
    %126 = vector.extract_strided_slice %102 {offsets = [0, 16], sizes = [17, 16], strides = [1, 1]} : vector<17x32xf32> to vector<17x16xf32>
    %127 = arith.truncf %126 : vector<17x16xf32> to vector<17x16xbf16>
    %128 = vector.extract_strided_slice %103 {offsets = [0, 16], sizes = [17, 16], strides = [1, 1]} : vector<17x32xf32> to vector<17x16xf32>
    %129 = arith.truncf %128 : vector<17x16xf32> to vector<17x16xbf16>
    %130 = vector.extract_strided_slice %104 {offsets = [0, 16], sizes = [17, 16], strides = [1, 1]} : vector<17x32xf32> to vector<17x16xf32>
    %131 = arith.truncf %130 : vector<17x16xf32> to vector<17x16xbf16>
    %cst_141 = arith.constant dense<0.000000e+00> : vector<17x17xf32>
    %132 = tpu.matmul %127, %129, %cst_141 {dimension_numbers = #tpu.dot_dimension_numbers<[1], [1], [0], [0], [0, 0, 1, 0], [], []>} : vector<17x16xbf16>, vector<17x16xbf16>, vector<17x17xf32> -> vector<17x17xf32>
    %cst_142 = arith.constant dense<0xFF800000> : vector<17xf32>
    %133 = vector.multi_reduction <maximumf>, %132, %cst_142 [1] : vector<17x17xf32> to vector<17xf32>
    %134 = vector.shape_cast %133 : vector<17xf32> to vector<17x1xf32>
    %135 = vector.broadcast %134 : vector<17x1xf32> to vector<17x17xf32>
    %136 = arith.subf %132, %135 : vector<17x17xf32>
    %137 = math.exp %136 : vector<17x17xf32>
    %cst_143 = arith.constant dense<0.000000e+00> : vector<17xf32>
    %138 = vector.multi_reduction <add>, %137, %cst_143 [1] : vector<17x17xf32> to vector<17xf32>
    %139 = vector.shape_cast %138 : vector<17xf32> to vector<17x1xf32>
    %140 = vector.broadcast %139 : vector<17x1xf32> to vector<17x17xf32>
    %141 = arith.divf %137, %140 : vector<17x17xf32>
    %142 = arith.truncf %141 : vector<17x17xf32> to vector<17x17xbf16>
    %cst_144 = arith.constant dense<0.000000e+00> : vector<17x16xf32>
    %143 = tpu.matmul %142, %131, %cst_144 {dimension_numbers = #tpu.dot_dimension_numbers<[1], [0], [0], [1], [0, 0, 1, 1], [], []>} : vector<17x17xbf16>, vector<17x16xbf16>, vector<17x16xf32> -> vector<17x16xf32>
    %144 = vector.extract_strided_slice %46 {offsets = [16, 0], sizes = [16, 32], strides = [1, 1]} : vector<32x32xbf16> to vector<16x32xbf16>
    %145 = arith.truncf %143 : vector<17x16xf32> to vector<17x16xbf16>
    %cst_145 = arith.constant dense<0.000000e+00> : vector<17x32xf32>
    %146 = tpu.matmul %145, %144, %cst_145 {dimension_numbers = #tpu.dot_dimension_numbers<[1], [0], [0], [1], [0, 0, 1, 1], [], []>} : vector<17x16xbf16>, vector<16x32xbf16>, vector<17x32xf32> -> vector<17x32xf32>
    %147 = arith.addf %125, %146 : vector<17x32xf32>
    %148 = vector.broadcast %43 : vector<1x32xf32> to vector<17x32xf32>
    %149 = arith.addf %147, %148 : vector<17x32xf32>
    %150 = arith.addf %69, %149 : vector<17x32xf32>
    %cst_146 = arith.constant dense<0.000000e+00> : vector<17xf32>
    %151 = vector.multi_reduction <add>, %150, %cst_146 [1] : vector<17x32xf32> to vector<17xf32>
    %152 = vector.shape_cast %151 : vector<17xf32> to vector<17x1xf32>
    %cst_147 = arith.constant 3.200000e+01 : f32
    %153 = vector.broadcast %cst_147 : f32 to vector<17x1xf32>
    %154 = arith.divf %152, %153 : vector<17x1xf32>
    %155 = vector.broadcast %154 : vector<17x1xf32> to vector<17x32xf32>
    %156 = arith.subf %150, %155 : vector<17x32xf32>
    %157 = arith.mulf %156, %156 : vector<17x32xf32>
    %cst_148 = arith.constant dense<0.000000e+00> : vector<17xf32>
    %158 = vector.multi_reduction <add>, %157, %cst_148 [1] : vector<17x32xf32> to vector<17xf32>
    %159 = vector.shape_cast %158 : vector<17xf32> to vector<17x1xf32>
    %cst_149 = arith.constant 3.200000e+01 : f32
    %160 = vector.broadcast %cst_149 : f32 to vector<17x1xf32>
    %161 = arith.divf %159, %160 : vector<17x1xf32>
    %162 = vector.broadcast %154 : vector<17x1xf32> to vector<17x32xf32>
    %163 = arith.subf %150, %162 : vector<17x32xf32>
    %cst_150 = arith.constant 9.99999974E-6 : f32
    %164 = vector.broadcast %cst_150 : f32 to vector<17x1xf32>
    %165 = arith.addf %161, %164 : vector<17x1xf32>
    %166 = math.rsqrt %165 : vector<17x1xf32>
    %167 = vector.broadcast %166 : vector<17x1xf32> to vector<17x32xf32>
    %168 = arith.mulf %163, %167 : vector<17x32xf32>
    %169 = vector.broadcast %53 : vector<1x32xf32> to vector<17x32xf32>
    %170 = arith.mulf %168, %169 : vector<17x32xf32>
    %171 = vector.broadcast %52 : vector<1x32xf32> to vector<17x32xf32>
    %172 = arith.addf %170, %171 : vector<17x32xf32>
    %173 = arith.truncf %172 : vector<17x32xf32> to vector<17x32xbf16>
    %cst_151 = arith.constant dense<0.000000e+00> : vector<17x64xf32>
    %174 = tpu.matmul %173, %49, %cst_151 {dimension_numbers = #tpu.dot_dimension_numbers<[1], [0], [0], [1], [0, 0, 1, 1], [], []>} : vector<17x32xbf16>, vector<32x64xbf16>, vector<17x64xf32> -> vector<17x64xf32>
    %175 = vector.broadcast %48 : vector<1x64xf32> to vector<17x64xf32>
    %176 = arith.addf %174, %175 : vector<17x64xf32>
    %cst_152 = arith.constant 5.000000e-01 : f32
    %177 = vector.broadcast %cst_152 : f32 to vector<17x64xf32>
    %178 = arith.mulf %177, %176 : vector<17x64xf32>
    %cst_153 = arith.constant 0.707106769 : f32
    %179 = vector.broadcast %cst_153 : f32 to vector<17x64xf32>
    %180 = arith.mulf %176, %179 : vector<17x64xf32>
    %181 = math.erf %180 : vector<17x64xf32>
    %cst_154 = arith.constant 1.000000e+00 : f32
    %182 = vector.broadcast %cst_154 : f32 to vector<17x64xf32>
    %183 = arith.addf %182, %181 : vector<17x64xf32>
    %184 = arith.mulf %178, %183 : vector<17x64xf32>
    %185 = arith.truncf %184 : vector<17x64xf32> to vector<17x64xbf16>
    %cst_155 = arith.constant dense<0.000000e+00> : vector<17x32xf32>
    %186 = tpu.matmul %185, %51, %cst_155 {dimension_numbers = #tpu.dot_dimension_numbers<[1], [0], [0], [1], [0, 0, 1, 1], [], []>} : vector<17x64xbf16>, vector<64x32xbf16>, vector<17x32xf32> -> vector<17x32xf32>
    %187 = vector.broadcast %50 : vector<1x32xf32> to vector<17x32xf32>
    %188 = arith.addf %186, %187 : vector<17x32xf32>
    %189 = arith.addf %150, %188 : vector<17x32xf32>
    %cst_156 = arith.constant dense<0.000000e+00> : vector<17xf32>
    %190 = vector.multi_reduction <add>, %189, %cst_156 [1] : vector<17x32xf32> to vector<17xf32>
    %191 = vector.shape_cast %190 : vector<17xf32> to vector<17x1xf32>
    %cst_157 = arith.constant 3.200000e+01 : f32
    %192 = vector.broadcast %cst_157 : f32 to vector<17x1xf32>
    %193 = arith.divf %191, %192 : vector<17x1xf32>
    %194 = vector.broadcast %193 : vector<17x1xf32> to vector<17x32xf32>
    %195 = arith.subf %189, %194 : vector<17x32xf32>
    %196 = arith.mulf %195, %195 : vector<17x32xf32>
    %cst_158 = arith.constant dense<0.000000e+00> : vector<17xf32>
    %197 = vector.multi_reduction <add>, %196, %cst_158 [1] : vector<17x32xf32> to vector<17xf32>
    %198 = vector.shape_cast %197 : vector<17xf32> to vector<17x1xf32>
    %cst_159 = arith.constant 3.200000e+01 : f32
    %199 = vector.broadcast %cst_159 : f32 to vector<17x1xf32>
    %200 = arith.divf %198, %199 : vector<17x1xf32>
    %201 = vector.broadcast %193 : vector<17x1xf32> to vector<17x32xf32>
    %202 = arith.subf %189, %201 : vector<17x32xf32>
    %cst_160 = arith.constant 9.99999974E-6 : f32
    %203 = vector.broadcast %cst_160 : f32 to vector<17x1xf32>
    %204 = arith.addf %200, %203 : vector<17x1xf32>
    %205 = math.rsqrt %204 : vector<17x1xf32>
    %206 = vector.broadcast %205 : vector<17x1xf32> to vector<17x32xf32>
    %207 = arith.mulf %202, %206 : vector<17x32xf32>
    %208 = vector.broadcast %42 : vector<1x32xf32> to vector<17x32xf32>
    %209 = arith.mulf %207, %208 : vector<17x32xf32>
    %210 = vector.broadcast %41 : vector<1x32xf32> to vector<17x32xf32>
    %211 = arith.addf %209, %210 : vector<17x32xf32>
    %cst_161 = arith.constant dense<0.000000e+00> : vector<5xf32>
    %212 = vector.multi_reduction <add>, %77, %cst_161 [1] : vector<5x64xf32> to vector<5xf32>
    %213 = vector.shape_cast %212 : vector<5xf32> to vector<5x1xf32>
    %cst_162 = arith.constant 6.400000e+01 : f32
    %214 = vector.broadcast %cst_162 : f32 to vector<5x1xf32>
    %215 = arith.divf %213, %214 : vector<5x1xf32>
    %216 = vector.broadcast %215 : vector<5x1xf32> to vector<5x64xf32>
    %217 = arith.subf %77, %216 : vector<5x64xf32>
    %218 = arith.mulf %217, %217 : vector<5x64xf32>
    %cst_163 = arith.constant dense<0.000000e+00> : vector<5xf32>
    %219 = vector.multi_reduction <add>, %218, %cst_163 [1] : vector<5x64xf32> to vector<5xf32>
    %220 = vector.shape_cast %219 : vector<5xf32> to vector<5x1xf32>
    %cst_164 = arith.constant 6.400000e+01 : f32
    %221 = vector.broadcast %cst_164 : f32 to vector<5x1xf32>
    %222 = arith.divf %220, %221 : vector<5x1xf32>
    %223 = vector.broadcast %215 : vector<5x1xf32> to vector<5x64xf32>
    %224 = arith.subf %77, %223 : vector<5x64xf32>
    %cst_165 = arith.constant 9.99999974E-6 : f32
    %225 = vector.broadcast %cst_165 : f32 to vector<5x1xf32>
    %226 = arith.addf %222, %225 : vector<5x1xf32>
    %227 = math.rsqrt %226 : vector<5x1xf32>
    %228 = vector.broadcast %227 : vector<5x1xf32> to vector<5x64xf32>
    %229 = arith.mulf %224, %228 : vector<5x64xf32>
    %230 = vector.broadcast %32 : vector<1x64xf32> to vector<5x64xf32>
    %231 = arith.mulf %229, %230 : vector<5x64xf32>
    %232 = vector.broadcast %31 : vector<1x64xf32> to vector<5x64xf32>
    %233 = arith.addf %231, %232 : vector<5x64xf32>
    %234 = arith.truncf %233 : vector<5x64xf32> to vector<5x64xbf16>
    %cst_166 = arith.constant dense<0.000000e+00> : vector<5x96xf32>
    %235 = tpu.matmul %234, %34, %cst_166 {dimension_numbers = #tpu.dot_dimension_numbers<[1], [0], [0], [1], [0, 0, 1, 1], [], []>} : vector<5x64xbf16>, vector<64x96xbf16>, vector<5x96xf32> -> vector<5x96xf32>
    %236 = vector.extract_strided_slice %235 {offsets = [0, 0], sizes = [5, 32], strides = [1, 1]} : vector<5x96xf32> to vector<5x32xf32>
    %237 = vector.extract_strided_slice %235 {offsets = [0, 32], sizes = [5, 32], strides = [1, 1]} : vector<5x96xf32> to vector<5x32xf32>
    %238 = vector.extract_strided_slice %235 {offsets = [0, 64], sizes = [5, 32], strides = [1, 1]} : vector<5x96xf32> to vector<5x32xf32>
    %239 = vector.extract_strided_slice %236 {offsets = [0, 0], sizes = [5, 16], strides = [1, 1]} : vector<5x32xf32> to vector<5x16xf32>
    %240 = arith.truncf %239 : vector<5x16xf32> to vector<5x16xbf16>
    %241 = vector.extract_strided_slice %237 {offsets = [0, 0], sizes = [5, 16], strides = [1, 1]} : vector<5x32xf32> to vector<5x16xf32>
    %242 = arith.truncf %241 : vector<5x16xf32> to vector<5x16xbf16>
    %243 = vector.extract_strided_slice %238 {offsets = [0, 0], sizes = [5, 16], strides = [1, 1]} : vector<5x32xf32> to vector<5x16xf32>
    %244 = arith.truncf %243 : vector<5x16xf32> to vector<5x16xbf16>
    %cst_167 = arith.constant dense<0.000000e+00> : vector<5x5xf32>
    %245 = tpu.matmul %240, %242, %cst_167 {dimension_numbers = #tpu.dot_dimension_numbers<[1], [1], [0], [0], [0, 0, 1, 0], [], []>} : vector<5x16xbf16>, vector<5x16xbf16>, vector<5x5xf32> -> vector<5x5xf32>
    %cst_168 = arith.constant dense<0xFF800000> : vector<5xf32>
    %246 = vector.multi_reduction <maximumf>, %245, %cst_168 [1] : vector<5x5xf32> to vector<5xf32>
    %247 = vector.shape_cast %246 : vector<5xf32> to vector<5x1xf32>
    %248 = vector.broadcast %247 : vector<5x1xf32> to vector<5x5xf32>
    %249 = arith.subf %245, %248 : vector<5x5xf32>
    %250 = math.exp %249 : vector<5x5xf32>
    %cst_169 = arith.constant dense<0.000000e+00> : vector<5xf32>
    %251 = vector.multi_reduction <add>, %250, %cst_169 [1] : vector<5x5xf32> to vector<5xf32>
    %252 = vector.shape_cast %251 : vector<5xf32> to vector<5x1xf32>
    %253 = vector.broadcast %252 : vector<5x1xf32> to vector<5x5xf32>
    %254 = arith.divf %250, %253 : vector<5x5xf32>
    %255 = arith.truncf %254 : vector<5x5xf32> to vector<5x5xbf16>
    %cst_170 = arith.constant dense<0.000000e+00> : vector<5x16xf32>
    %256 = tpu.matmul %255, %244, %cst_170 {dimension_numbers = #tpu.dot_dimension_numbers<[1], [0], [0], [1], [0, 0, 1, 1], [], []>} : vector<5x5xbf16>, vector<5x16xbf16>, vector<5x16xf32> -> vector<5x16xf32>
    %257 = vector.extract_strided_slice %33 {offsets = [0, 0], sizes = [16, 64], strides = [1, 1]} : vector<32x64xbf16> to vector<16x64xbf16>
    %258 = arith.truncf %256 : vector<5x16xf32> to vector<5x16xbf16>
    %cst_171 = arith.constant dense<0.000000e+00> : vector<5x64xf32>
    %259 = tpu.matmul %258, %257, %cst_171 {dimension_numbers = #tpu.dot_dimension_numbers<[1], [0], [0], [1], [0, 0, 1, 1], [], []>} : vector<5x16xbf16>, vector<16x64xbf16>, vector<5x64xf32> -> vector<5x64xf32>
    %260 = vector.extract_strided_slice %236 {offsets = [0, 16], sizes = [5, 16], strides = [1, 1]} : vector<5x32xf32> to vector<5x16xf32>
    %261 = arith.truncf %260 : vector<5x16xf32> to vector<5x16xbf16>
    %262 = vector.extract_strided_slice %237 {offsets = [0, 16], sizes = [5, 16], strides = [1, 1]} : vector<5x32xf32> to vector<5x16xf32>
    %263 = arith.truncf %262 : vector<5x16xf32> to vector<5x16xbf16>
    %264 = vector.extract_strided_slice %238 {offsets = [0, 16], sizes = [5, 16], strides = [1, 1]} : vector<5x32xf32> to vector<5x16xf32>
    %265 = arith.truncf %264 : vector<5x16xf32> to vector<5x16xbf16>
    %cst_172 = arith.constant dense<0.000000e+00> : vector<5x5xf32>
    %266 = tpu.matmul %261, %263, %cst_172 {dimension_numbers = #tpu.dot_dimension_numbers<[1], [1], [0], [0], [0, 0, 1, 0], [], []>} : vector<5x16xbf16>, vector<5x16xbf16>, vector<5x5xf32> -> vector<5x5xf32>
    %cst_173 = arith.constant dense<0xFF800000> : vector<5xf32>
    %267 = vector.multi_reduction <maximumf>, %266, %cst_173 [1] : vector<5x5xf32> to vector<5xf32>
    %268 = vector.shape_cast %267 : vector<5xf32> to vector<5x1xf32>
    %269 = vector.broadcast %268 : vector<5x1xf32> to vector<5x5xf32>
    %270 = arith.subf %266, %269 : vector<5x5xf32>
    %271 = math.exp %270 : vector<5x5xf32>
    %cst_174 = arith.constant dense<0.000000e+00> : vector<5xf32>
    %272 = vector.multi_reduction <add>, %271, %cst_174 [1] : vector<5x5xf32> to vector<5xf32>
    %273 = vector.shape_cast %272 : vector<5xf32> to vector<5x1xf32>
    %274 = vector.broadcast %273 : vector<5x1xf32> to vector<5x5xf32>
    %275 = arith.divf %271, %274 : vector<5x5xf32>
    %276 = arith.truncf %275 : vector<5x5xf32> to vector<5x5xbf16>
    %cst_175 = arith.constant dense<0.000000e+00> : vector<5x16xf32>
    %277 = tpu.matmul %276, %265, %cst_175 {dimension_numbers = #tpu.dot_dimension_numbers<[1], [0], [0], [1], [0, 0, 1, 1], [], []>} : vector<5x5xbf16>, vector<5x16xbf16>, vector<5x16xf32> -> vector<5x16xf32>
    %278 = vector.extract_strided_slice %33 {offsets = [16, 0], sizes = [16, 64], strides = [1, 1]} : vector<32x64xbf16> to vector<16x64xbf16>
    %279 = arith.truncf %277 : vector<5x16xf32> to vector<5x16xbf16>
    %cst_176 = arith.constant dense<0.000000e+00> : vector<5x64xf32>
    %280 = tpu.matmul %279, %278, %cst_176 {dimension_numbers = #tpu.dot_dimension_numbers<[1], [0], [0], [1], [0, 0, 1, 1], [], []>} : vector<5x16xbf16>, vector<16x64xbf16>, vector<5x64xf32> -> vector<5x64xf32>
    %281 = arith.addf %259, %280 : vector<5x64xf32>
    %282 = vector.broadcast %30 : vector<1x64xf32> to vector<5x64xf32>
    %283 = arith.addf %281, %282 : vector<5x64xf32>
    %284 = arith.addf %77, %283 : vector<5x64xf32>
    %cst_177 = arith.constant dense<0.000000e+00> : vector<5xf32>
    %285 = vector.multi_reduction <add>, %284, %cst_177 [1] : vector<5x64xf32> to vector<5xf32>
    %286 = vector.shape_cast %285 : vector<5xf32> to vector<5x1xf32>
    %cst_178 = arith.constant 6.400000e+01 : f32
    %287 = vector.broadcast %cst_178 : f32 to vector<5x1xf32>
    %288 = arith.divf %286, %287 : vector<5x1xf32>
    %289 = vector.broadcast %288 : vector<5x1xf32> to vector<5x64xf32>
    %290 = arith.subf %284, %289 : vector<5x64xf32>
    %291 = arith.mulf %290, %290 : vector<5x64xf32>
    %cst_179 = arith.constant dense<0.000000e+00> : vector<5xf32>
    %292 = vector.multi_reduction <add>, %291, %cst_179 [1] : vector<5x64xf32> to vector<5xf32>
    %293 = vector.shape_cast %292 : vector<5xf32> to vector<5x1xf32>
    %cst_180 = arith.constant 6.400000e+01 : f32
    %294 = vector.broadcast %cst_180 : f32 to vector<5x1xf32>
    %295 = arith.divf %293, %294 : vector<5x1xf32>
    %296 = vector.broadcast %288 : vector<5x1xf32> to vector<5x64xf32>
    %297 = arith.subf %284, %296 : vector<5x64xf32>
    %cst_181 = arith.constant 9.99999974E-6 : f32
    %298 = vector.broadcast %cst_181 : f32 to vector<5x1xf32>
    %299 = arith.addf %295, %298 : vector<5x1xf32>
    %300 = math.rsqrt %299 : vector<5x1xf32>
    %301 = vector.broadcast %300 : vector<5x1xf32> to vector<5x64xf32>
    %302 = arith.mulf %297, %301 : vector<5x64xf32>
    %303 = vector.broadcast %40 : vector<1x64xf32> to vector<5x64xf32>
    %304 = arith.mulf %302, %303 : vector<5x64xf32>
    %305 = vector.broadcast %39 : vector<1x64xf32> to vector<5x64xf32>
    %306 = arith.addf %304, %305 : vector<5x64xf32>
    %307 = arith.truncf %306 : vector<5x64xf32> to vector<5x64xbf16>
    %cst_182 = arith.constant dense<0.000000e+00> : vector<5x128xf32>
    %308 = tpu.matmul %307, %36, %cst_182 {dimension_numbers = #tpu.dot_dimension_numbers<[1], [0], [0], [1], [0, 0, 1, 1], [], []>} : vector<5x64xbf16>, vector<64x128xbf16>, vector<5x128xf32> -> vector<5x128xf32>
    %309 = vector.broadcast %35 : vector<1x128xf32> to vector<5x128xf32>
    %310 = arith.addf %308, %309 : vector<5x128xf32>
    %cst_183 = arith.constant 5.000000e-01 : f32
    %311 = vector.broadcast %cst_183 : f32 to vector<5x128xf32>
    %312 = arith.mulf %311, %310 : vector<5x128xf32>
    %cst_184 = arith.constant 0.707106769 : f32
    %313 = vector.broadcast %cst_184 : f32 to vector<5x128xf32>
    %314 = arith.mulf %310, %313 : vector<5x128xf32>
    %315 = math.erf %314 : vector<5x128xf32>
    %cst_185 = arith.constant 1.000000e+00 : f32
    %316 = vector.broadcast %cst_185 : f32 to vector<5x128xf32>
    %317 = arith.addf %316, %315 : vector<5x128xf32>
    %318 = arith.mulf %312, %317 : vector<5x128xf32>
    %319 = arith.truncf %318 : vector<5x128xf32> to vector<5x128xbf16>
    %cst_186 = arith.constant dense<0.000000e+00> : vector<5x64xf32>
    %320 = tpu.matmul %319, %38, %cst_186 {dimension_numbers = #tpu.dot_dimension_numbers<[1], [0], [0], [1], [0, 0, 1, 1], [], []>} : vector<5x128xbf16>, vector<128x64xbf16>, vector<5x64xf32> -> vector<5x64xf32>
    %321 = vector.broadcast %37 : vector<1x64xf32> to vector<5x64xf32>
    %322 = arith.addf %320, %321 : vector<5x64xf32>
    %323 = arith.addf %284, %322 : vector<5x64xf32>
    %cst_187 = arith.constant dense<0.000000e+00> : vector<5xf32>
    %324 = vector.multi_reduction <add>, %323, %cst_187 [1] : vector<5x64xf32> to vector<5xf32>
    %325 = vector.shape_cast %324 : vector<5xf32> to vector<5x1xf32>
    %cst_188 = arith.constant 6.400000e+01 : f32
    %326 = vector.broadcast %cst_188 : f32 to vector<5x1xf32>
    %327 = arith.divf %325, %326 : vector<5x1xf32>
    %328 = vector.broadcast %327 : vector<5x1xf32> to vector<5x64xf32>
    %329 = arith.subf %323, %328 : vector<5x64xf32>
    %330 = arith.mulf %329, %329 : vector<5x64xf32>
    %cst_189 = arith.constant dense<0.000000e+00> : vector<5xf32>
    %331 = vector.multi_reduction <add>, %330, %cst_189 [1] : vector<5x64xf32> to vector<5xf32>
    %332 = vector.shape_cast %331 : vector<5xf32> to vector<5x1xf32>
    %cst_190 = arith.constant 6.400000e+01 : f32
    %333 = vector.broadcast %cst_190 : f32 to vector<5x1xf32>
    %334 = arith.divf %332, %333 : vector<5x1xf32>
    %335 = vector.broadcast %327 : vector<5x1xf32> to vector<5x64xf32>
    %336 = arith.subf %323, %335 : vector<5x64xf32>
    %cst_191 = arith.constant 9.99999974E-6 : f32
    %337 = vector.broadcast %cst_191 : f32 to vector<5x1xf32>
    %338 = arith.addf %334, %337 : vector<5x1xf32>
    %339 = math.rsqrt %338 : vector<5x1xf32>
    %340 = vector.broadcast %339 : vector<5x1xf32> to vector<5x64xf32>
    %341 = arith.mulf %336, %340 : vector<5x64xf32>
    %342 = vector.broadcast %29 : vector<1x64xf32> to vector<5x64xf32>
    %343 = arith.mulf %341, %342 : vector<5x64xf32>
    %344 = vector.broadcast %28 : vector<1x64xf32> to vector<5x64xf32>
    %345 = arith.addf %343, %344 : vector<5x64xf32>
    %346 = vector.extract_strided_slice %211 {offsets = [0, 0], sizes = [1, 32], strides = [1, 1]} : vector<17x32xf32> to vector<1x32xf32>
    %347 = vector.extract_strided_slice %211 {offsets = [1, 0], sizes = [16, 32], strides = [1, 1]} : vector<17x32xf32> to vector<16x32xf32>
    %348 = vector.extract_strided_slice %345 {offsets = [0, 0], sizes = [1, 64], strides = [1, 1]} : vector<5x64xf32> to vector<1x64xf32>
    %349 = vector.extract_strided_slice %345 {offsets = [1, 0], sizes = [4, 64], strides = [1, 1]} : vector<5x64xf32> to vector<4x64xf32>
    %350 = arith.truncf %346 : vector<1x32xf32> to vector<1x32xbf16>
    %cst_192 = arith.constant dense<0.000000e+00> : vector<1x64xf32>
    %351 = tpu.matmul %350, %25, %cst_192 {dimension_numbers = #tpu.dot_dimension_numbers<[1], [0], [0], [1], [0, 0, 1, 1], [], []>} : vector<1x32xbf16>, vector<32x64xbf16>, vector<1x64xf32> -> vector<1x64xf32>
    %352 = arith.addf %351, %24 : vector<1x64xf32>
    %cst_193 = arith.constant dense<0.000000e+00> : vector<1xf32>
    %353 = vector.multi_reduction <add>, %352, %cst_193 [1] : vector<1x64xf32> to vector<1xf32>
    %354 = vector.shape_cast %353 : vector<1xf32> to vector<1x1xf32>
    %cst_194 = arith.constant 6.400000e+01 : f32
    %355 = vector.broadcast %cst_194 : f32 to vector<1x1xf32>
    %356 = arith.divf %354, %355 : vector<1x1xf32>
    %357 = vector.broadcast %356 : vector<1x1xf32> to vector<1x64xf32>
    %358 = arith.subf %352, %357 : vector<1x64xf32>
    %359 = arith.mulf %358, %358 : vector<1x64xf32>
    %cst_195 = arith.constant dense<0.000000e+00> : vector<1xf32>
    %360 = vector.multi_reduction <add>, %359, %cst_195 [1] : vector<1x64xf32> to vector<1xf32>
    %361 = vector.shape_cast %360 : vector<1xf32> to vector<1x1xf32>
    %cst_196 = arith.constant 6.400000e+01 : f32
    %362 = vector.broadcast %cst_196 : f32 to vector<1x1xf32>
    %363 = arith.divf %361, %362 : vector<1x1xf32>
    %364 = vector.broadcast %356 : vector<1x1xf32> to vector<1x64xf32>
    %365 = arith.subf %352, %364 : vector<1x64xf32>
    %cst_197 = arith.constant 9.99999974E-6 : f32
    %366 = vector.broadcast %cst_197 : f32 to vector<1x1xf32>
    %367 = arith.addf %363, %366 : vector<1x1xf32>
    %368 = math.rsqrt %367 : vector<1x1xf32>
    %369 = vector.broadcast %368 : vector<1x1xf32> to vector<1x64xf32>
    %370 = arith.mulf %365, %369 : vector<1x64xf32>
    %371 = arith.mulf %370, %20 : vector<1x64xf32>
    %372 = arith.addf %371, %19 : vector<1x64xf32>
    %373 = tpu.concatenate %372, %349 in 0 : vector<1x64xf32>, vector<4x64xf32> -> vector<5x64xf32>
    %374 = arith.truncf %372 : vector<1x64xf32> to vector<1x64xbf16>
    %cst_198 = arith.constant dense<0.000000e+00> : vector<1x32xf32>
    %375 = tpu.matmul %374, %23, %cst_198 {dimension_numbers = #tpu.dot_dimension_numbers<[1], [0], [0], [1], [0, 0, 1, 1], [], []>} : vector<1x64xbf16>, vector<64x32xbf16>, vector<1x32xf32> -> vector<1x32xf32>
    %376 = arith.truncf %373 : vector<5x64xf32> to vector<5x64xbf16>
    %cst_199 = arith.constant dense<0.000000e+00> : vector<5x64xf32>
    %377 = tpu.matmul %376, %21, %cst_199 {dimension_numbers = #tpu.dot_dimension_numbers<[1], [0], [0], [1], [0, 0, 1, 1], [], []>} : vector<5x64xbf16>, vector<64x64xbf16>, vector<5x64xf32> -> vector<5x64xf32>
    %378 = vector.extract_strided_slice %377 {offsets = [0, 0], sizes = [5, 32], strides = [1, 1]} : vector<5x64xf32> to vector<5x32xf32>
    %379 = vector.extract_strided_slice %377 {offsets = [0, 32], sizes = [5, 32], strides = [1, 1]} : vector<5x64xf32> to vector<5x32xf32>
    %380 = vector.extract_strided_slice %375 {offsets = [0, 0], sizes = [1, 16], strides = [1, 1]} : vector<1x32xf32> to vector<1x16xf32>
    %381 = arith.truncf %380 : vector<1x16xf32> to vector<1x16xbf16>
    %382 = vector.extract_strided_slice %378 {offsets = [0, 0], sizes = [5, 16], strides = [1, 1]} : vector<5x32xf32> to vector<5x16xf32>
    %383 = arith.truncf %382 : vector<5x16xf32> to vector<5x16xbf16>
    %384 = vector.extract_strided_slice %379 {offsets = [0, 0], sizes = [5, 16], strides = [1, 1]} : vector<5x32xf32> to vector<5x16xf32>
    %385 = arith.truncf %384 : vector<5x16xf32> to vector<5x16xbf16>
    %cst_200 = arith.constant dense<0.000000e+00> : vector<1x5xf32>
    %386 = tpu.matmul %381, %383, %cst_200 {dimension_numbers = #tpu.dot_dimension_numbers<[1], [1], [0], [0], [0, 0, 1, 0], [], []>} : vector<1x16xbf16>, vector<5x16xbf16>, vector<1x5xf32> -> vector<1x5xf32>
    %cst_201 = arith.constant dense<0xFF800000> : vector<1xf32>
    %387 = vector.multi_reduction <maximumf>, %386, %cst_201 [1] : vector<1x5xf32> to vector<1xf32>
    %388 = vector.shape_cast %387 : vector<1xf32> to vector<1x1xf32>
    %389 = vector.broadcast %388 : vector<1x1xf32> to vector<1x5xf32>
    %390 = arith.subf %386, %389 : vector<1x5xf32>
    %391 = math.exp %390 : vector<1x5xf32>
    %cst_202 = arith.constant dense<0.000000e+00> : vector<1xf32>
    %392 = vector.multi_reduction <add>, %391, %cst_202 [1] : vector<1x5xf32> to vector<1xf32>
    %393 = vector.shape_cast %392 : vector<1xf32> to vector<1x1xf32>
    %394 = vector.broadcast %393 : vector<1x1xf32> to vector<1x5xf32>
    %395 = arith.divf %391, %394 : vector<1x5xf32>
    %396 = arith.truncf %395 : vector<1x5xf32> to vector<1x5xbf16>
    %cst_203 = arith.constant dense<0.000000e+00> : vector<1x16xf32>
    %397 = tpu.matmul %396, %385, %cst_203 {dimension_numbers = #tpu.dot_dimension_numbers<[1], [0], [0], [1], [0, 0, 1, 1], [], []>} : vector<1x5xbf16>, vector<5x16xbf16>, vector<1x16xf32> -> vector<1x16xf32>
    %398 = vector.extract_strided_slice %22 {offsets = [0, 0], sizes = [16, 64], strides = [1, 1]} : vector<32x64xbf16> to vector<16x64xbf16>
    %399 = arith.truncf %397 : vector<1x16xf32> to vector<1x16xbf16>
    %cst_204 = arith.constant dense<0.000000e+00> : vector<1x64xf32>
    %400 = tpu.matmul %399, %398, %cst_204 {dimension_numbers = #tpu.dot_dimension_numbers<[1], [0], [0], [1], [0, 0, 1, 1], [], []>} : vector<1x16xbf16>, vector<16x64xbf16>, vector<1x64xf32> -> vector<1x64xf32>
    %401 = vector.extract_strided_slice %375 {offsets = [0, 16], sizes = [1, 16], strides = [1, 1]} : vector<1x32xf32> to vector<1x16xf32>
    %402 = arith.truncf %401 : vector<1x16xf32> to vector<1x16xbf16>
    %403 = vector.extract_strided_slice %378 {offsets = [0, 16], sizes = [5, 16], strides = [1, 1]} : vector<5x32xf32> to vector<5x16xf32>
    %404 = arith.truncf %403 : vector<5x16xf32> to vector<5x16xbf16>
    %405 = vector.extract_strided_slice %379 {offsets = [0, 16], sizes = [5, 16], strides = [1, 1]} : vector<5x32xf32> to vector<5x16xf32>
    %406 = arith.truncf %405 : vector<5x16xf32> to vector<5x16xbf16>
    %cst_205 = arith.constant dense<0.000000e+00> : vector<1x5xf32>
    %407 = tpu.matmul %402, %404, %cst_205 {dimension_numbers = #tpu.dot_dimension_numbers<[1], [1], [0], [0], [0, 0, 1, 0], [], []>} : vector<1x16xbf16>, vector<5x16xbf16>, vector<1x5xf32> -> vector<1x5xf32>
    %cst_206 = arith.constant dense<0xFF800000> : vector<1xf32>
    %408 = vector.multi_reduction <maximumf>, %407, %cst_206 [1] : vector<1x5xf32> to vector<1xf32>
    %409 = vector.shape_cast %408 : vector<1xf32> to vector<1x1xf32>
    %410 = vector.broadcast %409 : vector<1x1xf32> to vector<1x5xf32>
    %411 = arith.subf %407, %410 : vector<1x5xf32>
    %412 = math.exp %411 : vector<1x5xf32>
    %cst_207 = arith.constant dense<0.000000e+00> : vector<1xf32>
    %413 = vector.multi_reduction <add>, %412, %cst_207 [1] : vector<1x5xf32> to vector<1xf32>
    %414 = vector.shape_cast %413 : vector<1xf32> to vector<1x1xf32>
    %415 = vector.broadcast %414 : vector<1x1xf32> to vector<1x5xf32>
    %416 = arith.divf %412, %415 : vector<1x5xf32>
    %417 = arith.truncf %416 : vector<1x5xf32> to vector<1x5xbf16>
    %cst_208 = arith.constant dense<0.000000e+00> : vector<1x16xf32>
    %418 = tpu.matmul %417, %406, %cst_208 {dimension_numbers = #tpu.dot_dimension_numbers<[1], [0], [0], [1], [0, 0, 1, 1], [], []>} : vector<1x5xbf16>, vector<5x16xbf16>, vector<1x16xf32> -> vector<1x16xf32>
    %419 = vector.extract_strided_slice %22 {offsets = [16, 0], sizes = [16, 64], strides = [1, 1]} : vector<32x64xbf16> to vector<16x64xbf16>
    %420 = arith.truncf %418 : vector<1x16xf32> to vector<1x16xbf16>
    %cst_209 = arith.constant dense<0.000000e+00> : vector<1x64xf32>
    %421 = tpu.matmul %420, %419, %cst_209 {dimension_numbers = #tpu.dot_dimension_numbers<[1], [0], [0], [1], [0, 0, 1, 1], [], []>} : vector<1x16xbf16>, vector<16x64xbf16>, vector<1x64xf32> -> vector<1x64xf32>
    %422 = arith.addf %400, %421 : vector<1x64xf32>
    %423 = arith.addf %422, %18 : vector<1x64xf32>
    %424 = arith.truncf %423 : vector<1x64xf32> to vector<1x64xbf16>
    %cst_210 = arith.constant dense<0.000000e+00> : vector<1x32xf32>
    %425 = tpu.matmul %424, %27, %cst_210 {dimension_numbers = #tpu.dot_dimension_numbers<[1], [0], [0], [1], [0, 0, 1, 1], [], []>} : vector<1x64xbf16>, vector<64x32xbf16>, vector<1x32xf32> -> vector<1x32xf32>
    %426 = arith.addf %425, %26 : vector<1x32xf32>
    %427 = arith.addf %426, %346 : vector<1x32xf32>
    %428 = arith.truncf %348 : vector<1x64xf32> to vector<1x64xbf16>
    %cst_211 = arith.constant dense<0.000000e+00> : vector<1x32xf32>
    %429 = tpu.matmul %428, %15, %cst_211 {dimension_numbers = #tpu.dot_dimension_numbers<[1], [0], [0], [1], [0, 0, 1, 1], [], []>} : vector<1x64xbf16>, vector<64x32xbf16>, vector<1x32xf32> -> vector<1x32xf32>
    %430 = arith.addf %429, %14 : vector<1x32xf32>
    %cst_212 = arith.constant dense<0.000000e+00> : vector<1xf32>
    %431 = vector.multi_reduction <add>, %430, %cst_212 [1] : vector<1x32xf32> to vector<1xf32>
    %432 = vector.shape_cast %431 : vector<1xf32> to vector<1x1xf32>
    %cst_213 = arith.constant 3.200000e+01 : f32
    %433 = vector.broadcast %cst_213 : f32 to vector<1x1xf32>
    %434 = arith.divf %432, %433 : vector<1x1xf32>
    %435 = vector.broadcast %434 : vector<1x1xf32> to vector<1x32xf32>
    %436 = arith.subf %430, %435 : vector<1x32xf32>
    %437 = arith.mulf %436, %436 : vector<1x32xf32>
    %cst_214 = arith.constant dense<0.000000e+00> : vector<1xf32>
    %438 = vector.multi_reduction <add>, %437, %cst_214 [1] : vector<1x32xf32> to vector<1xf32>
    %439 = vector.shape_cast %438 : vector<1xf32> to vector<1x1xf32>
    %cst_215 = arith.constant 3.200000e+01 : f32
    %440 = vector.broadcast %cst_215 : f32 to vector<1x1xf32>
    %441 = arith.divf %439, %440 : vector<1x1xf32>
    %442 = vector.broadcast %434 : vector<1x1xf32> to vector<1x32xf32>
    %443 = arith.subf %430, %442 : vector<1x32xf32>
    %cst_216 = arith.constant 9.99999974E-6 : f32
    %444 = vector.broadcast %cst_216 : f32 to vector<1x1xf32>
    %445 = arith.addf %441, %444 : vector<1x1xf32>
    %446 = math.rsqrt %445 : vector<1x1xf32>
    %447 = vector.broadcast %446 : vector<1x1xf32> to vector<1x32xf32>
    %448 = arith.mulf %443, %447 : vector<1x32xf32>
    %449 = arith.mulf %448, %10 : vector<1x32xf32>
    %450 = arith.addf %449, %9 : vector<1x32xf32>
    %451 = tpu.concatenate %450, %347 in 0 : vector<1x32xf32>, vector<16x32xf32> -> vector<17x32xf32>
    %452 = arith.truncf %450 : vector<1x32xf32> to vector<1x32xbf16>
    %cst_217 = arith.constant dense<0.000000e+00> : vector<1x32xf32>
    %453 = tpu.matmul %452, %13, %cst_217 {dimension_numbers = #tpu.dot_dimension_numbers<[1], [0], [0], [1], [0, 0, 1, 1], [], []>} : vector<1x32xbf16>, vector<32x32xbf16>, vector<1x32xf32> -> vector<1x32xf32>
    %454 = arith.truncf %451 : vector<17x32xf32> to vector<17x32xbf16>
    %cst_218 = arith.constant dense<0.000000e+00> : vector<17x64xf32>
    %455 = tpu.matmul %454, %11, %cst_218 {dimension_numbers = #tpu.dot_dimension_numbers<[1], [0], [0], [1], [0, 0, 1, 1], [], []>} : vector<17x32xbf16>, vector<32x64xbf16>, vector<17x64xf32> -> vector<17x64xf32>
    %456 = vector.extract_strided_slice %455 {offsets = [0, 0], sizes = [17, 32], strides = [1, 1]} : vector<17x64xf32> to vector<17x32xf32>
    %457 = vector.extract_strided_slice %455 {offsets = [0, 32], sizes = [17, 32], strides = [1, 1]} : vector<17x64xf32> to vector<17x32xf32>
    %458 = vector.extract_strided_slice %453 {offsets = [0, 0], sizes = [1, 16], strides = [1, 1]} : vector<1x32xf32> to vector<1x16xf32>
    %459 = arith.truncf %458 : vector<1x16xf32> to vector<1x16xbf16>
    %460 = vector.extract_strided_slice %456 {offsets = [0, 0], sizes = [17, 16], strides = [1, 1]} : vector<17x32xf32> to vector<17x16xf32>
    %461 = arith.truncf %460 : vector<17x16xf32> to vector<17x16xbf16>
    %462 = vector.extract_strided_slice %457 {offsets = [0, 0], sizes = [17, 16], strides = [1, 1]} : vector<17x32xf32> to vector<17x16xf32>
    %463 = arith.truncf %462 : vector<17x16xf32> to vector<17x16xbf16>
    %cst_219 = arith.constant dense<0.000000e+00> : vector<1x17xf32>
    %464 = tpu.matmul %459, %461, %cst_219 {dimension_numbers = #tpu.dot_dimension_numbers<[1], [1], [0], [0], [0, 0, 1, 0], [], []>} : vector<1x16xbf16>, vector<17x16xbf16>, vector<1x17xf32> -> vector<1x17xf32>
    %cst_220 = arith.constant dense<0xFF800000> : vector<1xf32>
    %465 = vector.multi_reduction <maximumf>, %464, %cst_220 [1] : vector<1x17xf32> to vector<1xf32>
    %466 = vector.shape_cast %465 : vector<1xf32> to vector<1x1xf32>
    %467 = vector.broadcast %466 : vector<1x1xf32> to vector<1x17xf32>
    %468 = arith.subf %464, %467 : vector<1x17xf32>
    %469 = math.exp %468 : vector<1x17xf32>
    %cst_221 = arith.constant dense<0.000000e+00> : vector<1xf32>
    %470 = vector.multi_reduction <add>, %469, %cst_221 [1] : vector<1x17xf32> to vector<1xf32>
    %471 = vector.shape_cast %470 : vector<1xf32> to vector<1x1xf32>
    %472 = vector.broadcast %471 : vector<1x1xf32> to vector<1x17xf32>
    %473 = arith.divf %469, %472 : vector<1x17xf32>
    %474 = arith.truncf %473 : vector<1x17xf32> to vector<1x17xbf16>
    %cst_222 = arith.constant dense<0.000000e+00> : vector<1x16xf32>
    %475 = tpu.matmul %474, %463, %cst_222 {dimension_numbers = #tpu.dot_dimension_numbers<[1], [0], [0], [1], [0, 0, 1, 1], [], []>} : vector<1x17xbf16>, vector<17x16xbf16>, vector<1x16xf32> -> vector<1x16xf32>
    %476 = vector.extract_strided_slice %12 {offsets = [0, 0], sizes = [16, 32], strides = [1, 1]} : vector<32x32xbf16> to vector<16x32xbf16>
    %477 = arith.truncf %475 : vector<1x16xf32> to vector<1x16xbf16>
    %cst_223 = arith.constant dense<0.000000e+00> : vector<1x32xf32>
    %478 = tpu.matmul %477, %476, %cst_223 {dimension_numbers = #tpu.dot_dimension_numbers<[1], [0], [0], [1], [0, 0, 1, 1], [], []>} : vector<1x16xbf16>, vector<16x32xbf16>, vector<1x32xf32> -> vector<1x32xf32>
    %479 = vector.extract_strided_slice %453 {offsets = [0, 16], sizes = [1, 16], strides = [1, 1]} : vector<1x32xf32> to vector<1x16xf32>
    %480 = arith.truncf %479 : vector<1x16xf32> to vector<1x16xbf16>
    %481 = vector.extract_strided_slice %456 {offsets = [0, 16], sizes = [17, 16], strides = [1, 1]} : vector<17x32xf32> to vector<17x16xf32>
    %482 = arith.truncf %481 : vector<17x16xf32> to vector<17x16xbf16>
    %483 = vector.extract_strided_slice %457 {offsets = [0, 16], sizes = [17, 16], strides = [1, 1]} : vector<17x32xf32> to vector<17x16xf32>
    %484 = arith.truncf %483 : vector<17x16xf32> to vector<17x16xbf16>
    %cst_224 = arith.constant dense<0.000000e+00> : vector<1x17xf32>
    %485 = tpu.matmul %480, %482, %cst_224 {dimension_numbers = #tpu.dot_dimension_numbers<[1], [1], [0], [0], [0, 0, 1, 0], [], []>} : vector<1x16xbf16>, vector<17x16xbf16>, vector<1x17xf32> -> vector<1x17xf32>
    %cst_225 = arith.constant dense<0xFF800000> : vector<1xf32>
    %486 = vector.multi_reduction <maximumf>, %485, %cst_225 [1] : vector<1x17xf32> to vector<1xf32>
    %487 = vector.shape_cast %486 : vector<1xf32> to vector<1x1xf32>
    %488 = vector.broadcast %487 : vector<1x1xf32> to vector<1x17xf32>
    %489 = arith.subf %485, %488 : vector<1x17xf32>
    %490 = math.exp %489 : vector<1x17xf32>
    %cst_226 = arith.constant dense<0.000000e+00> : vector<1xf32>
    %491 = vector.multi_reduction <add>, %490, %cst_226 [1] : vector<1x17xf32> to vector<1xf32>
    %492 = vector.shape_cast %491 : vector<1xf32> to vector<1x1xf32>
    %493 = vector.broadcast %492 : vector<1x1xf32> to vector<1x17xf32>
    %494 = arith.divf %490, %493 : vector<1x17xf32>
    %495 = arith.truncf %494 : vector<1x17xf32> to vector<1x17xbf16>
    %cst_227 = arith.constant dense<0.000000e+00> : vector<1x16xf32>
    %496 = tpu.matmul %495, %484, %cst_227 {dimension_numbers = #tpu.dot_dimension_numbers<[1], [0], [0], [1], [0, 0, 1, 1], [], []>} : vector<1x17xbf16>, vector<17x16xbf16>, vector<1x16xf32> -> vector<1x16xf32>
    %497 = vector.extract_strided_slice %12 {offsets = [16, 0], sizes = [16, 32], strides = [1, 1]} : vector<32x32xbf16> to vector<16x32xbf16>
    %498 = arith.truncf %496 : vector<1x16xf32> to vector<1x16xbf16>
    %cst_228 = arith.constant dense<0.000000e+00> : vector<1x32xf32>
    %499 = tpu.matmul %498, %497, %cst_228 {dimension_numbers = #tpu.dot_dimension_numbers<[1], [0], [0], [1], [0, 0, 1, 1], [], []>} : vector<1x16xbf16>, vector<16x32xbf16>, vector<1x32xf32> -> vector<1x32xf32>
    %500 = arith.addf %478, %499 : vector<1x32xf32>
    %501 = arith.addf %500, %8 : vector<1x32xf32>
    %502 = arith.truncf %501 : vector<1x32xf32> to vector<1x32xbf16>
    %cst_229 = arith.constant dense<0.000000e+00> : vector<1x64xf32>
    %503 = tpu.matmul %502, %17, %cst_229 {dimension_numbers = #tpu.dot_dimension_numbers<[1], [0], [0], [1], [0, 0, 1, 1], [], []>} : vector<1x32xbf16>, vector<32x64xbf16>, vector<1x64xf32> -> vector<1x64xf32>
    %504 = arith.addf %503, %16 : vector<1x64xf32>
    %505 = arith.addf %504, %348 : vector<1x64xf32>
    %506 = tpu.concatenate %427, %347 in 0 : vector<1x32xf32>, vector<16x32xf32> -> vector<17x32xf32>
    %507 = tpu.concatenate %505, %349 in 0 : vector<1x64xf32>, vector<4x64xf32> -> vector<5x64xf32>
    %508 = vector.extract_strided_slice %506 {offsets = [0, 0], sizes = [1, 32], strides = [1, 1]} : vector<17x32xf32> to vector<1x32xf32>
    %cst_230 = arith.constant dense<0.000000e+00> : vector<1xf32>
    %509 = vector.multi_reduction <add>, %508, %cst_230 [1] : vector<1x32xf32> to vector<1xf32>
    %510 = vector.shape_cast %509 : vector<1xf32> to vector<1x1xf32>
    %cst_231 = arith.constant 3.200000e+01 : f32
    %511 = vector.broadcast %cst_231 : f32 to vector<1x1xf32>
    %512 = arith.divf %510, %511 : vector<1x1xf32>
    %513 = vector.broadcast %512 : vector<1x1xf32> to vector<1x32xf32>
    %514 = arith.subf %508, %513 : vector<1x32xf32>
    %515 = arith.mulf %514, %514 : vector<1x32xf32>
    %cst_232 = arith.constant dense<0.000000e+00> : vector<1xf32>
    %516 = vector.multi_reduction <add>, %515, %cst_232 [1] : vector<1x32xf32> to vector<1xf32>
    %517 = vector.shape_cast %516 : vector<1xf32> to vector<1x1xf32>
    %cst_233 = arith.constant 3.200000e+01 : f32
    %518 = vector.broadcast %cst_233 : f32 to vector<1x1xf32>
    %519 = arith.divf %517, %518 : vector<1x1xf32>
    %520 = vector.broadcast %512 : vector<1x1xf32> to vector<1x32xf32>
    %521 = arith.subf %508, %520 : vector<1x32xf32>
    %cst_234 = arith.constant 9.99999974E-6 : f32
    %522 = vector.broadcast %cst_234 : f32 to vector<1x1xf32>
    %523 = arith.addf %519, %522 : vector<1x1xf32>
    %524 = math.rsqrt %523 : vector<1x1xf32>
    %525 = vector.broadcast %524 : vector<1x1xf32> to vector<1x32xf32>
    %526 = arith.mulf %521, %525 : vector<1x32xf32>
    %527 = arith.mulf %526, %60 : vector<1x32xf32>
    %528 = arith.addf %527, %59 : vector<1x32xf32>
    %529 = arith.truncf %528 : vector<1x32xf32> to vector<1x32xbf16>
    %cst_235 = arith.constant dense<0.000000e+00> : vector<1x128xf32>
    %530 = tpu.matmul %529, %61, %cst_235 {dimension_numbers = #tpu.dot_dimension_numbers<[1], [0], [0], [1], [0, 0, 1, 1], [], []>} : vector<1x32xbf16>, vector<32x128xbf16>, vector<1x128xf32> -> vector<1x128xf32>
    %531 = arith.addf %530, %58 : vector<1x128xf32>
    %532 = vector.extract_strided_slice %507 {offsets = [0, 0], sizes = [1, 64], strides = [1, 1]} : vector<5x64xf32> to vector<1x64xf32>
    %cst_236 = arith.constant dense<0.000000e+00> : vector<1xf32>
    %533 = vector.multi_reduction <add>, %532, %cst_236 [1] : vector<1x64xf32> to vector<1xf32>
    %534 = vector.shape_cast %533 : vector<1xf32> to vector<1x1xf32>
    %cst_237 = arith.constant 6.400000e+01 : f32
    %535 = vector.broadcast %cst_237 : f32 to vector<1x1xf32>
    %536 = arith.divf %534, %535 : vector<1x1xf32>
    %537 = vector.broadcast %536 : vector<1x1xf32> to vector<1x64xf32>
    %538 = arith.subf %532, %537 : vector<1x64xf32>
    %539 = arith.mulf %538, %538 : vector<1x64xf32>
    %cst_238 = arith.constant dense<0.000000e+00> : vector<1xf32>
    %540 = vector.multi_reduction <add>, %539, %cst_238 [1] : vector<1x64xf32> to vector<1xf32>
    %541 = vector.shape_cast %540 : vector<1xf32> to vector<1x1xf32>
    %cst_239 = arith.constant 6.400000e+01 : f32
    %542 = vector.broadcast %cst_239 : f32 to vector<1x1xf32>
    %543 = arith.divf %541, %542 : vector<1x1xf32>
    %544 = vector.broadcast %536 : vector<1x1xf32> to vector<1x64xf32>
    %545 = arith.subf %532, %544 : vector<1x64xf32>
    %cst_240 = arith.constant 9.99999974E-6 : f32
    %546 = vector.broadcast %cst_240 : f32 to vector<1x1xf32>
    %547 = arith.addf %543, %546 : vector<1x1xf32>
    %548 = math.rsqrt %547 : vector<1x1xf32>
    %549 = vector.broadcast %548 : vector<1x1xf32> to vector<1x64xf32>
    %550 = arith.mulf %545, %549 : vector<1x64xf32>
    %551 = arith.mulf %550, %6 : vector<1x64xf32>
    %552 = arith.addf %551, %5 : vector<1x64xf32>
    %553 = arith.truncf %552 : vector<1x64xf32> to vector<1x64xbf16>
    %cst_241 = arith.constant dense<0.000000e+00> : vector<1x128xf32>
    %554 = tpu.matmul %553, %7, %cst_241 {dimension_numbers = #tpu.dot_dimension_numbers<[1], [0], [0], [1], [0, 0, 1, 1], [], []>} : vector<1x64xbf16>, vector<64x128xbf16>, vector<1x128xf32> -> vector<1x128xf32>
    %555 = arith.addf %554, %4 : vector<1x128xf32>
    %556 = arith.addf %531, %555 : vector<1x128xf32>
    %c0_242 = arith.constant 0 : index
    %c0_243 = arith.constant 0 : index
    %c0_244 = arith.constant 0 : index
    %557 = vector.load %arg65[%c0_242, %c0_243, %c0_244] : memref<1x1x128xf32, #tpu.memory_space<vmem>>, vector<1x1x128xf32>
    %558 = vector.shape_cast %557 : vector<1x1x128xf32> to vector<1x128xf32>
    %559 = vector.shape_cast %556 : vector<1x128xf32> to vector<1x1x128xf32>
    tpu.vector_store %arg65[%c0_242, %c0_243, %c0_244], %559 {strides = array<i32>} : memref<1x1x128xf32, #tpu.memory_space<vmem>>, vector<1x1x128xf32>,
    return
  }
  func.func @transform_0(%arg0: i32) -> (i32, i32, i32) {
    %c0_i32 = arith.constant 0 : i32
    %c0_i32_0 = arith.constant 0 : i32
    %c0_i32_1 = arith.constant 0 : i32
    return %arg0, %c0_i32, %c0_i32_0 : i32, i32, i32
  }
  func.func @transform_1(%arg0: i32) -> (i32, i32, i32) {
    %c0_i32 = arith.constant 0 : i32
    %c0_i32_0 = arith.constant 0 : i32
    %c0_i32_1 = arith.constant 0 : i32
    return %arg0, %c0_i32, %c0_i32_0 : i32, i32, i32
  }
  func.func @transform_2(%arg0: i32) -> (i32, i32) {
    %c0_i32 = arith.constant 0 : i32
    %c0_i32_0 = arith.constant 0 : i32
    %c0_i32_1 = arith.constant 0 : i32
    return %c0_i32, %c0_i32_0 : i32, i32
  }
  func.func @transform_3(%arg0: i32) -> (i32, i32) {
    %c0_i32 = arith.constant 0 : i32
    %c0_i32_0 = arith.constant 0 : i32
    %c0_i32_1 = arith.constant 0 : i32
    return %c0_i32, %c0_i32_0 : i32, i32
  }
  func.func @transform_4(%arg0: i32) -> (i32, i32) {
    %c0_i32 = arith.constant 0 : i32
    %c0_i32_0 = arith.constant 0 : i32
    %c0_i32_1 = arith.constant 0 : i32
    return %c0_i32, %c0_i32_0 : i32, i32
  }
  func.func @transform_5(%arg0: i32) -> (i32, i32) {
    %c0_i32 = arith.constant 0 : i32
    %c0_i32_0 = arith.constant 0 : i32
    %c0_i32_1 = arith.constant 0 : i32
    return %c0_i32, %c0_i32_0 : i32, i32
  }
  func.func @transform_6(%arg0: i32) -> (i32, i32) {
    %c0_i32 = arith.constant 0 : i32
    %c0_i32_0 = arith.constant 0 : i32
    %c0_i32_1 = arith.constant 0 : i32
    return %c0_i32, %c0_i32_0 : i32, i32
  }
  func.func @transform_7(%arg0: i32) -> (i32, i32) {
    %c0_i32 = arith.constant 0 : i32
    %c0_i32_0 = arith.constant 0 : i32
    %c0_i32_1 = arith.constant 0 : i32
    return %c0_i32, %c0_i32_0 : i32, i32
  }
  func.func @transform_8(%arg0: i32) -> (i32, i32) {
    %c0_i32 = arith.constant 0 : i32
    %c0_i32_0 = arith.constant 0 : i32
    %c0_i32_1 = arith.constant 0 : i32
    return %c0_i32, %c0_i32_0 : i32, i32
  }
  func.func @transform_9(%arg0: i32) -> (i32, i32) {
    %c0_i32 = arith.constant 0 : i32
    %c0_i32_0 = arith.constant 0 : i32
    %c0_i32_1 = arith.constant 0 : i32
    return %c0_i32, %c0_i32_0 : i32, i32
  }
  func.func @transform_10(%arg0: i32) -> (i32, i32) {
    %c0_i32 = arith.constant 0 : i32
    %c0_i32_0 = arith.constant 0 : i32
    %c0_i32_1 = arith.constant 0 : i32
    return %c0_i32, %c0_i32_0 : i32, i32
  }
  func.func @transform_11(%arg0: i32) -> (i32, i32) {
    %c0_i32 = arith.constant 0 : i32
    %c0_i32_0 = arith.constant 0 : i32
    %c0_i32_1 = arith.constant 0 : i32
    return %c0_i32, %c0_i32_0 : i32, i32
  }
  func.func @transform_12(%arg0: i32) -> (i32, i32) {
    %c0_i32 = arith.constant 0 : i32
    %c0_i32_0 = arith.constant 0 : i32
    %c0_i32_1 = arith.constant 0 : i32
    return %c0_i32, %c0_i32_0 : i32, i32
  }
  func.func @transform_13(%arg0: i32) -> (i32, i32) {
    %c0_i32 = arith.constant 0 : i32
    %c0_i32_0 = arith.constant 0 : i32
    %c0_i32_1 = arith.constant 0 : i32
    return %c0_i32, %c0_i32_0 : i32, i32
  }
  func.func @transform_14(%arg0: i32) -> (i32, i32) {
    %c0_i32 = arith.constant 0 : i32
    %c0_i32_0 = arith.constant 0 : i32
    %c0_i32_1 = arith.constant 0 : i32
    return %c0_i32, %c0_i32_0 : i32, i32
  }
  func.func @transform_15(%arg0: i32) -> (i32, i32) {
    %c0_i32 = arith.constant 0 : i32
    %c0_i32_0 = arith.constant 0 : i32
    %c0_i32_1 = arith.constant 0 : i32
    return %c0_i32, %c0_i32_0 : i32, i32
  }
  func.func @transform_16(%arg0: i32) -> (i32, i32) {
    %c0_i32 = arith.constant 0 : i32
    %c0_i32_0 = arith.constant 0 : i32
    %c0_i32_1 = arith.constant 0 : i32
    return %c0_i32, %c0_i32_0 : i32, i32
  }
  func.func @transform_17(%arg0: i32) -> (i32, i32) {
    %c0_i32 = arith.constant 0 : i32
    %c0_i32_0 = arith.constant 0 : i32
    %c0_i32_1 = arith.constant 0 : i32
    return %c0_i32, %c0_i32_0 : i32, i32
  }
  func.func @transform_18(%arg0: i32) -> (i32, i32) {
    %c0_i32 = arith.constant 0 : i32
    %c0_i32_0 = arith.constant 0 : i32
    %c0_i32_1 = arith.constant 0 : i32
    return %c0_i32, %c0_i32_0 : i32, i32
  }
  func.func @transform_19(%arg0: i32) -> (i32, i32) {
    %c0_i32 = arith.constant 0 : i32
    %c0_i32_0 = arith.constant 0 : i32
    %c0_i32_1 = arith.constant 0 : i32
    return %c0_i32, %c0_i32_0 : i32, i32
  }
  func.func @transform_20(%arg0: i32) -> (i32, i32) {
    %c0_i32 = arith.constant 0 : i32
    %c0_i32_0 = arith.constant 0 : i32
    %c0_i32_1 = arith.constant 0 : i32
    return %c0_i32, %c0_i32_0 : i32, i32
  }
  func.func @transform_21(%arg0: i32) -> (i32, i32) {
    %c0_i32 = arith.constant 0 : i32
    %c0_i32_0 = arith.constant 0 : i32
    %c0_i32_1 = arith.constant 0 : i32
    return %c0_i32, %c0_i32_0 : i32, i32
  }
  func.func @transform_22(%arg0: i32) -> (i32, i32) {
    %c0_i32 = arith.constant 0 : i32
    %c0_i32_0 = arith.constant 0 : i32
    %c0_i32_1 = arith.constant 0 : i32
    return %c0_i32, %c0_i32_0 : i32, i32
  }
  func.func @transform_23(%arg0: i32) -> (i32, i32) {
    %c0_i32 = arith.constant 0 : i32
    %c0_i32_0 = arith.constant 0 : i32
    %c0_i32_1 = arith.constant 0 : i32
    return %c0_i32, %c0_i32_0 : i32, i32
  }
  func.func @transform_24(%arg0: i32) -> (i32, i32) {
    %c0_i32 = arith.constant 0 : i32
    %c0_i32_0 = arith.constant 0 : i32
    %c0_i32_1 = arith.constant 0 : i32
    return %c0_i32, %c0_i32_0 : i32, i32
  }
  func.func @transform_25(%arg0: i32) -> (i32, i32) {
    %c0_i32 = arith.constant 0 : i32
    %c0_i32_0 = arith.constant 0 : i32
    %c0_i32_1 = arith.constant 0 : i32
    return %c0_i32, %c0_i32_0 : i32, i32
  }
  func.func @transform_26(%arg0: i32) -> (i32, i32) {
    %c0_i32 = arith.constant 0 : i32
    %c0_i32_0 = arith.constant 0 : i32
    %c0_i32_1 = arith.constant 0 : i32
    return %c0_i32, %c0_i32_0 : i32, i32
  }
  func.func @transform_27(%arg0: i32) -> (i32, i32) {
    %c0_i32 = arith.constant 0 : i32
    %c0_i32_0 = arith.constant 0 : i32
    %c0_i32_1 = arith.constant 0 : i32
    return %c0_i32, %c0_i32_0 : i32, i32
  }
  func.func @transform_28(%arg0: i32) -> (i32, i32) {
    %c0_i32 = arith.constant 0 : i32
    %c0_i32_0 = arith.constant 0 : i32
    %c0_i32_1 = arith.constant 0 : i32
    return %c0_i32, %c0_i32_0 : i32, i32
  }
  func.func @transform_29(%arg0: i32) -> (i32, i32) {
    %c0_i32 = arith.constant 0 : i32
    %c0_i32_0 = arith.constant 0 : i32
    %c0_i32_1 = arith.constant 0 : i32
    return %c0_i32, %c0_i32_0 : i32, i32
  }
  func.func @transform_30(%arg0: i32) -> (i32, i32) {
    %c0_i32 = arith.constant 0 : i32
    %c0_i32_0 = arith.constant 0 : i32
    %c0_i32_1 = arith.constant 0 : i32
    return %c0_i32, %c0_i32_0 : i32, i32
  }
  func.func @transform_31(%arg0: i32) -> (i32, i32) {
    %c0_i32 = arith.constant 0 : i32
    %c0_i32_0 = arith.constant 0 : i32
    %c0_i32_1 = arith.constant 0 : i32
    return %c0_i32, %c0_i32_0 : i32, i32
  }
  func.func @transform_32(%arg0: i32) -> (i32, i32) {
    %c0_i32 = arith.constant 0 : i32
    %c0_i32_0 = arith.constant 0 : i32
    %c0_i32_1 = arith.constant 0 : i32
    return %c0_i32, %c0_i32_0 : i32, i32
  }
  func.func @transform_33(%arg0: i32) -> (i32, i32) {
    %c0_i32 = arith.constant 0 : i32
    %c0_i32_0 = arith.constant 0 : i32
    %c0_i32_1 = arith.constant 0 : i32
    return %c0_i32, %c0_i32_0 : i32, i32
  }
  func.func @transform_34(%arg0: i32) -> (i32, i32) {
    %c0_i32 = arith.constant 0 : i32
    %c0_i32_0 = arith.constant 0 : i32
    %c0_i32_1 = arith.constant 0 : i32
    return %c0_i32, %c0_i32_0 : i32, i32
  }
  func.func @transform_35(%arg0: i32) -> (i32, i32) {
    %c0_i32 = arith.constant 0 : i32
    %c0_i32_0 = arith.constant 0 : i32
    %c0_i32_1 = arith.constant 0 : i32
    return %c0_i32, %c0_i32_0 : i32, i32
  }
  func.func @transform_36(%arg0: i32) -> (i32, i32) {
    %c0_i32 = arith.constant 0 : i32
    %c0_i32_0 = arith.constant 0 : i32
    %c0_i32_1 = arith.constant 0 : i32
    return %c0_i32, %c0_i32_0 : i32, i32
  }
  func.func @transform_37(%arg0: i32) -> (i32, i32) {
    %c0_i32 = arith.constant 0 : i32
    %c0_i32_0 = arith.constant 0 : i32
    %c0_i32_1 = arith.constant 0 : i32
    return %c0_i32, %c0_i32_0 : i32, i32
  }
  func.func @transform_38(%arg0: i32) -> (i32, i32) {
    %c0_i32 = arith.constant 0 : i32
    %c0_i32_0 = arith.constant 0 : i32
    %c0_i32_1 = arith.constant 0 : i32
    return %c0_i32, %c0_i32_0 : i32, i32
  }
  func.func @transform_39(%arg0: i32) -> (i32, i32) {
    %c0_i32 = arith.constant 0 : i32
    %c0_i32_0 = arith.constant 0 : i32
    %c0_i32_1 = arith.constant 0 : i32
    return %c0_i32, %c0_i32_0 : i32, i32
  }
  func.func @transform_40(%arg0: i32) -> (i32, i32) {
    %c0_i32 = arith.constant 0 : i32
    %c0_i32_0 = arith.constant 0 : i32
    %c0_i32_1 = arith.constant 0 : i32
    return %c0_i32, %c0_i32_0 : i32, i32
  }
  func.func @transform_41(%arg0: i32) -> (i32, i32) {
    %c0_i32 = arith.constant 0 : i32
    %c0_i32_0 = arith.constant 0 : i32
    %c0_i32_1 = arith.constant 0 : i32
    return %c0_i32, %c0_i32_0 : i32, i32
  }
  func.func @transform_42(%arg0: i32) -> (i32, i32) {
    %c0_i32 = arith.constant 0 : i32
    %c0_i32_0 = arith.constant 0 : i32
    %c0_i32_1 = arith.constant 0 : i32
    return %c0_i32, %c0_i32_0 : i32, i32
  }
  func.func @transform_43(%arg0: i32) -> (i32, i32) {
    %c0_i32 = arith.constant 0 : i32
    %c0_i32_0 = arith.constant 0 : i32
    %c0_i32_1 = arith.constant 0 : i32
    return %c0_i32, %c0_i32_0 : i32, i32
  }
  func.func @transform_44(%arg0: i32) -> (i32, i32) {
    %c0_i32 = arith.constant 0 : i32
    %c0_i32_0 = arith.constant 0 : i32
    %c0_i32_1 = arith.constant 0 : i32
    return %c0_i32, %c0_i32_0 : i32, i32
  }
  func.func @transform_45(%arg0: i32) -> (i32, i32) {
    %c0_i32 = arith.constant 0 : i32
    %c0_i32_0 = arith.constant 0 : i32
    %c0_i32_1 = arith.constant 0 : i32
    return %c0_i32, %c0_i32_0 : i32, i32
  }
  func.func @transform_46(%arg0: i32) -> (i32, i32) {
    %c0_i32 = arith.constant 0 : i32
    %c0_i32_0 = arith.constant 0 : i32
    %c0_i32_1 = arith.constant 0 : i32
    return %c0_i32, %c0_i32_0 : i32, i32
  }
  func.func @transform_47(%arg0: i32) -> (i32, i32) {
    %c0_i32 = arith.constant 0 : i32
    %c0_i32_0 = arith.constant 0 : i32
    %c0_i32_1 = arith.constant 0 : i32
    return %c0_i32, %c0_i32_0 : i32, i32
  }
  func.func @transform_48(%arg0: i32) -> (i32, i32) {
    %c0_i32 = arith.constant 0 : i32
    %c0_i32_0 = arith.constant 0 : i32
    %c0_i32_1 = arith.constant 0 : i32
    return %c0_i32, %c0_i32_0 : i32, i32
  }
  func.func @transform_49(%arg0: i32) -> (i32, i32) {
    %c0_i32 = arith.constant 0 : i32
    %c0_i32_0 = arith.constant 0 : i32
    %c0_i32_1 = arith.constant 0 : i32
    return %c0_i32, %c0_i32_0 : i32, i32
  }
  func.func @transform_50(%arg0: i32) -> (i32, i32) {
    %c0_i32 = arith.constant 0 : i32
    %c0_i32_0 = arith.constant 0 : i32
    %c0_i32_1 = arith.constant 0 : i32
    return %c0_i32, %c0_i32_0 : i32, i32
  }
  func.func @transform_51(%arg0: i32) -> (i32, i32) {
    %c0_i32 = arith.constant 0 : i32
    %c0_i32_0 = arith.constant 0 : i32
    %c0_i32_1 = arith.constant 0 : i32
    return %c0_i32, %c0_i32_0 : i32, i32
  }
  func.func @transform_52(%arg0: i32) -> (i32, i32) {
    %c0_i32 = arith.constant 0 : i32
    %c0_i32_0 = arith.constant 0 : i32
    %c0_i32_1 = arith.constant 0 : i32
    return %c0_i32, %c0_i32_0 : i32, i32
  }
  func.func @transform_53(%arg0: i32) -> (i32, i32) {
    %c0_i32 = arith.constant 0 : i32
    %c0_i32_0 = arith.constant 0 : i32
    %c0_i32_1 = arith.constant 0 : i32
    return %c0_i32, %c0_i32_0 : i32, i32
  }
  func.func @transform_54(%arg0: i32) -> (i32, i32) {
    %c0_i32 = arith.constant 0 : i32
    %c0_i32_0 = arith.constant 0 : i32
    %c0_i32_1 = arith.constant 0 : i32
    return %c0_i32, %c0_i32_0 : i32, i32
  }
  func.func @transform_55(%arg0: i32) -> (i32, i32) {
    %c0_i32 = arith.constant 0 : i32
    %c0_i32_0 = arith.constant 0 : i32
    %c0_i32_1 = arith.constant 0 : i32
    return %c0_i32, %c0_i32_0 : i32, i32
  }
  func.func @transform_56(%arg0: i32) -> (i32, i32) {
    %c0_i32 = arith.constant 0 : i32
    %c0_i32_0 = arith.constant 0 : i32
    %c0_i32_1 = arith.constant 0 : i32
    return %c0_i32, %c0_i32_0 : i32, i32
  }
  func.func @transform_57(%arg0: i32) -> (i32, i32) {
    %c0_i32 = arith.constant 0 : i32
    %c0_i32_0 = arith.constant 0 : i32
    %c0_i32_1 = arith.constant 0 : i32
    return %c0_i32, %c0_i32_0 : i32, i32
  }
  func.func @transform_58(%arg0: i32) -> (i32, i32) {
    %c0_i32 = arith.constant 0 : i32
    %c0_i32_0 = arith.constant 0 : i32
    %c0_i32_1 = arith.constant 0 : i32
    return %c0_i32, %c0_i32_0 : i32, i32
  }
  func.func @transform_59(%arg0: i32) -> (i32, i32) {
    %c0_i32 = arith.constant 0 : i32
    %c0_i32_0 = arith.constant 0 : i32
    %c0_i32_1 = arith.constant 0 : i32
    return %c0_i32, %c0_i32_0 : i32, i32
  }
  func.func @transform_60(%arg0: i32) -> (i32, i32) {
    %c0_i32 = arith.constant 0 : i32
    %c0_i32_0 = arith.constant 0 : i32
    %c0_i32_1 = arith.constant 0 : i32
    return %c0_i32, %c0_i32_0 : i32, i32
  }
  func.func @transform_61(%arg0: i32) -> (i32, i32) {
    %c0_i32 = arith.constant 0 : i32
    %c0_i32_0 = arith.constant 0 : i32
    %c0_i32_1 = arith.constant 0 : i32
    return %c0_i32, %c0_i32_0 : i32, i32
  }
  func.func @transform_62(%arg0: i32) -> (i32, i32) {
    %c0_i32 = arith.constant 0 : i32
    %c0_i32_0 = arith.constant 0 : i32
    %c0_i32_1 = arith.constant 0 : i32
    return %c0_i32, %c0_i32_0 : i32, i32
  }
  func.func @transform_63(%arg0: i32) -> (i32, i32) {
    %c0_i32 = arith.constant 0 : i32
    %c0_i32_0 = arith.constant 0 : i32
    %c0_i32_1 = arith.constant 0 : i32
    return %c0_i32, %c0_i32_0 : i32, i32
  }
  func.func @transform_64(%arg0: i32) -> (i32, i32, i32) {
    %c0_i32 = arith.constant 0 : i32
    %c0_i32_0 = arith.constant 0 : i32
    %c0_i32_1 = arith.constant 0 : i32
    return %arg0, %c0_i32, %c0_i32_0 : i32, i32, i32
  }
}

</mosaic_0001>

<bundles_post_ra>
// kernel: _lambda_.1
= control target key start
LH: loop header
LB: loop body
LE: loop exit
PB: predicated region body
PF: predicated region fallthrough
CT: control target
= control target key end

     0   :  { %s7852_s6 = smov 1   ;;  %s7853_s10 = smov 2   ;;  %s9227_s0 = inlined_call_operand.smem [shape: u32[65], index: -1, kind: input, shape index: {}] }
   0x1   :  { %s7956_s5 = sld [smem:[%s9227_s0]]   ;;  %s7854_s14 = smov 3  }
   0x2   :  { %s7961_s9 = sld [smem:[%s9227_s0 + %s7852_s6]]   ;;  %s7855_s18 = smov 4  }
   0x3   :  { %s7966_s13 = sld [smem:[%s9227_s0 + %s7853_s10]]   ;;  %s7856_s22 = smov 5  }
   0x4   :  { %s7971_s17 = sld [smem:[%s9227_s0 + %s7854_s14]]   ;;  %s7857_s26 = smov 6  }
   0x5   :  { %s7976_s21 = sld [smem:[%s9227_s0 + %s7855_s18]]   ;;  %s7858_s30 = smov 7  }
   0x6   :  { %s7981_s25 = sld [smem:[%s9227_s0 + %s7856_s22]]   ;;  %s7859_s4 = smov 8  }
   0x7   :  { %9300 = sst [smem:[#allocation51_spill]] %s7956_s5  ;;  %s7860_s10 = smov 9  }
   0x8   :  { %9301 = sst [smem:[#allocation52_spill]] %s7961_s9  ;;  %s7861_s15 = smov 10  }
   0x9   :  { %9302 = sst [smem:[#allocation53_spill]] %s7966_s13  ;;  %s7862_s20 = smov 11  }
   0xa   :  { %9303 = sst [smem:[#allocation54_spill]] %s7971_s17  ;;  %s7864_s1 = smov 13  }
   0xb   :  { %9304 = sst [smem:[#allocation55_spill]] %s7976_s21  ;;  %s7865_s7 = smov 14  }
   0xc   :  { %9305 = sst [smem:[#allocation56_spill]] %s7981_s25  ;;  %s7867_s22 = smov 16  }
   0xd   :  { %s7986_s29 = sld [smem:[%s9227_s0 + %s7857_s26]]   ;;  %s7863_s26 = smov 12  }
   0xe   :  { %s7991_s3 = sld [smem:[%s9227_s0 + %s7858_s30]]   ;;  %s7868_s28 = smov 17  }
   0xf   :  { %s7996_s8 = sld [smem:[%s9227_s0 + %s7859_s4]]  }
  0x10   :  { %s8001_s14 = sld [smem:[%s9227_s0 + %s7860_s10]]  }
  0x11   :  { %s8006_s19 = sld [smem:[%s9227_s0 + %s7861_s15]]   ;;  %s7866_s15 = smov 15  }
  0x12   :  { %s8011_s24 = sld [smem:[%s9227_s0 + %s7862_s20]]  }
  0x13   :  { %9306 = sst [smem:[#allocation57_spill]] %s7986_s29 }
  0x14   :  { %9307 = sst [smem:[#allocation58_spill]] %s7991_s3 }
  0x15   :  { %9308 = sst [smem:[#allocation59_spill]] %s7996_s8 }
  0x16   :  { %9309 = sst [smem:[#allocation60_spill]] %s8001_s14 }
  0x17   :  { %9310 = sst [smem:[#allocation61_spill]] %s8006_s19 }
  0x18   :  { %9311 = sst [smem:[#allocation62_spill]] %s8011_s24 }
  0x19   :  { %s8016_s30 = sld [smem:[%s9227_s0 + %s7863_s26]]  }
  0x1a   :  { %s8021_s6 = sld [smem:[%s9227_s0 + %s7864_s1]]  }
  0x1b   :  { %s8026_s12 = sld [smem:[%s9227_s0 + %s7865_s7]]   ;;  %s7869_s7 = smov 18  }
  0x1c   :  { %s8031_s20 = sld [smem:[%s9227_s0 + %s7866_s15]]   ;;  %s7870_s15 = smov 19  }
  0x1d   :  { %s8036_s27 = sld [smem:[%s9227_s0 + %s7867_s22]]   ;;  %s7871_s22 = smov 20  }
  0x1e   :  { %s8041_s4 = sld [smem:[%s9227_s0 + %s7868_s28]]   ;;  %s7872_s28 = smov 21  }
  0x1f   :  { %9312 = sst [smem:[#allocation63_spill]] %s8016_s30 }
  0x20   :  { %9313 = sst [smem:[#allocation64_spill]] %s8021_s6 }
  0x21   :  { %9314 = sst [smem:[#allocation65_spill]] %s8026_s12 }
  0x22   :  { %9315 = sst [smem:[#allocation66_spill]] %s8031_s20 }
  0x23   :  { %9316 = sst [smem:[#allocation67_spill]] %s8036_s27 }
  0x24   :  { %9317 = sst [smem:[#allocation68_spill]] %s8041_s4 }
  0x25   :  { %s8046_s29 = sld [smem:[%s9227_s0 + %s7869_s7]]   ;;  %s7873_s7 = smov 22  }
  0x26   :  { %s8051_s3 = sld [smem:[%s9227_s0 + %s7870_s15]]   ;;  %s7874_s15 = smov 23  }
  0x27   :  { %s8056_s8 = sld [smem:[%s9227_s0 + %s7871_s22]]   ;;  %s7875_s22 = smov 24  }
  0x28   :  { %s8061_s14 = sld [smem:[%s9227_s0 + %s7872_s28]]   ;;  %s7876_s28 = smov 25  }
  0x29   :  { %s8071_s19 = sld [smem:[%s9227_s0 + %s7874_s15]]   ;;  %s7878_s15 = smov 27  }
  0x2a   :  { %s8081_s12 = sld [smem:[%s9227_s0 + %s7876_s28]]   ;;  %s7880_s28 = smov 29  }
  0x2b   :  { %9318 = sst [smem:[#allocation69_spill]] %s8046_s29 }
  0x2c   :  { %9319 = sst [smem:[#allocation70_spill]] %s8051_s3 }
  0x2d   :  { %9320 = sst [smem:[#allocation71_spill]] %s8056_s8 }
  0x2e   :  { %9321 = sst [smem:[#allocation72_spill]] %s8061_s14 }
  0x2f   :  { %s8066_s29 = sld [smem:[%s9227_s0 + %s7873_s7]]   ;;  %s7877_s7 = smov 26  }
  0x30   :  { %9323 = sst [smem:[#allocation74_spill]] %s8071_s19 }
  0x31   :  { %s8076_s3 = sld [smem:[%s9227_s0 + %s7875_s22]]   ;;  %s7879_s22 = smov 28  }
  0x32   :  { %9325 = sst [smem:[#allocation76_spill]] %s8081_s12 }
  0x33   :  { %s8086_s24 = sld [smem:[%s9227_s0 + %s7877_s7]]   ;;  %s7881_s7 = smov 30  }
  0x34   :  { %s8091_s30 = sld [smem:[%s9227_s0 + %s7878_s15]]   ;;  %s7882_s15 = smov 31  }
  0x35   :  { %9322 = sst [smem:[#allocation73_spill]] %s8066_s29 }
  0x36   :  { %s8096_s6 = sld [smem:[%s9227_s0 + %s7879_s22]]   ;;  %s7883_s22 = smov 32  }
  0x37   :  { %9324 = sst [smem:[#allocation75_spill]] %s8076_s3 }
  0x38   :  { %s8101_s20 = sld [smem:[%s9227_s0 + %s7880_s28]]   ;;  %s7884_s28 = smov 33  }
  0x39   :  { %9326 = sst [smem:[#allocation77_spill]] %s8086_s24 }
  0x3a   :  { %9327 = sst [smem:[#allocation78_spill]] %s8091_s30 }
  0x3b   :  { %s8106_s8 = sld [smem:[%s9227_s0 + %s7881_s7]]   ;;  %s7885_s7 = smov 34  }
  0x3c   :  { %9328 = sst [smem:[#allocation79_spill]] %s8096_s6 }
  0x3d   :  { %s8111_s27 = sld [smem:[%s9227_s0 + %s7882_s15]]   ;;  %s7886_s15 = smov 35  }
  0x3e   :  { %9329 = sst [smem:[#allocation80_spill]] %s8101_s20 }
  0x3f   :  { %s8116_s6 = sld [smem:[%s9227_s0 + %s7883_s22]]   ;;  %s7887_s22 = smov 36  }
  0x40   :  { %s8121_s20 = sld [smem:[%s9227_s0 + %s7884_s28]]   ;;  %s7888_s28 = smov 37  }
  0x41   :  { %9330 = sst [smem:[#allocation81_spill]] %s8106_s8 }
  0x42   :  { %s8126_s4 = sld [smem:[%s9227_s0 + %s7885_s7]]   ;;  %s7889_s7 = smov 38  }
  0x43   :  { %s8131_s3 = sld [smem:[%s9227_s0 + %s7886_s15]]   ;;  %s7890_s15 = smov 39  }
  0x44   :  { %s8136_s8 = sld [smem:[%s9227_s0 + %s7887_s22]]   ;;  %s7891_s22 = smov 40  }
  0x45   :  { %9331 = sst [smem:[#allocation82_spill]] %s8116_s6 }
  0x46   :  { %s8141_s19 = sld [smem:[%s9227_s0 + %s7888_s28]]   ;;  %s7892_s28 = smov 41  }
  0x47   :  { %s8146_s14 = sld [smem:[%s9227_s0 + %s7889_s7]]   ;;  %s7893_s7 = smov 42  }
  0x48   :  { %9332 = sst [smem:[#allocation83_spill]] %s8126_s4 }
  0x49   :  { %9333 = sst [smem:[#allocation84_spill]] %s8131_s3 }
  0x4a   :  { %9334 = sst [smem:[#allocation85_spill]] %s8136_s8 }
  0x4b   :  { %s8151_s29 = sld [smem:[%s9227_s0 + %s7890_s15]]   ;;  %s7894_s15 = smov 43  }
  0x4c   :  { %s8156_s12 = sld [smem:[%s9227_s0 + %s7891_s22]]   ;;  %s7895_s22 = smov 44  }
  0x4d   :  { %9335 = sst [smem:[#allocation86_spill]] %s8146_s14 }
  0x4e   :  { %s8161_s24 = sld [smem:[%s9227_s0 + %s7892_s28]]   ;;  %s7896_s28 = smov 45  }
  0x4f   :  { %s8166_s30 = sld [smem:[%s9227_s0 + %s7893_s7]]   ;;  %s7897_s7 = smov 46  }
  0x50   :  { %s8171_s14 = sld [smem:[%s9227_s0 + %s7894_s15]]   ;;  %s7898_s15 = smov 47  }
  0x51   :  { %s8181_s3 = sld [smem:[%s9227_s0 + %s7896_s28]]   ;;  %s7900_s28 = smov 49  }
  0x52   :  { %9336 = sst [smem:[#allocation87_spill]] %s8156_s12 }
  0x53   :  { %s8176_s12 = sld [smem:[%s9227_s0 + %s7895_s22]]   ;;  %s7899_s22 = smov 48  }
  0x54   :  { %s8186_s8 = sld [smem:[%s9227_s0 + %s7897_s7]]   ;;  %s7901_s7 = smov 50  }
  0x55   :  { %s8191_s17 = sld [smem:[%s9227_s0 + %s7898_s15]]   ;;  %s7902_s15 = smov 51  }
  0x56   :  { %9337 = sst [smem:[#allocation88_spill]] %s8171_s14 }
  0x57   :  { %9338 = sst [smem:[#allocation89_spill]] %s8181_s3 }
  0x58   :  { %s8196_s13 = sld [smem:[%s9227_s0 + %s7899_s22]]   ;;  %s7903_s22 = smov 52  }
  0x59   :  { %s8201_s21 = sld [smem:[%s9227_s0 + %s7900_s28]]   ;;  %s7904_s28 = smov 53  }
  0x5a   :  { %9339 = sst [smem:[#allocation90_spill]] %s8186_s8 }
  0x5b   :  { %9340 = sst [smem:[#allocation91_spill]] %s8191_s17 }
  0x5c   :  { %s8206_s9 = sld [smem:[%s9227_s0 + %s7901_s7]]   ;;  %s7905_s7 = smov 54  }
  0x5d   :  { %s8211_s25 = sld [smem:[%s9227_s0 + %s7902_s15]]   ;;  %s7906_s15 = smov 55  }
  0x5e   :  { %9341 = sst [smem:[#allocation92_spill]] %s8196_s13 }
  0x5f   :  { %9342 = sst [smem:[#allocation93_spill]] %s8201_s21 }
  0x60   :  { %s8216_s13 = sld [smem:[%s9227_s0 + %s7903_s22]]   ;;  %s7907_s22 = smov 56  }
  0x61   :  { %s8221_s21 = sld [smem:[%s9227_s0 + %s7904_s28]]   ;;  %s7908_s28 = smov 57  }
  0x62   :  { %9343 = sst [smem:[#allocation94_spill]] %s8206_s9 }
  0x63   :  { %9344 = sst [smem:[#allocation95_spill]] %s8211_s25 }
  0x64   :  { %s8226_s5 = sld [smem:[%s9227_s0 + %s7905_s7]]   ;;  %s7909_s7 = smov 58  }
  0x65   :  { %s8231_s25 = sld [smem:[%s9227_s0 + %s7906_s15]]   ;;  %s7910_s15 = smov 59  }
  0x66   :  { %9345 = sst [smem:[#allocation96_spill]] %s8216_s13 }
  0x67   :  { %9346 = sst [smem:[#allocation97_spill]] %s8221_s21 }
  0x68   :  { %s8236_s13 = sld [smem:[%s9227_s0 + %s7907_s22]]   ;;  %s7911_s22 = smov 60  }
  0x69   :  { %s8241_s21 = sld [smem:[%s9227_s0 + %s7908_s28]]   ;;  %s7912_s28 = smov 61  }
  0x6a   :  { %9347 = sst [smem:[#allocation98_spill]] %s8226_s5 }
  0x6b   :  { %9348 = sst [smem:[#allocation99_spill]] %s8231_s25 }
  0x6c   :  { %s8246_s17 = sld [smem:[%s9227_s0 + %s7909_s7]]   ;;  %s7913_s7 = smov 62  }
  0x6d   :  { %s8251_s25 = sld [smem:[%s9227_s0 + %s7910_s15]]   ;;  %s7914_s15 = smov 63  }
  0x6e   :  { %s8256_s3 = sld [smem:[%s9227_s0 + %s7911_s22]]   ;;  %s7915_s22 = smov 64  }
  0x6f   :  { %9349 = sst [smem:[#allocation100_spill]] %s8241_s21 }
  0x70   :  { %s8261_s21 = sld [smem:[%s9227_s0 + %s7912_s28]]  }
  0x71   :  { %s8276_s14 = sld [smem:[%s9227_s0 + %s7915_s22]]  }
  0x72   :  { %9350 = sst [smem:[#allocation101_spill]] %s8246_s17 }
  0x73   :  { %9351 = sst [smem:[#allocation102_spill]] %s8251_s25 }
  0x74   :  { %9352 = sst [smem:[#allocation103_spill]] %s8256_s3 }
  0x75   :  { %s8266_s17 = sld [smem:[%s9227_s0 + %s7913_s7]]  }
  0x76   :  { %s8271_s25 = sld [smem:[%s9227_s0 + %s7914_s15]]  }
  0x77   :  { %134 = vsyncpa [#allocation3], 0 }
  0x78   :  { %135 = vsyncpa [#allocation6], 0 }
  0x79   :  { %136 = vsyncpa [#allocation9], 0 }
  0x7a   :  { %137 = vsyncpa [#allocation12], 0 }
  0x7b   :  { %138 = vsyncpa [#allocation15], 0 }
  0x7c   :  { %139 = vsyncpa [#allocation18], 0 }
  0x7d   :  { %140 = vsyncpa [#allocation21], 0 }
  0x7e   :  { %141 = vsyncpa [#allocation24], 0 }
  0x7f   :  { %142 = vsyncpa [#allocation27], 0 }
  0x80   :  { %143 = vsyncpa [#allocation30], 0 }
  0x81   :  { %144 = vsyncpa [#allocation33], 0 }
  0x82   :  { %145 = vsyncpa [#allocation36], 0 }
  0x83   :  { %146 = vsyncpa [#allocation4], 0 }
  0x84   :  { %148 = vsyncpa [#allocation4 + $0x1], 0  ;;  %s8278_s28 = smov 0   ;;  %s8280_s1 = smov 0  }
  0x85   :  { %s8282_s0 = smov 0   ;;  %s8284_s2 = smov 0  }
  0x86 LB: > { %s9353_s9 = sld [smem:[#allocation94_spill]]  ;;  %s9354_s8 = sld [smem:[#allocation90_spill]]  ;;  %s7842_s1 = sphi %s8280_s1, %s9458_s1   ;;  %s7838_s28 = sphi %s8278_s28, %s9457_s28   ;;  %s7850_s2 = sphi %s8284_s2, %s9454_s2   ;;  %s7846_s0 = sphi %s8282_s0, %s9456_s0  }
  0x87   : > { %s9355_s5 = sld [smem:[#allocation98_spill]]  ;;  %s9356_s3 = sld [smem:[#allocation103_spill]] }
  0x88   : > { %s9357_s6 = sld [smem:[#allocation82_spill]]  ;;  %s9358_s4 = sld [smem:[#allocation83_spill]] }
  0x89   : > { %9359 = sst [smem:[#allocation104_spill]] %s7838_s28  ;;  %s8299_s7 = sadd.s32 4294967295, %s7850_s2  }
  0x8a   : > { %9360 = sst [smem:[#allocation105_spill]] %s7846_s0  ;;  %s5894_s10 = sadd.s32 4294967294, %s7850_s2  }
  0x8b   : > { %s8303_s11 = sadd.s32 1, %s7850_s2   ;;  %s1515_s15 = sadd.s32 1, %s7846_s0 }
  0x8c   : > { %9361 = sst [smem:[#allocation106_spill]] %s8303_s11  ;;  %s1512_s16 = ssub.s32 %s7850_s2, %s8303_s11 }
  0x8d   : > { %p1525_p0 = scmp.ne.s32.totalorder %s7846_s0, %s7842_s1  ;;  %p1513_p1 = scmp.eq.s32.totalorder %s1512_s16, 0 }
  0x8e   : > { %p1526_p2 = scmp.eq.s32.totalorder %s8299_s7, 1  ;;  %p1531_p3 = scmp.ne.s32.totalorder %s7842_s1, %s7838_s28 }
  0x8f   : > { %p1532_p4 = scmp.eq.s32.totalorder %s5894_s10, 1  ;;  %p5895_p7 = scmp.ge.s32.totalorder %s7850_s2, 1 }
  0x90   : > { %s8314_s18 = scalar_select %p1513_p1, %s7846_s0, %s1515_s15  }
  0x91   : > { %p8316_p5 = por %p1526_p2, %p1525_p0  ;;  %p8320_p6 = por %p1532_p4, %p1531_p3 }
  0x92   : > { %9362 = sst [smem:[#allocation107_spill]] %s8314_s18  ;;  %p1539_p8 = scmp.lt.s32.totalorder %s7850_s2, 3 }
  0x93   : > { %s9363_s22 = scalar_select %p8316_p5, 1, 0 }
  0x94   : > { %s9364_s23 = scalar_select %p8320_p6, 1, 0 }
  0x95   : > { %p9261_p9 = scmp.eq.s32.totalorder %s8299_s7, 0  ;;  %p8327_p10 = pnand %p5895_p7, %p1539_p8 }
  0x96   : > { %9365 = sst [smem:[#allocation108_spill]] %s9364_s23  ;;  %s7916_s10 = smov [#allocation5]  }
  0x97   : > { %s9366_s26 = scalar_select %p8327_p10, 1, 0 }
  0x98   : > { %s1650_s15 = sshll.u32 %s7916_s10, 4  ;;  %p6710_p11 = pneg %p8327_p10  ;;  %s1651_s15 = int_to_ptr.vmem [resolvable:$true] %s1650_s15 }
  0x99   : > { %s7917_s16 = smov [#allocation8]   ;;  %s7918_s11 = smov [#allocation11]  }
  0x9a   : > { %s1672_s18 = sshll.u32 %s7917_s16, 4  ;;  %p8335_p12 = pnand %p9261_p9, %p6710_p11  ;;  %s8339_s18 = int_to_ptr.vmem [resolvable:$true] %s1672_s18 }
  0x9b   : > { %s1703_s23 = sshll.u32 %s7918_s11, 4  ;;  %s7124_s28 = scalar_lea.hbm %s9357_s6, 16  ;;  %s8341_s23 = int_to_ptr.vmem [resolvable:$true] %s1703_s23 }
  0x9c   : > { %p7125_p13 = scmp.ne.s32.totalorder %s9357_s6, %s7124_s28  ;;  %p8347_p0 = pneg %p8335_p12 }
  0x9d   : > { %p7131_p3 = scmp.lt.u32.totalorder %s7124_s28, %s9357_s6 }
  0x9e   : > { %p7127_p1 = pnand %p8347_p0, %p7125_p13 }
  0xa0   : > { %p7128_p2 = pneg %p7127_p1 }
  0xa2   : > { %p7133_p4 = pnand %p7131_p3, %p7128_p2 }
  0xa4   : > { %7136 = shalt.err (!%p7133_p4)
}
  0xa5   : > { %s7137_s16 = scalar_lea.vmem %s1651_s15, 16  ;;  %s7144_s11 = scalar_lea.vmem %s1651_s15, 32 }
  0xa6   : > { %p7138_p7 = scmp.ne.s32.totalorder %s1651_s15, %s7137_s16  ;;  %p7145_p9 = scmp.lt.s32.totalorder %s1651_s15, %s1651_s15 }
  0xa7   : > { %p7146_p6 = scmp.lt.s32.totalorder %s7144_s11, %s7137_s16 }
  0xa8   : > { %p7140_p8 = pnand %p7138_p7, %p8347_p0 }
  0xa9   : > { %p7147_p5 = por %p7146_p6, %p7145_p9 }
  0xaa   : > { %p7141_p11 = pneg %p7140_p8 }
  0xac   : > { %p7148_p10 = pnand %p7147_p5, %p7141_p11 }
  0xae   : > { %7151 = shalt.err (!%p7148_p10)
}
  0xaf   : > { %6716 = dma.hbm_to_vmem [thread:$0]  (!%p8335_p12), %s9357_s6, 16, %s1651_s15, [#allocation6]  }
  0xb0   : > { %s7152_s28 = scalar_lea.hbm %s9358_s4, 16 }
  0xb1   : > { %p7153_p13 = scmp.ne.s32.totalorder %s9358_s4, %s7152_s28  ;;  %p7159_p3 = scmp.lt.u32.totalorder %s7152_s28, %s9358_s4 }
  0xb3   : > { %p7155_p1 = pnand %p7153_p13, %p8347_p0 }
  0xb5   : > { %p7156_p2 = pneg %p7155_p1 }
  0xb7   : > { %p7161_p4 = pnand %p7159_p3, %p7156_p2 }
  0xb9   : > { %7164 = shalt.err (!%p7161_p4)
}
  0xba   : > { %s7165_s16 = scalar_lea.vmem %s8339_s18, 16  ;;  %s7172_s11 = scalar_lea.vmem %s8339_s18, 32 }
  0xbb   : > { %p7166_p5 = scmp.ne.s32.totalorder %s8339_s18, %s7165_s16  ;;  %p7173_p10 = scmp.lt.s32.totalorder %s8339_s18, %s8339_s18 }
  0xbc   : > { %p7174_p7 = scmp.lt.s32.totalorder %s7172_s11, %s7165_s16 }
  0xbd   : > { %p7168_p6 = pnand %p7166_p5, %p8347_p0 }
  0xbe   : > { %p7175_p8 = por %p7174_p7, %p7173_p10 }
  0xbf   : > { %p7169_p9 = pneg %p7168_p6 }
  0xc1   : > { %p7176_p11 = pnand %p7175_p8, %p7169_p9 }
  0xc3   : > { %7179 = shalt.err (!%p7176_p11)
}
  0xc4   : > { %6722 = dma.hbm_to_vmem [thread:$0]  (!%p8335_p12), %s9358_s4, 16, %s8339_s18, [#allocation9]  }
  0xc5   : > { %s7180_s15 = scalar_lea.hbm %s8151_s29, 16 }
  0xc6   : > { %p7181_p13 = scmp.ne.s32.totalorder %s8151_s29, %s7180_s15  ;;  %p7187_p3 = scmp.lt.u32.totalorder %s7180_s15, %s8151_s29 }
  0xc8   : > { %p7183_p1 = pnand %p7181_p13, %p8347_p0 }
  0xca   : > { %p7184_p2 = pneg %p7183_p1 }
  0xcc   : > { %p7189_p4 = pnand %p7187_p3, %p7184_p2 }
  0xce   : > { %7192 = shalt.err (!%p7189_p4)
}
  0xcf   : > { %s7193_s28 = scalar_lea.vmem %s8341_s23, 16  ;;  %s7200_s16 = scalar_lea.vmem %s8341_s23, 32 }
  0xd0   : > { %p7194_p5 = scmp.ne.s32.totalorder %s8341_s23, %s7193_s28  ;;  %p7201_p10 = scmp.lt.s32.totalorder %s8341_s23, %s8341_s23 }
  0xd1   : > { %p7202_p7 = scmp.lt.s32.totalorder %s7200_s16, %s7193_s28 }
  0xd2   : > { %p7196_p6 = pnand %p7194_p5, %p8347_p0 }
  0xd3   : > { %p7203_p8 = por %p7202_p7, %p7201_p10 }
  0xd4   : > { %p7197_p9 = pneg %p7196_p6 }
  0xd6   : > { %p7204_p11 = pnand %p7203_p8, %p7197_p9 }
  0xd8   : > { %7207 = shalt.err (!%p7204_p11)
}
  0xd9   : > { %6728 = dma.hbm_to_vmem [thread:$0]  (!%p8335_p12), %s8151_s29, 16, %s8341_s23, [#allocation12]  }
  0xda   : > { %s7919_s18 = smov [#allocation14]   ;;  %s7920_s15 = smov [#allocation17]  }
  0xdb   : > { %s1728_s11 = sshll.u32 %s7919_s18, 4  ;;  %s1750_s4 = sshll.u32 %s7920_s15, 4  ;;  %s1729_s11 = int_to_ptr.vmem [resolvable:$true] %s1728_s11  ;;  %s1751_s4 = int_to_ptr.vmem [resolvable:$true] %s1750_s4 }
  0xdc   : > { %s7208_s6 = scalar_lea.hbm %s8166_s30, 16 }
  0xdd   : > { %p7209_p13 = scmp.ne.s32.totalorder %s8166_s30, %s7208_s6  ;;  %p7215_p3 = scmp.lt.u32.totalorder %s7208_s6, %s8166_s30 }
  0xdf   : > { %p7211_p1 = pnand %p7209_p13, %p8347_p0 }
  0xe1   : > { %p7212_p2 = pneg %p7211_p1 }
  0xe3   : > { %p7217_p4 = pnand %p7215_p3, %p7212_p2 }
  0xe5   : > { %7220 = shalt.err (!%p7217_p4)
}
  0xe6   : > { %s7221_s28 = scalar_lea.vmem %s1729_s11, 16  ;;  %s7228_s23 = scalar_lea.vmem %s1729_s11, 32 }
  0xe7   : > { %p7222_p5 = scmp.ne.s32.totalorder %s1729_s11, %s7221_s28  ;;  %p7229_p10 = scmp.lt.s32.totalorder %s1729_s11, %s1729_s11 }
  0xe8   : > { %p7230_p7 = scmp.lt.s32.totalorder %s7228_s23, %s7221_s28 }
  0xe9   : > { %p7224_p6 = pnand %p7222_p5, %p8347_p0 }
  0xea   : > { %p7231_p8 = por %p7230_p7, %p7229_p10 }
  0xeb   : > { %p7225_p9 = pneg %p7224_p6 }
  0xed   : > { %p7232_p11 = pnand %p7231_p8, %p7225_p9 }
  0xef   : > { %7235 = shalt.err (!%p7232_p11)
}
  0xf0   : > { %6734 = dma.hbm_to_vmem [thread:$0]  (!%p8335_p12), %s8166_s30, 16, %s1729_s11, [#allocation15]  }
  0xf1   : > { %s7236_s6 = scalar_lea.hbm %s8176_s12, 16 }
  0xf2   : > { %p7237_p13 = scmp.ne.s32.totalorder %s8176_s12, %s7236_s6  ;;  %p7243_p3 = scmp.lt.u32.totalorder %s7236_s6, %s8176_s12 }
  0xf4   : > { %p7239_p1 = pnand %p7237_p13, %p8347_p0 }
  0xf6   : > { %p7240_p2 = pneg %p7239_p1 }
  0xf8   : > { %p7245_p4 = pnand %p7243_p3, %p7240_p2 }
  0xfa   : > { %7248 = shalt.err (!%p7245_p4)
}
  0xfb   : > { %s7249_s16 = scalar_lea.vmem %s1751_s4, 16  ;;  %s7256_s18 = scalar_lea.vmem %s1751_s4, 32 }
  0xfc   : > { %p7250_p5 = scmp.ne.s32.totalorder %s1751_s4, %s7249_s16  ;;  %p7257_p10 = scmp.lt.s32.totalorder %s1751_s4, %s1751_s4 }
  0xfd   : > { %p7258_p7 = scmp.lt.s32.totalorder %s7256_s18, %s7249_s16 }
  0xfe   : > { %p7252_p6 = pnand %p7250_p5, %p8347_p0 }
  0xff   : > { %p7259_p8 = por %p7258_p7, %p7257_p10 }
 0x100   : > { %p7253_p9 = pneg %p7252_p6 }
 0x102   : > { %p7260_p11 = pnand %p7259_p8, %p7253_p9 }
 0x104   : > { %7263 = shalt.err (!%p7260_p11)
}
 0x105   : > { %6740 = dma.hbm_to_vmem [thread:$0]  (!%p8335_p12), %s8176_s12, 16, %s1751_s4, [#allocation18]  }
 0x106   : > { %s7921_s11 = smov [#allocation20]   ;;  %s7922_s28 = smov [#allocation23]  }
 0x107   : > { %s1772_s15 = sshll.u32 %s7921_s11, 4  ;;  %s1800_s23 = sshll.u32 %s7922_s28, 4  ;;  %s1773_s15 = int_to_ptr.vmem [resolvable:$true] %s1772_s15  ;;  %s1801_s23 = int_to_ptr.vmem [resolvable:$true] %s1800_s23 }
 0x108   : > { %s7264_s6 = scalar_lea.hbm %s9354_s8, 16 }
 0x109   : > { %p7265_p13 = scmp.ne.s32.totalorder %s9354_s8, %s7264_s6  ;;  %p7271_p3 = scmp.lt.u32.totalorder %s7264_s6, %s9354_s8 }
 0x10b   : > { %p7267_p1 = pnand %p7265_p13, %p8347_p0 }
 0x10d   : > { %p7268_p2 = pneg %p7267_p1 }
 0x10f   : > { %p7273_p4 = pnand %p7271_p3, %p7268_p2 }
 0x111   : > { %7276 = shalt.err (!%p7273_p4)
}
 0x112   : > { %s7277_s16 = scalar_lea.vmem %s1773_s15, 16  ;;  %s7284_s4 = scalar_lea.vmem %s1773_s15, 32 }
 0x113   : > { %p7278_p5 = scmp.ne.s32.totalorder %s1773_s15, %s7277_s16  ;;  %p7285_p10 = scmp.lt.s32.totalorder %s1773_s15, %s1773_s15 }
 0x114   : > { %p7286_p7 = scmp.lt.s32.totalorder %s7284_s4, %s7277_s16 }
 0x115   : > { %p7280_p6 = pnand %p7278_p5, %p8347_p0 }
 0x116   : > { %p7287_p8 = por %p7286_p7, %p7285_p10 }
 0x117   : > { %p7281_p9 = pneg %p7280_p6 }
 0x119   : > { %p7288_p11 = pnand %p7287_p8, %p7281_p9 }
 0x11b   : > { %7291 = shalt.err (!%p7288_p11)
}
 0x11c   : > { %6746 = dma.hbm_to_vmem [thread:$0]  (!%p8335_p12), %s9354_s8, 16, %s1773_s15, [#allocation21]  }
 0x11d   : > { %s7292_s18 = scalar_lea.hbm %s9353_s9, 16 }
 0x11e   : > { %p7293_p13 = scmp.ne.s32.totalorder %s9353_s9, %s7292_s18  ;;  %p7299_p3 = scmp.lt.u32.totalorder %s7292_s18, %s9353_s9 }
 0x120   : > { %p7295_p1 = pnand %p7293_p13, %p8347_p0 }
 0x122   : > { %p7296_p2 = pneg %p7295_p1 }
 0x124   : > { %p7301_p4 = pnand %p7299_p3, %p7296_p2 }
 0x126   : > { %7304 = shalt.err (!%p7301_p4)
}
 0x127   : > { %s7305_s11 = scalar_lea.vmem %s1801_s23, 16  ;;  %s7312_s28 = scalar_lea.vmem %s1801_s23, 32 }
 0x128   : > { %p7306_p5 = scmp.ne.s32.totalorder %s1801_s23, %s7305_s11  ;;  %p7313_p10 = scmp.lt.s32.totalorder %s1801_s23, %s1801_s23 }
 0x129   : > { %p7314_p7 = scmp.lt.s32.totalorder %s7312_s28, %s7305_s11 }
 0x12a   : > { %p7308_p6 = pnand %p7306_p5, %p8347_p0 }
 0x12b   : > { %p7315_p8 = por %p7314_p7, %p7313_p10 }
 0x12c   : > { %p7309_p9 = pneg %p7308_p6 }
 0x12e   : > { %p7316_p11 = pnand %p7315_p8, %p7309_p9 }
 0x130   : > { %7319 = shalt.err (!%p7316_p11)
}
 0x131   : > { %6752 = dma.hbm_to_vmem [thread:$0]  (!%p8335_p12), %s9353_s9, 16, %s1801_s23, [#allocation24]  }
 0x132   : > { %s7923_s15 = smov [#allocation26]   ;;  %s7924_s16 = smov [#allocation29]  }
 0x133   : > { %s1828_s6 = sshll.u32 %s7923_s15, 4  ;;  %s1850_s4 = sshll.u32 %s7924_s16, 4  ;;  %s1829_s6 = int_to_ptr.vmem [resolvable:$true] %s1828_s6  ;;  %s1851_s4 = int_to_ptr.vmem [resolvable:$true] %s1850_s4 }
 0x134   : > { %s7320_s18 = scalar_lea.hbm %s9355_s5, 16 }
 0x135   : > { %p7321_p13 = scmp.ne.s32.totalorder %s9355_s5, %s7320_s18  ;;  %p7327_p3 = scmp.lt.u32.totalorder %s7320_s18, %s9355_s5 }
 0x137   : > { %p7323_p1 = pnand %p7321_p13, %p8347_p0 }
 0x139   : > { %p7324_p2 = pneg %p7323_p1 }
 0x13b   : > { %p7329_p4 = pnand %p7327_p3, %p7324_p2 }
 0x13d   : > { %7332 = shalt.err (!%p7329_p4)
}
 0x13e   : > { %s7333_s11 = scalar_lea.vmem %s1829_s6, 16  ;;  %s7340_s23 = scalar_lea.vmem %s1829_s6, 32 }
 0x13f   : > { %p7334_p5 = scmp.ne.s32.totalorder %s1829_s6, %s7333_s11  ;;  %p7341_p10 = scmp.lt.s32.totalorder %s1829_s6, %s1829_s6 }
 0x140   : > { %p7342_p7 = scmp.lt.s32.totalorder %s7340_s23, %s7333_s11 }
 0x141   : > { %p7336_p6 = pnand %p7334_p5, %p8347_p0 }
 0x142   : > { %p7343_p8 = por %p7342_p7, %p7341_p10 }
 0x143   : > { %p7337_p9 = pneg %p7336_p6 }
 0x145   : > { %p7344_p11 = pnand %p7343_p8, %p7337_p9 }
 0x147   : > { %7347 = shalt.err (!%p7344_p11)
}
 0x148   : > { %6758 = dma.hbm_to_vmem [thread:$0]  (!%p8335_p12), %s9355_s5, 16, %s1829_s6, [#allocation27]  }
 0x149   : > { %s7348_s28 = scalar_lea.hbm %s8236_s13, 16 }
 0x14a   : > { %p7349_p13 = scmp.ne.s32.totalorder %s8236_s13, %s7348_s28  ;;  %p7355_p3 = scmp.lt.u32.totalorder %s7348_s28, %s8236_s13 }
 0x14c   : > { %p7351_p1 = pnand %p7349_p13, %p8347_p0 }
 0x14e   : > { %p7352_p2 = pneg %p7351_p1 }
 0x150   : > { %p7357_p4 = pnand %p7355_p3, %p7352_p2 }
 0x152   : > { %7360 = shalt.err (!%p7357_p4)
}
 0x153   : > { %s7361_s15 = scalar_lea.vmem %s1851_s4, 16  ;;  %s7368_s16 = scalar_lea.vmem %s1851_s4, 32 }
 0x154   : > { %p7362_p5 = scmp.ne.s32.totalorder %s1851_s4, %s7361_s15  ;;  %p7369_p10 = scmp.lt.s32.totalorder %s1851_s4, %s1851_s4 }
 0x155   : > { %p7370_p7 = scmp.lt.s32.totalorder %s7368_s16, %s7361_s15 }
 0x156   : > { %p7364_p6 = pnand %p7362_p5, %p8347_p0 }
 0x157   : > { %p7371_p8 = por %p7370_p7, %p7369_p10 }
 0x158   : > { %p7365_p9 = pneg %p7364_p6 }
 0x15a   : > { %p7372_p11 = pnand %p7371_p8, %p7365_p9 }
 0x15c   : > { %7375 = shalt.err (!%p7372_p11)
}
 0x15d   : > { %6764 = dma.hbm_to_vmem [thread:$0]  (!%p8335_p12), %s8236_s13, 16, %s1851_s4, [#allocation30]  }
 0x15e   : > { %s7925_s6 = smov [#allocation32]   ;;  %s7926_s11 = smov [#allocation2]  }
 0x15f   : > { %s1878_s18 = sshll.u32 %s7925_s6, 4  ;;  %s1639_s23 = sshll.u32 %s7926_s11, 4  ;;  %s1879_s18 = int_to_ptr.vmem [resolvable:$true] %s1878_s18  ;;  %s1640_s23 = int_to_ptr.vmem [resolvable:$true] %s1639_s23 }
 0x160   : > { %s7376_s28 = scalar_lea.hbm %s9356_s3, 16 }
 0x161   : > { %p7377_p13 = scmp.ne.s32.totalorder %s9356_s3, %s7376_s28  ;;  %p7383_p3 = scmp.lt.u32.totalorder %s7376_s28, %s9356_s3 }
 0x163   : > { %p7379_p1 = pnand %p7377_p13, %p8347_p0 }
 0x165   : > { %p7380_p2 = pneg %p7379_p1 }
 0x167   : > { %p7385_p4 = pnand %p7383_p3, %p7380_p2 }
 0x169   : > { %7388 = shalt.err (!%p7385_p4)
}
 0x16a   : > { %s7389_s15 = scalar_lea.vmem %s1879_s18, 16  ;;  %s7396_s4 = scalar_lea.vmem %s1879_s18, 32 }
 0x16b   : > { %p7390_p5 = scmp.ne.s32.totalorder %s1879_s18, %s7389_s15  ;;  %p7397_p10 = scmp.lt.s32.totalorder %s1879_s18, %s1879_s18 }
 0x16c   : > { %p7398_p7 = scmp.lt.s32.totalorder %s7396_s4, %s7389_s15 }
 0x16d   : > { %p7392_p6 = pnand %p7390_p5, %p8347_p0 }
 0x16e   : > { %p7399_p8 = por %p7398_p7, %p7397_p10 }
 0x16f   : > { %p7393_p9 = pneg %p7392_p6 }
 0x171   : > { %p7400_p11 = pnand %p7399_p8, %p7393_p9 }
 0x173   : > { %7403 = shalt.err (!%p7400_p11)
}
 0x174   : > { %6770 = dma.hbm_to_vmem [thread:$0]  (!%p8335_p12), %s9356_s3, 16, %s1879_s18, [#allocation33]  }
 0x175   : > { %s7404_s16 = scalar_lea.hbm %s8111_s27, 16 }
 0x176   : > { %p7405_p13 = scmp.ne.s32.totalorder %s8111_s27, %s7404_s16  ;;  %p7411_p3 = scmp.lt.u32.totalorder %s7404_s16, %s8111_s27 }
 0x178   : > { %p7407_p1 = pnand %p7405_p13, %p8347_p0 }
 0x17a   : > { %p7408_p2 = pneg %p7407_p1 }
 0x17c   : > { %p7413_p4 = pnand %p7411_p3, %p7408_p2 }
 0x17e   : > { %7416 = shalt.err (!%p7413_p4)
}
 0x17f   : > { %s7417_s6 = scalar_lea.vmem %s1640_s23, 16  ;;  %s7424_s11 = scalar_lea.vmem %s1640_s23, 32 }
 0x180   : > { %p7418_p5 = scmp.ne.s32.totalorder %s1640_s23, %s7417_s6  ;;  %p7425_p10 = scmp.lt.s32.totalorder %s1640_s23, %s1640_s23 }
 0x181   : > { %p7426_p7 = scmp.lt.s32.totalorder %s7424_s11, %s7417_s6 }
 0x182   : > { %p7420_p6 = pnand %p7418_p5, %p8347_p0 }
 0x183   : > { %p7427_p8 = por %p7426_p7, %p7425_p10 }
 0x184   : > { %p7421_p9 = pneg %p7420_p6 }
 0x186   : > { %p7428_p11 = pnand %p7427_p8, %p7421_p9 }
 0x188   : > { %7431 = shalt.err (!%p7428_p11)
}
 0x189   : > { %6713 = dma.hbm_to_vmem [thread:$0]  (!%p8335_p12), %s8111_s27, 16, %s1640_s23, [#allocation3]  }
 0x18a   : > { %s7927_s18 = smov [#allocation7]   ;;  %s7928_s15 = smov [#allocation10]  }
 0x18b   : > { %s1661_s28 = sshll.u32 %s7927_s18, 4  ;;  %s1689_s4 = sshll.u32 %s7928_s15, 4  ;;  %s1662_s28 = int_to_ptr.vmem [resolvable:$true] %s1661_s28  ;;  %s1690_s4 = int_to_ptr.vmem [resolvable:$true] %s1689_s4 }
 0x18c   : > { %s7432_s16 = scalar_lea.hbm %s8121_s20, 16 }
 0x18d   : > { %p7433_p13 = scmp.ne.s32.totalorder %s8121_s20, %s7432_s16  ;;  %p7439_p3 = scmp.lt.u32.totalorder %s7432_s16, %s8121_s20 }
 0x18f   : > { %p7435_p1 = pnand %p7433_p13, %p8347_p0 }
 0x191   : > { %p7436_p2 = pneg %p7435_p1 }
 0x193   : > { %p7441_p4 = pnand %p7439_p3, %p7436_p2 }
 0x195   : > { %7444 = shalt.err (!%p7441_p4)
}
 0x196   : > { %s7445_s6 = scalar_lea.vmem %s1662_s28, 16  ;;  %s7452_s23 = scalar_lea.vmem %s1662_s28, 32 }
 0x197   : > { %p7446_p5 = scmp.ne.s32.totalorder %s1662_s28, %s7445_s6  ;;  %p7453_p10 = scmp.lt.s32.totalorder %s1662_s28, %s1662_s28 }
 0x198   : > { %p7454_p7 = scmp.lt.s32.totalorder %s7452_s23, %s7445_s6 }
 0x199   : > { %p7448_p6 = pnand %p7446_p5, %p8347_p0 }
 0x19a   : > { %p7455_p8 = por %p7454_p7, %p7453_p10 }
 0x19b   : > { %p7449_p9 = pneg %p7448_p6 }
 0x19d   : > { %p7456_p11 = pnand %p7455_p8, %p7449_p9 }
 0x19f   : > { %7459 = shalt.err (!%p7456_p11)
}
 0x1a0   : > { %6719 = dma.hbm_to_vmem [thread:$0]  (!%p8335_p12), %s8121_s20, 16, %s1662_s28, [#allocation6]  }
 0x1a1   : > { %s7460_s11 = scalar_lea.hbm %s8141_s19, 16 }
 0x1a2   : > { %p7461_p13 = scmp.ne.s32.totalorder %s8141_s19, %s7460_s11  ;;  %p7467_p3 = scmp.lt.u32.totalorder %s7460_s11, %s8141_s19 }
 0x1a4   : > { %p7463_p1 = pnand %p7461_p13, %p8347_p0 }
 0x1a6   : > { %p7464_p2 = pneg %p7463_p1 }
 0x1a8   : > { %p7469_p4 = pnand %p7467_p3, %p7464_p2 }
 0x1aa   : > { %7472 = shalt.err (!%p7469_p4)
}
 0x1ab   : > { %s7473_s18 = scalar_lea.vmem %s1690_s4, 16  ;;  %s7480_s15 = scalar_lea.vmem %s1690_s4, 32 }
 0x1ac   : > { %p7474_p5 = scmp.ne.s32.totalorder %s1690_s4, %s7473_s18  ;;  %p7481_p10 = scmp.lt.s32.totalorder %s1690_s4, %s1690_s4 }
 0x1ad   : > { %p7482_p7 = scmp.lt.s32.totalorder %s7480_s15, %s7473_s18 }
 0x1ae   : > { %p7476_p6 = pnand %p7474_p5, %p8347_p0 }
 0x1af   : > { %p7483_p8 = por %p7482_p7, %p7481_p10 }
 0x1b0   : > { %p7477_p9 = pneg %p7476_p6 }
 0x1b2   : > { %p7484_p11 = pnand %p7483_p8, %p7477_p9 }
 0x1b4   : > { %7487 = shalt.err (!%p7484_p11)
}
 0x1b5   : > { %6725 = dma.hbm_to_vmem [thread:$0]  (!%p8335_p12), %s8141_s19, 16, %s1690_s4, [#allocation9]  }
 0x1b6   : > { %s7929_s28 = smov [#allocation13]   ;;  %s7930_s6 = smov [#allocation16]  }
 0x1b7   : > { %s1717_s16 = sshll.u32 %s7929_s28, 4  ;;  %s1739_s23 = sshll.u32 %s7930_s6, 4  ;;  %s1718_s16 = int_to_ptr.vmem [resolvable:$true] %s1717_s16  ;;  %s1740_s23 = int_to_ptr.vmem [resolvable:$true] %s1739_s23 }
 0x1b8   : > { %s7488_s11 = scalar_lea.hbm %s8161_s24, 16 }
 0x1b9   : > { %p7489_p13 = scmp.ne.s32.totalorder %s8161_s24, %s7488_s11  ;;  %p7495_p3 = scmp.lt.u32.totalorder %s7488_s11, %s8161_s24 }
 0x1bb   : > { %p7491_p1 = pnand %p7489_p13, %p8347_p0 }
 0x1bd   : > { %p7492_p2 = pneg %p7491_p1 }
 0x1bf   : > { %p7497_p4 = pnand %p7495_p3, %p7492_p2 }
 0x1c1   : > { %7500 = shalt.err (!%p7497_p4)
}
 0x1c2   : > { %s7501_s18 = scalar_lea.vmem %s1718_s16, 16  ;;  %s7508_s4 = scalar_lea.vmem %s1718_s16, 32 }
 0x1c3   : > { %p7502_p5 = scmp.ne.s32.totalorder %s1718_s16, %s7501_s18  ;;  %p7509_p10 = scmp.lt.s32.totalorder %s1718_s16, %s1718_s16 }
 0x1c4   : > { %p7510_p7 = scmp.lt.s32.totalorder %s7508_s4, %s7501_s18 }
 0x1c5   : > { %p7504_p6 = pnand %p7502_p5, %p8347_p0 }
 0x1c6   : > { %p7511_p8 = por %p7510_p7, %p7509_p10 }
 0x1c7   : > { %p7505_p9 = pneg %p7504_p6 }
 0x1c9   : > { %p7512_p11 = pnand %p7511_p8, %p7505_p9 }
 0x1cb   : > { %7515 = shalt.err (!%p7512_p11)
}
 0x1cc   : > { %s9369_s15 = sld [smem:[#allocation88_spill]] }
 0x1cd   : > { %6731 = dma.hbm_to_vmem [thread:$0]  (!%p8335_p12), %s8161_s24, 16, %s1718_s16, [#allocation12]  }
 0x1d2   : > { %s7516_s28 = scalar_lea.hbm %s9369_s15, 16 }
 0x1d3   : > { %p7517_p13 = scmp.ne.s32.totalorder %s9369_s15, %s7516_s28  ;;  %p7523_p3 = scmp.lt.u32.totalorder %s7516_s28, %s9369_s15 }
 0x1d5   : > { %p7519_p1 = pnand %p7517_p13, %p8347_p0 }
 0x1d7   : > { %p7520_p2 = pneg %p7519_p1 }
 0x1d9   : > { %p7525_p4 = pnand %p7523_p3, %p7520_p2 }
 0x1db   : > { %7528 = shalt.err (!%p7525_p4)
}
 0x1dc   : > { %s7529_s6 = scalar_lea.vmem %s1740_s23, 16  ;;  %s7536_s11 = scalar_lea.vmem %s1740_s23, 32 }
 0x1dd   : > { %p7530_p5 = scmp.ne.s32.totalorder %s1740_s23, %s7529_s6  ;;  %p7537_p10 = scmp.lt.s32.totalorder %s1740_s23, %s1740_s23 }
 0x1de   : > { %p7538_p7 = scmp.lt.s32.totalorder %s7536_s11, %s7529_s6 }
 0x1df   : > { %p7532_p6 = pnand %p7530_p5, %p8347_p0 }
 0x1e0   : > { %p7539_p8 = por %p7538_p7, %p7537_p10 }
 0x1e1   : > { %p7533_p9 = pneg %p7532_p6 }
 0x1e3   : > { %p7540_p11 = pnand %p7539_p8, %p7533_p9 }
 0x1e5   : > { %7543 = shalt.err (!%p7540_p11)
}
 0x1e6   : > { %s9370_s16 = sld [smem:[#allocation89_spill]]  ;;  %s7931_s18 = smov [#allocation19]  }
 0x1e7   : > { %6737 = dma.hbm_to_vmem [thread:$0]  (!%p8335_p12), %s9369_s15, 16, %s1740_s23, [#allocation15]  }
 0x1e8   : > { %s1761_s4 = sshll.u32 %s7931_s18, 4  ;;  %s7932_s28 = smov [#allocation22]   ;;  %s1762_s4 = int_to_ptr.vmem [resolvable:$true] %s1761_s4 }
 0x1e9   : > { %s1783_s3 = sshll.u32 %s7932_s28, 4  ;;  %s1784_s3 = int_to_ptr.vmem [resolvable:$true] %s1783_s3 }
 0x1ec   : > { %s7544_s5 = scalar_lea.hbm %s9370_s16, 16 }
 0x1ed   : > { %p7545_p13 = scmp.ne.s32.totalorder %s9370_s16, %s7544_s5  ;;  %p7551_p3 = scmp.lt.u32.totalorder %s7544_s5, %s9370_s16 }
 0x1ef   : > { %p7547_p1 = pnand %p7545_p13, %p8347_p0 }
 0x1f1   : > { %p7548_p2 = pneg %p7547_p1 }
 0x1f3   : > { %p7553_p4 = pnand %p7551_p3, %p7548_p2 }
 0x1f5   : > { %7556 = shalt.err (!%p7553_p4)
}
 0x1f6   : > { %s7557_s6 = scalar_lea.vmem %s1762_s4, 16  ;;  %s7564_s23 = scalar_lea.vmem %s1762_s4, 32 }
 0x1f7   : > { %p7558_p5 = scmp.ne.s32.totalorder %s1762_s4, %s7557_s6  ;;  %p7565_p10 = scmp.lt.s32.totalorder %s1762_s4, %s1762_s4 }
 0x1f8   : > { %p7566_p7 = scmp.lt.s32.totalorder %s7564_s23, %s7557_s6 }
 0x1f9   : > { %p7560_p6 = pnand %p7558_p5, %p8347_p0 }
 0x1fa   : > { %p7567_p8 = por %p7566_p7, %p7565_p10 }
 0x1fb   : > { %p7561_p9 = pneg %p7560_p6 }
 0x1fd   : > { %p7568_p11 = pnand %p7567_p8, %p7561_p9 }
 0x1ff   : > { %7571 = shalt.err (!%p7568_p11)
}
 0x200   : > { %s9371_s11 = sld [smem:[#allocation91_spill]] }
 0x201   : > { %6743 = dma.hbm_to_vmem [thread:$0]  (!%p8335_p12), %s9370_s16, 16, %s1762_s4, [#allocation18]  }
 0x206   : > { %s7572_s5 = scalar_lea.hbm %s9371_s11, 16 }
 0x207   : > { %p7573_p13 = scmp.ne.s32.totalorder %s9371_s11, %s7572_s5  ;;  %p7579_p3 = scmp.lt.u32.totalorder %s7572_s5, %s9371_s11 }
 0x209   : > { %p7575_p1 = pnand %p7573_p13, %p8347_p0 }
 0x20b   : > { %p7576_p2 = pneg %p7575_p1 }
 0x20d   : > { %p7581_p4 = pnand %p7579_p3, %p7576_p2 }
 0x20f   : > { %7584 = shalt.err (!%p7581_p4)
}
 0x210   : > { %s7585_s18 = scalar_lea.vmem %s1784_s3, 16  ;;  %s7592_s28 = scalar_lea.vmem %s1784_s3, 32 }
 0x211   : > { %p7586_p5 = scmp.ne.s32.totalorder %s1784_s3, %s7585_s18  ;;  %p7593_p10 = scmp.lt.s32.totalorder %s1784_s3, %s1784_s3 }
 0x212   : > { %p7594_p7 = scmp.lt.s32.totalorder %s7592_s28, %s7585_s18 }
 0x213   : > { %p7588_p6 = pnand %p7586_p5, %p8347_p0 }
 0x214   : > { %p7595_p8 = por %p7594_p7, %p7593_p10 }
 0x215   : > { %p7589_p9 = pneg %p7588_p6 }
 0x217   : > { %p7596_p11 = pnand %p7595_p8, %p7589_p9 }
 0x219   : > { %7599 = shalt.err (!%p7596_p11)
}
 0x21a   : > { %s9372_s4 = sld [smem:[#allocation96_spill]]  ;;  %s7933_s6 = smov [#allocation25]  }
 0x21b   : > { %6749 = dma.hbm_to_vmem [thread:$0]  (!%p8335_p12), %s9371_s11, 16, %s1784_s3, [#allocation21]  }
 0x21c   : > { %s1814_s23 = sshll.u32 %s7933_s6, 4  ;;  %s7934_s5 = smov [#allocation28]   ;;  %s1815_s23 = int_to_ptr.vmem [resolvable:$true] %s1814_s23 }
 0x21d   : > { %s1839_s8 = sshll.u32 %s7934_s5, 4  ;;  %s1840_s8 = int_to_ptr.vmem [resolvable:$true] %s1839_s8 }
 0x220   : > { %s7600_s9 = scalar_lea.hbm %s9372_s4, 16 }
 0x221   : > { %p7601_p13 = scmp.ne.s32.totalorder %s9372_s4, %s7600_s9  ;;  %p7607_p3 = scmp.lt.u32.totalorder %s7600_s9, %s9372_s4 }
 0x223   : > { %p7603_p1 = pnand %p7601_p13, %p8347_p0 }
 0x225   : > { %p7604_p2 = pneg %p7603_p1 }
 0x227   : > { %p7609_p4 = pnand %p7607_p3, %p7604_p2 }
 0x229   : > { %7612 = shalt.err (!%p7609_p4)
}
 0x22a   : > { %s7613_s18 = scalar_lea.vmem %s1815_s23, 16  ;;  %s7620_s3 = scalar_lea.vmem %s1815_s23, 32 }
 0x22b   : > { %p7614_p5 = scmp.ne.s32.totalorder %s1815_s23, %s7613_s18  ;;  %p7621_p10 = scmp.lt.s32.totalorder %s1815_s23, %s1815_s23 }
 0x22c   : > { %p7622_p7 = scmp.lt.s32.totalorder %s7620_s3, %s7613_s18 }
 0x22d   : > { %p7616_p6 = pnand %p7614_p5, %p8347_p0 }
 0x22e   : > { %p7623_p8 = por %p7622_p7, %p7621_p10 }
 0x22f   : > { %p7617_p9 = pneg %p7616_p6 }
 0x231   : > { %p7624_p11 = pnand %p7623_p8, %p7617_p9 }
 0x233   : > { %7627 = shalt.err (!%p7624_p11)
}
 0x234   : > { %s9373_s28 = sld [smem:[#allocation99_spill]] }
 0x235   : > { %6755 = dma.hbm_to_vmem [thread:$0]  (!%p8335_p12), %s9372_s4, 16, %s1815_s23, [#allocation24]  }
 0x23a   : > { %s9374_s6 = smov %s9373_s28  ;;  %s7628_s9 = scalar_lea.hbm %s9373_s28, 16 }
 0x23b   : > { %p7629_p13 = scmp.ne.s32.totalorder %s9374_s6, %s7628_s9  ;;  %p7635_p3 = scmp.lt.u32.totalorder %s7628_s9, %s9374_s6 }
 0x23d   : > { %p7631_p1 = pnand %p7629_p13, %p8347_p0 }
 0x23f   : > { %p7632_p2 = pneg %p7631_p1 }
 0x241   : > { %p7637_p4 = pnand %p7635_p3, %p7632_p2 }
 0x243   : > { %7640 = shalt.err (!%p7637_p4)
}
 0x244   : > { %s7641_s5 = scalar_lea.vmem %s1840_s8, 16  ;;  %s7648_s18 = scalar_lea.vmem %s1840_s8, 32 }
 0x245   : > { %p7642_p5 = scmp.ne.s32.totalorder %s1840_s8, %s7641_s5  ;;  %p7649_p10 = scmp.lt.s32.totalorder %s1840_s8, %s1840_s8 }
 0x246   : > { %p7650_p7 = scmp.lt.s32.totalorder %s7648_s18, %s7641_s5 }
 0x247   : > { %p7644_p6 = pnand %p7642_p5, %p8347_p0 }
 0x248   : > { %p7651_p8 = por %p7650_p7, %p7649_p10 }
 0x249   : > { %p7645_p9 = pneg %p7644_p6 }
 0x24b   : > { %p7652_p11 = pnand %p7651_p8, %p7645_p9 }
 0x24d   : > { %7655 = shalt.err (!%p7652_p11)
}
 0x24e   : > { %s9375_s23 = sld [smem:[#allocation101_spill]]  ;;  %s7935_s3 = smov [#allocation31]  }
 0x24f   : > { %6761 = dma.hbm_to_vmem [thread:$0]  (!%p8335_p12), %s9374_s6, 16, %s1840_s8, [#allocation27]  }
 0x250   : > { %s1864_s28 = sshll.u32 %s7935_s3, 4  ;;  %s7936_s9 = smov [#allocation34]   ;;  %s1865_s28 = int_to_ptr.vmem [resolvable:$true] %s1864_s28 }
 0x251   : > { %s1889_s4 = sshll.u32 %s7936_s9, 4  ;;  %s1890_s4 = int_to_ptr.vmem [resolvable:$true] %s1889_s4 }
 0x254   : > { %s7656_s11 = scalar_lea.hbm %s9375_s23, 16 }
 0x255   : > { %p7657_p13 = scmp.ne.s32.totalorder %s9375_s23, %s7656_s11  ;;  %p7663_p3 = scmp.lt.u32.totalorder %s7656_s11, %s9375_s23 }
 0x257   : > { %p7659_p1 = pnand %p7657_p13, %p8347_p0 }
 0x259   : > { %p7660_p2 = pneg %p7659_p1 }
 0x25b   : > { %p7665_p4 = pnand %p7663_p3, %p7660_p2 }
 0x25d   : > { %7668 = shalt.err (!%p7665_p4)
}
 0x25e   : > { %s7669_s5 = scalar_lea.vmem %s1865_s28, 16  ;;  %s7676_s8 = scalar_lea.vmem %s1865_s28, 32 }
 0x25f   : > { %p7670_p5 = scmp.ne.s32.totalorder %s1865_s28, %s7669_s5  ;;  %p7677_p10 = scmp.lt.s32.totalorder %s1865_s28, %s1865_s28 }
 0x260   : > { %p7678_p7 = scmp.lt.s32.totalorder %s7676_s8, %s7669_s5 }
 0x261   : > { %p7672_p6 = pnand %p7670_p5, %p8347_p0 }
 0x262   : > { %p7679_p8 = por %p7678_p7, %p7677_p10 }
 0x263   : > { %p7673_p9 = pneg %p7672_p6 }
 0x265   : > { %p7680_p11 = pnand %p7679_p8, %p7673_p9 }
 0x267   : > { %7683 = shalt.err (!%p7680_p11)
}
 0x268   : > { %6767 = dma.hbm_to_vmem [thread:$0]  (!%p8335_p12), %s9375_s23, 16, %s1865_s28, [#allocation30]  }
 0x269   : > { %s7684_s11 = scalar_lea.hbm %s8261_s21, 16 }
 0x26a   : > { %p7685_p13 = scmp.ne.s32.totalorder %s8261_s21, %s7684_s11  ;;  %p7691_p3 = scmp.lt.u32.totalorder %s7684_s11, %s8261_s21 }
 0x26c   : > { %p7687_p1 = pnand %p7685_p13, %p8347_p0 }
 0x26e   : > { %p7688_p2 = pneg %p7687_p1 }
 0x270   : > { %p7693_p4 = pnand %p7691_p3, %p7688_p2 }
 0x272   : > { %7696 = shalt.err (!%p7693_p4)
}
 0x273   : > { %s7697_s18 = scalar_lea.vmem %s1890_s4, 16  ;;  %s7704_s3 = scalar_lea.vmem %s1890_s4, 32 }
 0x274   : > { %p7698_p5 = scmp.ne.s32.totalorder %s1890_s4, %s7697_s18  ;;  %p7705_p10 = scmp.lt.s32.totalorder %s1890_s4, %s1890_s4 }
 0x275   : > { %p7706_p7 = scmp.lt.s32.totalorder %s7704_s3, %s7697_s18 }
 0x276   : > { %p7700_p6 = pnand %p7698_p5, %p8347_p0 }
 0x277   : > { %p7707_p8 = por %p7706_p7, %p7705_p10 }
 0x278   : > { %p7701_p9 = pneg %p7700_p6 }
 0x27a   : > { %p7708_p11 = pnand %p7707_p8, %p7701_p9 }
 0x27c   : > { %7711 = shalt.err (!%p7708_p11)
}
 0x27d   : > { %6773 = dma.hbm_to_vmem [thread:$0]  (!%p8335_p12), %s8261_s21, 16, %s1890_s4, [#allocation33]  }
 0x27e   : > { %s7937_s28 = smov [#allocation35]   ;;  %s7712_s5 = scalar_lea.hbm %s8266_s17, 16 }
 0x27f   : > { %s1900_s9 = sshll.u32 %s7937_s28, 4  ;;  %p7713_p13 = scmp.ne.s32.totalorder %s8266_s17, %s7712_s5  ;;  %s1901_s9 = int_to_ptr.vmem [resolvable:$true] %s1900_s9 }
 0x280   : > { %p7719_p3 = scmp.lt.u32.totalorder %s7712_s5, %s8266_s17 }
 0x281   : > { %p7715_p1 = pnand %p7713_p13, %p8347_p0 }
 0x283   : > { %p7716_p2 = pneg %p7715_p1 }
 0x285   : > { %p7721_p4 = pnand %p7719_p3, %p7716_p2 }
 0x287   : > { %7724 = shalt.err (!%p7721_p4)
}
 0x288   : > { %s7725_s8 = scalar_lea.vmem %s1901_s9, 16  ;;  %s7732_s11 = scalar_lea.vmem %s1901_s9, 32 }
 0x289   : > { %p7726_p5 = scmp.ne.s32.totalorder %s1901_s9, %s7725_s8  ;;  %p7733_p10 = scmp.lt.s32.totalorder %s1901_s9, %s1901_s9 }
 0x28a   : > { %p7734_p7 = scmp.lt.s32.totalorder %s7732_s11, %s7725_s8 }
 0x28b   : > { %p7728_p6 = pnand %p7726_p5, %p8347_p0 }
 0x28c   : > { %p7735_p8 = por %p7734_p7, %p7733_p10 }
 0x28d   : > { %p7729_p9 = pneg %p7728_p6 }
 0x28f   : > { %p7736_p11 = pnand %p7735_p8, %p7729_p9 }
 0x291   : > { %7739 = shalt.err (!%p7736_p11)
}
 0x292   : > { %6776 = dma.hbm_to_vmem [thread:$0]  (!%p8335_p12), %s8266_s17, 16, %s1901_s9, [#allocation36]  }
 0x293   : > { %p9376_p13 = scmp.ne.s32.totalorder %s9366_s26, 0 }
 0x294   : > { %p9377_p1 = scmp.eq.s32.totalorder (!%p9376_p13), %s8299_s7, 0 }
 0x295   : > { %1932 = sbr.rel (%p9376_p13) target bundleno = 9334 (0x2476), region = 276 }
 0x29c   : > { %7785 = dma.done.wait (%p9377_p1), [#allocation3], 16   ;;  %p9378_p2 = pmov %p9377_p1 }
 0x29d   : > { %p9379_p0 = pmov %p9377_p1 }
 0x29e   : > { %7787 = vsyncadd (%p9378_p2), [#allocation3], 4294967280 }
 0x29f   : > { %7789 = dma.done.wait (%p9379_p0), [#allocation6], 32   ;;  %p9380_p3 = pmov %p9379_p0 }
 0x2a0   : > { %p9381_p4 = pmov %p9379_p0 }
 0x2a1   : > { %7791 = vsyncadd (%p9380_p3), [#allocation6], 4294967264 }
 0x2a2   : > { %7793 = dma.done.wait (%p9381_p4), [#allocation9], 32   ;;  %p9382_p12 = pmov %p9379_p0 }
 0x2a3   : > { %p9383_p5 = pmov %p9379_p0 }
 0x2a4   : > { %7795 = vsyncadd (%p9382_p12), [#allocation9], 4294967264 }
 0x2a5   : > { %7797 = dma.done.wait (%p9383_p5), [#allocation12], 32   ;;  %p9384_p6 = pmov %p9379_p0 }
 0x2a6   : > { %p9385_p9 = pmov %p9379_p0 }
 0x2a7   : > { %7799 = vsyncadd (%p9384_p6), [#allocation12], 4294967264 }
 0x2a8   : > { %7801 = dma.done.wait (%p9385_p9), [#allocation15], 32   ;;  %p9386_p10 = pmov %p9379_p0 }
 0x2a9   : > { %p9387_p7 = pmov %p9379_p0 }
 0x2aa   : > { %7803 = vsyncadd (%p9386_p10), [#allocation15], 4294967264 }
 0x2ab   : > { %7805 = dma.done.wait (%p9387_p7), [#allocation18], 32   ;;  %p9388_p8 = pmov %p9379_p0 }
 0x2ac   : > { %p9389_p11 = pmov %p9379_p0 }
 0x2ad   : > { %7807 = vsyncadd (%p9388_p8), [#allocation18], 4294967264 }
 0x2ae   : > { %7809 = dma.done.wait (%p9389_p11), [#allocation21], 32   ;;  %p9390_p13 = pmov %p9379_p0 }
 0x2af   : > { %p9391_p1 = pmov %p9379_p0 }
 0x2b0   : > { %7811 = vsyncadd (%p9390_p13), [#allocation21], 4294967264 }
 0x2b1   : > { %7813 = dma.done.wait (%p9391_p1), [#allocation24], 32   ;;  %p9392_p2 = pmov %p9379_p0 }
 0x2b3   : > { %7815 = vsyncadd (%p9392_p2), [#allocation24], 4294967264 }
 0x2b4   : > { %7817 = dma.done.wait (%p9379_p0), [#allocation27], 32   ;;  %p9393_p3 = pmov %p9379_p0 }
 0x2b5   : > { %p9394_p4 = pmov %p9379_p0 }
 0x2b6   : > { %7819 = vsyncadd (%p9393_p3), [#allocation27], 4294967264 }
 0x2b7   : > { %7821 = dma.done.wait (%p9394_p4), [#allocation30], 32   ;;  %p9395_p12 = pmov %p9379_p0 }
 0x2b8   : > { %p9396_p5 = pmov %p9379_p0 }
 0x2b9   : > { %7823 = vsyncadd (%p9395_p12), [#allocation30], 4294967264 }
 0x2ba   : > { %7825 = dma.done.wait (%p9396_p5), [#allocation33], 32   ;;  %p9397_p6 = pmov %p9379_p0 }
 0x2bb   : > { %p9398_p9 = pmov %p9379_p0 }
 0x2bc   : > { %7827 = vsyncadd (%p9397_p6), [#allocation33], 4294967264 }
 0x2bd   : > { %7829 = dma.done.wait (%p9398_p9), [#allocation36], 16   ;;  %p9399_p10 = pmov %p9379_p0 }
 0x2be   : > { %s9400_s0 = sld [smem:[#allocation102_spill]]  ;;  %s9402_s10 = sld [smem:[#allocation51_spill]]  ;;  %v7938_v0 = vmov 0.0   ;;  %vm7939_vm0 = vmmov 0   ;;  %vm2416_vm1 = vcmask 523264   ;;  %vm2463_vm2 = vcmask 1040384  }
 0x2bf   : > { %7831 = vsyncadd (%p9399_p10), [#allocation36], 4294967280  ;;  %6266 = vmatprep.subr.bf16.mxu1 %v7938_v0  ;;  %6274 = vmatprep.mubr.msk.bf16.mxu1 %vm7939_vm0, %v7938_v0  ;;  %p2166_p7 = scmp.lt.s32.totalorder %s8299_s7, 1  ;;  %s9403_s28 = sld [smem:[#allocation100_spill]]  ;;  %v5946_v8 = vld [vmem:[#allocation31] ss:$0 sm:$0xff] }
 0x2c0   : > { %v2363_v13 = vld [vmem:[#allocation29] sm:$0x1]  ;;  %vm2627_vm3 = vcmask 261120   ;;  %vm2634_vm4 = vcmask 253952   ;;  %s9405_s5 = sld [smem:[#allocation93_spill]]  ;;  %s9274_s8 = smov 96  }
 0x2c1   : > { %s8636_s4 = scalar_select %p2166_p7, %s8299_s7, 1  ;;  %v5969_v57 = vld [vmem:[#allocation22] ss:$0 sm:$0xff]  ;;  %v5970_v63 = vld [vmem:[#allocation20] ss:$0 sm:$0xff]  ;;  %vm2763_vm5 = vcmask 130048  }
 0x2c2   : > { %s9278_s11 = smov 80   ;;  %vm2824_vm6 = vcmask 138240   ;;  %vm2831_vm7 = vcmask 131072   ;;  %vm3518_vm8 = vcmask 520192   ;;  %vm3665_vm9 = vcmask 36864   ;;  %s9433_s6 = sld [smem:[#allocation80_spill]] }
 0x2c3   : > { %s6101_s18 = sshll.u32 %s8636_s4, 4  ;;  %vm3684_vm10 = vcmask 1041408   ;;  %vm3685_vm11 = vcmask 1042432   ;;  %vm3680_vm12 = vcmask 39936   ;;  %vm4234_vm13 = vcmask 516096   ;;  %p9450_p11 = scmp.ne.s32.totalorder %s9363_s22, 0 }
 0x2c4   : > { %s9401_s26 = smov %s9400_s0  ;;  %v6953_v1 = vld [vmem:[%s9400_s0] sm:$0xff]   ;;  %s2170_s3 = scalar_lea.vmem %s9402_s10, %s6101_s18  ;;  %vm4435_vm14 = vcmask 32768  }
 0x2c5   : > { %6267 = vmatpush3.bf16.msra.mxu1 %v6953_v1  ;;  %v6954_v2 = vld [vmem:[%s9401_s26 + $0x8] sm:$0xff]   ;;  %v6955_v3 = vld [vmem:[%s9401_s26 + $0x10] sm:$0xff]   ;;  %v6956_v4 = vld [vmem:[%s9401_s26 + $0x18] sm:$0xff]   ;;  %s9404_s9 = smov %s9403_s28  ;;  %s9272_s0 = smov 112  }
 0x2c6   : > { %6268 = vmatprep.subr.bf16.mxu1 %v7938_v0  ;;  %v2383_v5 = vld [vmem:[%s2170_s3] sm:$0xff]  ;;  %v2384_v6 = vld [vmem:[%s2170_s3 + $0x8] sm:$0xff]  ;;  %v2366_v18 = vld [vmem:[%s9404_s9 + $0x10] sm:$0x1]  ;;  %s9406_s10 = sld [smem:[#allocation56_spill]]  ;;  %s9407_s18 = sld [smem:[#allocation52_spill]] }
 0x2c7   : > { %v2385_v7 = vpack.c.bf16 %v2384_v6, %v2383_v5  ;;  %v2364_v17 = vld [vmem:[%s9403_s28] sm:$0xff]  ;;  %v2365_v21 = vld [vmem:[%s9404_s9 + $0x8] sm:$0xff]  ;;  %s6102_s3 = sshll.u32 %s8636_s4, 3  ;;  %s9408_s4 = sld [smem:[#allocation92_spill]] }
 0x2c8   : > { %v6957_v44 = vld [vmem:[%s9405_s5] sm:$0xff]   ;;  %v6958_v45 = vld [vmem:[%s9405_s5 + $0x8] sm:$0xff]   ;;  %s9427_s5 = sld [smem:[#allocation72_spill]] }
 0x2c9   : > { %6269 = vmatpush3.bf16.msra.mxu1 %v6954_v2  ;;  %6278 = vmatprep.subr.bf16.mxu0 %v6957_v44 }
 0x2ca   : > { %6270 = vmatprep.subr.bf16.mxu1 %v7938_v0  ;;  %6279 = vmatpush3.bf16.msra.mxu0 %v6957_v44 }
 0x2cb   : > { %6280 = vmatprep.subr.bf16.mxu0 %v6958_v45 }
 0x2cc   : > { %v6962_v44 = vld [vmem:[%s9406_s10 + $0x8] sm:$0xff]   ;;  %s2175_s28 = scalar_lea.vmem %s9407_s18, %s6102_s3  ;;  %s9409_s18 = sld [smem:[#allocation55_spill]] }
 0x2cd   : > { %6271 = vmatpush3.bf16.msra.mxu1 %v6955_v3  ;;  %s9410_s3 = sld [smem:[#allocation53_spill]] }
 0x2ce   : > { %6272 = vmatprep.subr.bf16.mxu1 %v7938_v0  ;;  %6281 = vmatpush3.bf16.msra.mxu0 %v6958_v45  ;;  %v6963_v45 = vld [vmem:[%s9406_s10 + $0x50] sm:$0xff]  }
 0x2d1   : > { %6273 = vmatpush3.bf16.msra.mxu1 %v6956_v4 }
 0x2d4   : > { %6275 = vmatmul.mubr.msk.bf16.vlgmr.msra.gmra.mrb[0].mxu1 %vm2416_vm1, %v2385_v7 }
 0x3a7   : > { %v2454_v9 = vpop.f32.mrb[0].mxu1 }
 0x3a8   : > { %v2455_v10 = vadd.f32 %v5946_v8, %v2454_v9  ;;  %v6276_v11 = vpop.f32.mrb[1].mxu1 }
 0x3a9   : > { %v2457_v12 = vpop.f32.mrb[2].mxu1 }
 0x3aa   : > { %v2464_v14 = vrot.slane %v2455_v10, 7  ;;  %v2458_v15 = vadd.f32 %v5946_v8, %v2457_v12  ;;  %v6277_v16 = vpop.f32.mrb[3].mxu1 }
 0x3ac   : > { %v2465_v19 = vrot.slane %v2458_v15, 7  ;;  %v2470_v20 = vsel %vm2463_vm2, %v2363_v13, %v2464_v14 }
 0x3ad   : > { %v8652_v22 = vadd.f32 %v2470_v20, %v2364_v17 }
 0x3ae   : > { %v2466_v23 = vsel %vm2463_vm2, %v2464_v14, %v2465_v19  ;;  %v8655_v24 = vadd.f32 %v2465_v19, %v2366_v18 }
 0x3af   : > { %v2628_v25 = vsel %vm2627_vm3, %v8652_v22, 0.0  ;;  %v8659_v26 = vadd.f32 %v2466_v23, %v2365_v21 }
 0x3b0   : > { %2629 = vadd.xlane.f32.xlu0 %v2628_v25  ;;  %v2635_v27 = vsel %vm2634_vm4, %v8655_v24, 0.0 }
 0x3b1   : > { %2636 = vadd.xlane.f32.xlu1 %v2635_v27  ;;  %v2631_v28 = vsel %vm2627_vm3, %v8659_v26, 0.0 }
 0x3b4   : > { %2632 = vadd.xlane.f32.xlu0 %v2631_v28 }
 0x43d   : > { %v2630_v29 = vpop.xlane.xlu0 %2629 }
 0x43e   : > { %v2639_v30 = vmul.f32 0.03125, %v2630_v29  ;;  %v2637_v31 = vpop.xlane.xlu1 %2636 }
 0x43f   : > { %v2641_v32 = vmul.f32 0.03125, %v2637_v31 }
 0x440   : > { %v2642_v33 = vsub.f32 %v8652_v22, %v2639_v30 }
 0x441   : > { %v2644_v34 = vsub.f32 %v8655_v24, %v2641_v32  ;;  %v2633_v35 = vpop.xlane.xlu0 %2632 }
 0x442   : > { %v2640_v36 = vmul.f32 0.03125, %v2633_v35  ;;  %v2645_v37 = vmul.f32 %v2642_v33, %v2642_v33 }
 0x443   : > { %v2647_v40 = vmul.f32 %v2644_v34, %v2644_v34 }
 0x444   : > { %v2643_v38 = vsub.f32 %v8659_v26, %v2640_v36  ;;  %v2648_v39 = vsel %vm2627_vm3, %v2645_v37, 0.0 }
 0x445   : > { %2649 = vadd.xlane.f32.xlu1 %v2648_v39  ;;  %v2654_v42 = vsel %vm2634_vm4, %v2647_v40, 0.0 }
 0x446   : > { %v2646_v41 = vmul.f32 %v2643_v38, %v2643_v38 }
 0x448   : > { %v2651_v43 = vsel %vm2627_vm3, %v2646_v41, 0.0  ;;  %v6959_v41 = vld [vmem:[%s9406_s10 + $0x40] sm:$0xff]  }
 0x449   : > { %2655 = vadd.xlane.f32.xlu1 %v2654_v42  ;;  %2652 = vadd.xlane.f32.xlu0 %v2651_v43  ;;  %v6960_v42 = vld [vmem:[%s9406_s10] sm:$0xff]   ;;  %v6961_v43 = vld [vmem:[%s9406_s10 + $0x48] sm:$0xff]  }
 0x44a   : > { %6108 = vmatprep.subr.bf16.mxu1 %v6959_v41 }
 0x44b   : > { %6109 = vmatpush3.bf16.msra.mxu1 %v6960_v42 }
 0x44c   : > { %6110 = vmatprep.subr.bf16.mxu1 %v6961_v43 }
 0x44f   : > { %6111 = vmatpush3.bf16.msra.mxu1 %v6962_v44 }
 0x450   : > { %6112 = vmatprep.subr.bf16.mxu1 %v6963_v45 }
 0x4d2   : > { %v2650_v46 = vpop.xlane.xlu1 %2649 }
 0x4d3   : > { %v2657_v47 = vmul.f32 0.03125, %v2650_v46  ;;  %v6964_v46 = vld [vmem:[%s9406_s10 + $0x10] sm:$0xff]  }
 0x4d4   : > { %6113 = vmatpush3.bf16.msra.mxu1 %v6964_v46 }
 0x4d5   : > { %v2660_v48 = vadd.f32 1e-05, %v2657_v47 }
 0x4d6   : > { %v2656_v49 = vpop.xlane.xlu1 %2655  ;;  %v2653_v50 = vpop.xlane.xlu0 %2652 }
 0x4d7   : > { %7036 = vrsqrt.f32 %v2660_v48  ;;  %v2659_v51 = vmul.f32 0.03125, %v2656_v49  ;;  %v2658_v52 = vmul.f32 0.03125, %v2653_v50 }
 0x4d9   : > { %v2662_v53 = vadd.f32 1e-05, %v2659_v51  ;;  %v2661_v54 = vadd.f32 1e-05, %v2658_v52 }
 0x4db   : > { %7038 = vrsqrt.f32 %v2662_v53 }
 0x4dc   : > { %7040 = vrsqrt.f32 %v2661_v54 }
 0x4e1   : > { %v7037_v55 = vpop.eup %7036 }
 0x4e2   : > { %v2666_v56 = vmul.f32 %v7037_v55, %v2642_v33 }
 0x4e4   : > { %v2675_v62 = vmul.f32 %v5969_v57, %v2666_v56 }
 0x4e5   : > { %v7039_v58 = vpop.eup %7038 }
 0x4e6   : > { %v7041_v59 = vpop.eup %7040  ;;  %v2668_v60 = vmul.f32 %v7039_v58, %v2644_v34  ;;  %v2684_v4 = vadd.f32 %v5970_v63, %v2675_v62 }
 0x4e7   : > { %v2667_v61 = vmul.f32 %v7041_v59, %v2643_v38 }
 0x4e8   : > { %v2677_v1 = vmul.f32 %v5969_v57, %v2668_v60 }
 0x4e9   : > { %v2676_v2 = vmul.f32 %v5969_v57, %v2667_v61 }
 0x4ea   : > { %v2686_v3 = vadd.f32 %v5970_v63, %v2677_v1 }
 0x4eb   : > { %v2685_v5 = vadd.f32 %v5970_v63, %v2676_v2 }
 0x4ec   : > { %v2688_v6 = vpack.c.bf16 %v2686_v3, %v2686_v3 }
 0x4ed   : > { %v2687_v7 = vpack.c.bf16 %v2685_v5, %v2684_v4 }
 0x4ef   : > { %6282 = vmatprep.mubr.msk.bf16.mxu0 %vm2627_vm3, %v2687_v7 }
 0x4f0   : > { %6283 = vmatmul.mubr.msk.bf16.vlgmr.msra.gmra.mrb[0].mxu0 %vm2627_vm3, %v2688_v6 }
 0x5c3   : > { %v6284_v8 = vpop.f32.mrb[0].mxu0 }
 0x5c4   : > { %v8675_v9 = vpack.c.bf16 %v6284_v8, %v6284_v8  ;;  %v2741_v10 = vpop.f32.mrb[1].mxu0 }
 0x5c5   : > { %v6285_v11 = vpop.f32.mrb[2].mxu0 }
 0x5c6   : > { %2761 = vrot.lane.b32.xlu1 %v8675_v9, %s9274_s8  ;;  %v2744_v12 = vpop.f32.mrb[3].mxu0 }
 0x5c7   : > { %v8679_v13 = vpack.c.bf16 %v2744_v12, %v2741_v10  ;;  %v6965_v10 = vld [vmem:[%s9406_s10 + $0x58] sm:$0xff]  }
 0x5c8   : > { %v6966_v12 = vld [vmem:[%s9406_s10 + $0x18] sm:$0xff]   ;;  %6114 = vmatprep.subr.bf16.mxu1 %v6965_v10 }
 0x5c9   : > { %2759 = vrot.lane.b32.xlu0 %v8679_v13, %s9274_s8  ;;  %6290 = vmatprep.mubr.msk.bf16.mxu0 %vm2763_vm5, %v8679_v13  ;;  %s9276_s8 = smov 48  }
 0x5ca   : > { %2931 = vrot.lane.b32.xlu1 %v8679_v13, %s9278_s11  ;;  %6115 = vmatpush3.bf16.msra.mxu1 %v6966_v12 }
 0x5cd   : > { %2927 = vrot.lane.b32.xlu0 %v8679_v13, %s9272_s0 }
 0x5ce   : > { %2933 = vrot.lane.b32.xlu1 %v8675_v9, %s9278_s11 }
 0x5d2   : > { %2929 = vrot.lane.b32.xlu1 %v8675_v9, %s9272_s0  ;;  %s9277_s0 = smov 64  }
 0x638   : > { %v2762_v16 = vpop.permute.xlu1 %2761 }
 0x639   : > { %v2774_v17 = vsel %vm2763_vm5, %v2762_v16, 0 }
 0x63b   : > { %v2760_v14 = vpop.permute.xlu0 %2759 }
 0x63c   : > { %v2771_v15 = vsel %vm2763_vm5, %v2760_v14, 0  ;;  %6616 = vmatprep.subr.msk.bf16.mxu0 %vm2763_vm5, %v2760_v14  ;;  %v2932_v18 = vpop.permute.xlu1 %2931 }
 0x63d   : > { %6287 = vmatpush3.bf16.xpose.msra.mxu0 %v2771_v15  ;;  %v2942_v19 = vsel %vm2763_vm5, %v2932_v18, 0  ;;  %v6967_v15 = vld [vmem:[%s9406_s10 + $0x60] sm:$0xff]  }
 0x63e   : > { %6617 = vmatprep.subr.msk.bf16.mxu0 %vm2763_vm5, %v2762_v16  ;;  %6116 = vmatprep.subr.bf16.mxu1 %v6967_v15 }
 0x63f   : > { %v2928_v20 = vpop.permute.xlu0 %2927 }
 0x640   : > { %v2934_v21 = vpop.permute.xlu1 %2933 }
 0x641   : > { %v2945_v23 = vsel %vm2763_vm5, %v2934_v21, 0 }
 0x644   : > { %v2930_v25 = vpop.permute.xlu1 %2929 }
 0x645   : > { %6289 = vmatpush3.bf16.xpose.msra.mxu0 %v2774_v17 }
 0x646   : > { %6618 = vmatprep.subr.msk.bf16.mxu0 %vm2763_vm5, %v2932_v18  ;;  %v6968_v18 = vld [vmem:[%s9406_s10 + $0x20] sm:$0xff]  }
 0x647   : > { %6117 = vmatpush3.bf16.msra.mxu1 %v6968_v18 }
 0x64c   : > { %6291 = vmatmul.mubr.msk.bf16.vlgmr.msra.gmra.mrb[4].mxu0 %vm2763_vm5, %v8675_v9 }
 0x64d   : > { %6303 = vmatpush3.bf16.xpose.msra.mxu0 %v2942_v19  ;;  %6306 = vmatprep.mubr.msk.bf16.mxu0 %vm2763_vm5, %v2928_v20  ;;  %v6969_v20 = vld [vmem:[%s9406_s10 + $0x68] sm:$0xff]  }
 0x64e   : > { %6619 = vmatprep.subr.msk.bf16.mxu0 %vm2763_vm5, %v2934_v21  ;;  %v6970_v21 = vld [vmem:[%s9406_s10 + $0x28] sm:$0xff]   ;;  %6118 = vmatprep.subr.bf16.mxu1 %v6969_v20 }
 0x64f   : > { %6119 = vmatpush3.bf16.msra.mxu1 %v6970_v21 }
 0x655   : > { %6305 = vmatpush3.bf16.xpose.msra.mxu0 %v2945_v23  ;;  %v6971_v23 = vld [vmem:[%s9406_s10 + $0x70] sm:$0xff]  }
 0x656   : > { %6120 = vmatprep.subr.bf16.mxu1 %v6971_v23 }
 0x65c   : > { %6307 = vmatmul.mubr.msk.bf16.vlgmr.msra.gmra.mrb[8].mxu0 %vm2763_vm5, %v2930_v25  ;;  %v6972_v25 = vld [vmem:[%s9406_s10 + $0x30] sm:$0xff]  }
 0x65d   : > { %6121 = vmatpush3.bf16.msra.mxu1 %v6972_v25  ;;  %v5952_v25 = vld [vmem:[%s9409_s18] ss:$0 sm:$0xff]  ;;  %s9412_s18 = sld [smem:[#allocation95_spill]] }
 0x71f   : > { %v6292_v27 = vpop.f32.mrb[4].mxu0 }
 0x720   : > { %v2810_v28 = vpop.f32.mrb[5].mxu0  ;;  %v2832_v33 = vsel %vm2831_vm7, %v6292_v27, -inf }
 0x721   : > { %v6293_v29 = vpop.f32.mrb[6].mxu0  ;;  %v2825_v30 = vsel %vm2824_vm6, %v2810_v28, -inf }
 0x722   : > { %2826 = vmax.xlane.f32.xlu0 %v2825_v30  ;;  %v2813_v31 = vpop.f32.mrb[7].mxu0  ;;  %v6974_v29 = vld [vmem:[%s9406_s10 + $0x38] sm:$0xff]  }
 0x723   : > { %v2828_v32 = vsel %vm2824_vm6, %v2813_v31, -inf }
 0x724   : > { %2829 = vmax.xlane.f32.xlu1 %v2828_v32 }
 0x726   : > { %2833 = vmax.xlane.f32.xlu0 %v2832_v33 }
 0x72f   : > { %v6308_v34 = vpop.f32.mrb[8].mxu0 }
 0x730   : > { %v2981_v35 = vpop.f32.mrb[9].mxu0  ;;  %v3001_v36 = vsel %vm2831_vm7, %v6308_v34, -inf }
 0x731   : > { %v6309_v37 = vpop.f32.mrb[10].mxu0  ;;  %3002 = vmax.xlane.f32.xlu1 %v3001_v36  ;;  %v2995_v38 = vsel %vm2824_vm6, %v2981_v35, -inf }
 0x732   : > { %2996 = vmax.xlane.f32.xlu0 %v2995_v38  ;;  %v2984_v39 = vpop.f32.mrb[11].mxu0 }
 0x733   : > { %v2998_v40 = vsel %vm2824_vm6, %v2984_v39, -inf }
 0x736   : > { %2999 = vmax.xlane.f32.xlu0 %v2998_v40 }
 0x7af   : > { %v2827_v47 = vpop.xlane.xlu0 %2826 }
 0x7b0   : > { %v2835_v49 = vsub.f32 %v2810_v28, %v2827_v47  ;;  %v2474_v28 = vld [vmem:[%s2175_s28] sm:$0xff]  ;;  %s9411_s28 = sld [smem:[#allocation54_spill]] }
 0x7b1   : > { %v2830_v48 = vpop.xlane.xlu1 %2829  ;;  %v2476_v30 = vcombine.high %v2474_v28, %v2474_v28  ;;  %v2478_v32 = vpack.c.bf16 %v2474_v28, %v2474_v28 }
 0x7b2   : > { %v2836_v50 = vsub.f32 %v2813_v31, %v2830_v48  ;;  %v2838_v54 = vmul.f32 1.442695, %v2835_v49 }
 0x7b3   : > { %v2834_v51 = vpop.xlane.xlu0 %2833  ;;  %v2479_v31 = vpack.c.bf16 %v2476_v30, %v2476_v30 }
 0x7b4   : > { %v2840_v52 = vmul.f32 1.442695, %v2836_v50  ;;  %v2837_v53 = vsub.f32 %v6292_v27, %v2834_v51  ;;  %v6973_v27 = vld [vmem:[%s9406_s10 + $0x78] sm:$0xff]  }
 0x7b5   : > { %6122 = vmatprep.subr.bf16.mxu1 %v6973_v27  ;;  %2614 = vmatprep.mubr.bf16.mxu1 %v2479_v31 }
 0x7b6   : > { %7042 = vpow2.f32 %v2840_v52  ;;  %v2842_v55 = vmul.f32 1.442695, %v2837_v53  ;;  %6123 = vmatpush3.bf16.msra.mxu1 %v6974_v29  ;;  %v5989_v29 = vld [vmem:[#allocation19] ss:$0 sm:$0xff] }
 0x7b8   : > { %7044 = vpow2.f32 %v2842_v55 }
 0x7b9   : > { %7046 = vpow2.f32 %v2838_v54  ;;  %2615 = vmatmul.mubr.bf16.vlgmr.msra.gmra.mrb[4].mxu1 %v2478_v32 }
 0x7be   : > { %v3003_v56 = vpop.xlane.xlu1 %3002 }
 0x7bf   : > { %v3006_v57 = vsub.f32 %v6308_v34, %v3003_v56  ;;  %v2997_v58 = vpop.xlane.xlu0 %2996 }
 0x7c0   : > { %v8717_v59 = vpop.eup %7042  ;;  %v3004_v60 = vsub.f32 %v2981_v35, %v2997_v58 }
 0x7c1   : > { %v3011_v61 = vmul.f32 1.442695, %v3006_v57  ;;  %v2847_v62 = vsel %vm2824_vm6, %v8717_v59, 0.0 }
 0x7c2   : > { %v8721_v63 = vpop.eup %7044  ;;  %v3007_v1 = vmul.f32 1.442695, %v3004_v60  ;;  %2848 = vadd.xlane.f32.xlu1 %v2847_v62 }
 0x7c3   : > { %7048 = vpow2.f32 %v3011_v61  ;;  %v3000_v2 = vpop.xlane.xlu0 %2999  ;;  %v2850_v3 = vsel %vm2831_vm7, %v8721_v63, 0.0  ;;  %v8725_v4 = vpop.eup %7046 }
 0x7c4   : > { %v3005_v5 = vsub.f32 %v2984_v39, %v3000_v2  ;;  %2851 = vadd.xlane.f32.xlu0 %v2850_v3  ;;  %7050 = vpow2.f32 %v3007_v1  ;;  %v2844_v7 = vsel %vm2824_vm6, %v8725_v4, 0.0  ;;  %v6976_v3 = vld [vmem:[%s9408_s4] sm:$0xff]  }
 0x7c5   : > { %6324 = vmatprep.subr.bf16.mxu0 %v6976_v3 }
 0x7c6   : > { %v3009_v6 = vmul.f32 1.442695, %v3005_v5  ;;  %6325 = vmatpush3.bf16.msra.mxu0 %v6976_v3 }
 0x7c8   : > { %7052 = vpow2.f32 %v3009_v6  ;;  %2845 = vadd.xlane.f32.xlu0 %v2844_v7 }
 0x7cd   : > { %v8729_v8 = vpop.eup %7048 }
 0x7ce   : > { %v3019_v11 = vsel %vm2831_vm7, %v8729_v8, 0.0  ;;  %v8735_v14 = vpop.eup %7050 }
 0x7cf   : > { %3020 = vadd.xlane.f32.xlu1 %v3019_v11  ;;  %v3013_v17 = vsel %vm2824_vm6, %v8735_v14, 0.0 }
 0x7d2   : > { %v8738_v16 = vpop.eup %7052 }
 0x7d3   : > { %3014 = vadd.xlane.f32.xlu1 %v3013_v17  ;;  %v3016_v19 = vsel %vm2824_vm6, %v8738_v16, 0.0 }
 0x7d4   : > { %3017 = vadd.xlane.f32.xlu0 %v3016_v19 }
 0x7e4   : > { %2863 = vrot.lane.b32.xlu1 %v8675_v9, %s9277_s0 }
 0x7e8   : > { %3030 = vrot.lane.b32.xlu1 %v8679_v13, %s9276_s8 }
 0x7ea   : > { %2861 = vrot.lane.b32.xlu0 %v8679_v13, %s9277_s0  ;;  %v7945_v13 = vmov 0   ;;  %s9417_s0 = smov 112  }
 0x7ec   : > { %3032 = vrot.lane.b32.xlu1 %v8675_v9, %s9276_s8  ;;  %v8764_v9 = vsel %vm2463_vm2, 65535, %v7945_v13 }
 0x84f   : > { %v2849_v33 = vpop.xlane.xlu1 %2848 }
 0x850   : > { %7054 = vrcp.f32 %v2849_v33 }
 0x851   : > { %v2852_v34 = vpop.xlane.xlu0 %2851 }
 0x855   : > { %v2846_v35 = vpop.xlane.xlu0 %2845 }
 0x856   : > { %7056 = vrcp.f32 %v2846_v35 }
 0x857   : > { %7058 = vrcp.f32 %v2852_v34 }
 0x85a   : > { %v7055_v37 = vpop.eup %7054 }
 0x85b   : > { %v2856_v42 = vmul.f32 %v7055_v37, %v8717_v59 }
 0x85c   : > { %v3021_v36 = vpop.xlane.xlu1 %3020 }
 0x860   : > { %v7057_v38 = vpop.eup %7056  ;;  %v3015_v39 = vpop.xlane.xlu1 %3014 }
 0x861   : > { %7060 = vrcp.f32 %v3015_v39  ;;  %v3018_v40 = vpop.xlane.xlu0 %3017  ;;  %v2854_v41 = vmul.f32 %v7057_v38, %v8725_v4  ;;  %v7059_v45 = vpop.eup %7058  ;;  %v6977_v4 = vld [vmem:[%s9408_s4 + $0x8] sm:$0xff]   ;;  %s9423_s4 = sld [smem:[#allocation78_spill]] }
 0x862   : > { %7062 = vrcp.f32 %v3018_v40  ;;  %v2858_v48 = vmul.f32 %v7059_v45, %v8721_v63 }
 0x863   : > { %7064 = vrcp.f32 %v3021_v36  ;;  %v2859_v43 = vpack.c.bf16 %v2856_v42, %v2854_v41  ;;  %v2177_v41 = vld [vmem:[%s9410_s3] sm:$0x1]  ;;  %s9413_s3 = sld [smem:[#allocation85_spill]] }
 0x864   : > { %v2864_v44 = vpop.permute.xlu1 %2863  ;;  %v2860_v53 = vpack.c.bf16 %v2858_v48, %v2858_v48 }
 0x865   : > { %v2875_v46 = vand.u32 %v8764_v9, %v2864_v44  ;;  %v2862_v47 = vpop.permute.xlu0 %2861  ;;  %6298 = vmatprep.mubr.msk.bf16.mxu1 %vm2824_vm6, %v2859_v43  ;;  %v2178_v44 = vld [vmem:[%s9411_s28] sm:$0x1f]  ;;  %s9414_s28 = sld [smem:[#allocation97_spill]] }
 0x866   : > { %6294 = vmatprep.subr.bf16.mxu1 %v2862_v47 }
 0x867   : > { %6295 = vmatpush3.bf16.msra.mxu1 %v2862_v47 }
 0x868   : > { %v3031_v49 = vpop.permute.xlu1 %3030  ;;  %6296 = vmatprep.subr.bf16.mxu1 %v2875_v46 }
 0x86b   : > { %v7061_v50 = vpop.eup %7060  ;;  %6297 = vmatpush3.bf16.msra.mxu1 %v2875_v46  ;;  %s9415_s8 = smov %s9414_s28 }
 0x86c   : > { %v7063_v51 = vpop.eup %7062  ;;  %v3033_v52 = vpop.permute.xlu1 %3032  ;;  %6310 = vmatprep.subr.bf16.mxu1 %v3031_v49  ;;  %v3023_v54 = vmul.f32 %v7061_v50, %v8735_v14 }
 0x86d   : > { %v7065_v55 = vpop.eup %7064  ;;  %v3042_v56 = vand.u32 %v3033_v52, %v8764_v9  ;;  %v3025_v57 = vmul.f32 %v7063_v51, %v8738_v16 }
 0x86e   : > { %6299 = vmatmul.mubr.msk.bf16.vlgmr.msra.gmra.mrb[8].mxu1 %vm2824_vm6, %v2860_v53  ;;  %v3027_v59 = vmul.f32 %v7065_v55, %v8729_v8 }
 0x86f   : > { %6311 = vmatpush3.bf16.msra.mxu1 %v3031_v49  ;;  %v3028_v58 = vpack.c.bf16 %v3025_v57, %v3023_v54 }
 0x870   : > { %6312 = vmatprep.subr.bf16.mxu1 %v3042_v56  ;;  %v3029_v60 = vpack.c.bf16 %v3027_v59, %v3027_v59 }
 0x871   : > { %6314 = vmatprep.mubr.msk.bf16.mxu1 %vm2824_vm6, %v3028_v58 }
 0x873   : > { %6313 = vmatpush3.bf16.msra.mxu1 %v3042_v56 }
 0x874   : > { %6318 = vmatprep.subr.bf16.mxu1 %v6977_v4 }
 0x876   : > { %6315 = vmatmul.mubr.msk.bf16.vlgmr.msra.gmra.mrb[12].mxu1 %vm2824_vm6, %v3029_v60 }
 0x877   : > { %6319 = vmatpush3.bf16.msra.mxu1 %v6977_v4  ;;  %v6978_v4 = vld [vmem:[%s9412_s18] sm:$0xff]  }
 0x878   : > { %6330 = vmatprep.subr.bf16.mxu1 %v6978_v4 }
 0x88c   : > { %v6124_v61 = vpop.f32.mrb[4].mxu1 }
 0x88d   : > { %v6125_v62 = vpop.f32.mrb[5].mxu1 }
 0x88e   : > { %v6126_v63 = vadd.f32 %v6125_v62, %v6124_v61  ;;  %v6127_v1 = vpop.f32.mrb[6].mxu1 }
 0x88f   : > { %v6128_v2 = vpop.f32.mrb[7].mxu1 }
 0x890   : > { %v2617_v28 = vadd.f32 %v6126_v63, %v5952_v25 }
 0x892   : > { %v2623_v38 = vrot.slane %v2617_v28, 7 }
 0x894   : > { %v2625_v45 = vsel %vm2463_vm2, %v2177_v41, %v2623_v38  ;;  %v6980_v38 = vld [vmem:[%s9413_s3] sm:$0xff]  }
 0x895   : > { %v8801_v47 = vadd.f32 %v2625_v45, %v2178_v44  ;;  %v6006_v45 = vld [vmem:[#allocation8] ss:$0 sm:$0xff] }
 0x941   : > { %v6300_v5 = vpop.f32.mrb[8].mxu1 }
 0x942   : > { %v2911_v6 = vpop.f32.mrb[9].mxu1  ;;  %v2926_v11 = vpack.c.bf16 %v6300_v5, %v6300_v5  ;;  %v6979_v5 = vld [vmem:[%s9412_s18 + $0x8] sm:$0xff]  }
 0x943   : > { %v6301_v7 = vpop.f32.mrb[10].mxu1 }
 0x944   : > { %v2914_v8 = vpop.f32.mrb[11].mxu1 }
 0x945   : > { %v2925_v10 = vpack.c.bf16 %v2914_v8, %v2911_v6 }
 0x947   : > { %6326 = vmatprep.mubr.msk.bf16.mxu0 %vm2763_vm5, %v2925_v10 }
 0x948   : > { %6327 = vmatmul.mubr.msk.bf16.vlgmr.msra.gmra.mrb[12].mxu0 %vm2763_vm5, %v2926_v11 }
 0x949   : > { %v6316_v12 = vpop.f32.mrb[12].mxu1 }
 0x94a   : > { %v3078_v14 = vpop.f32.mrb[13].mxu1  ;;  %v3093_v18 = vpack.c.bf16 %v6316_v12, %v6316_v12 }
 0x94b   : > { %v6317_v15 = vpop.f32.mrb[14].mxu1 }
 0x94c   : > { %v3081_v16 = vpop.f32.mrb[15].mxu1 }
 0x94d   : > { %v3092_v17 = vpack.c.bf16 %v3081_v16, %v3078_v14 }
 0x94f   : > { %6320 = vmatprep.mubr.msk.bf16.mxu1 %vm2763_vm5, %v3092_v17 }
 0x950   : > { %6321 = vmatmul.mubr.msk.bf16.vlgmr.msra.gmra.mrb[16].mxu1 %vm2763_vm5, %v3093_v18 }
 0x951   : > { %6331 = vmatpush3.bf16.msra.mxu1 %v6978_v4 }
 0x952   : > { %6332 = vmatprep.subr.bf16.mxu1 %v6979_v5 }
 0x955   : > { %6333 = vmatpush3.bf16.msra.mxu1 %v6979_v5 }
 0x956   : > { %6350 = vmatprep.subr.bf16.mxu1 %v7938_v0 }
 0xa1b   : > { %v6328_v19 = vpop.f32.mrb[12].mxu0 }
 0xa1c   : > { %v3200_v20 = vpop.f32.mrb[13].mxu0 }
 0xa1d   : > { %v6329_v21 = vpop.f32.mrb[14].mxu0 }
 0xa1e   : > { %v3203_v23 = vpop.f32.mrb[15].mxu0  ;;  %v5990_v21 = vld [vmem:[#allocation28] ss:$0 sm:$0xff] }
 0xa23   : > { %v6322_v27 = vpop.f32.mrb[16].mxu1 }
 0xa24   : > { %v3209_v30 = vadd.f32 %v6328_v19, %v6322_v27  ;;  %v3140_v31 = vpop.f32.mrb[17].mxu1 }
 0xa25   : > { %v3201_v32 = vadd.f32 %v3200_v20, %v3140_v31  ;;  %v6323_v33 = vpop.f32.mrb[18].mxu1 }
 0xa26   : > { %v3143_v34 = vpop.f32.mrb[19].mxu1  ;;  %v3222_v35 = vadd.f32 %v5989_v29, %v3209_v30  ;;  %v5991_v30 = vld [vmem:[#allocation26] ss:$0 sm:$0xff] }
 0xa27   : > { %v3220_v36 = vadd.f32 %v5989_v29, %v3201_v32  ;;  %v3204_v37 = vadd.f32 %v3203_v23, %v3143_v34 }
 0xa28   : > { %v8788_v42 = vadd.f32 %v3222_v35, %v8655_v24  ;;  %v3519_v24 = vsel %vm3518_vm8, %v8801_v47, 0.0 }
 0xa29   : > { %v8784_v39 = vadd.f32 %v3220_v36, %v8652_v22  ;;  %v3221_v40 = vadd.f32 %v5989_v29, %v3204_v37 }
 0xa2a   : > { %v3232_v22 = vsel %vm2634_vm4, %v8788_v42, 0.0 }
 0xa2b   : > { %v8791_v13 = vadd.f32 %v3221_v40, %v8659_v26  ;;  %v3226_v43 = vsel %vm2627_vm3, %v8784_v39, 0.0 }
 0xa2c   : > { %3227 = vadd.xlane.f32.xlu0 %v3226_v43  ;;  %v6981_v43 = vld [vmem:[%s9413_s3 + $0x8] sm:$0xff]  }
 0xa2d   : > { %v3229_v46 = vsel %vm2627_vm3, %v8791_v13, 0.0 }
 0xa2e   : > { %3230 = vadd.xlane.f32.xlu1 %v3229_v46  ;;  %v6982_v46 = vld [vmem:[%s9413_s3 + $0x10] sm:$0xff]  }
 0xa30   : > { %3233 = vadd.xlane.f32.xlu0 %v3232_v22 }
 0xa34   : > { %3520 = vadd.xlane.f32.xlu0 %v3519_v24  ;;  %v6007_v24 = vld [vmem:[#allocation7] ss:$0 sm:$0xff] }
 0xab9   : > { %v3228_v26 = vpop.xlane.xlu0 %3227 }
 0xaba   : > { %v3235_v48 = vmul.f32 0.03125, %v3228_v26  ;;  %v6983_v26 = vld [vmem:[%s9413_s3 + $0x18] sm:$0xff]   ;;  %s9420_s3 = sld [smem:[#allocation84_spill]] }
 0xabb   : > { %v3231_v49 = vpop.xlane.xlu1 %3230 }
 0xabc   : > { %v3238_v50 = vsub.f32 %v8784_v39, %v3235_v48  ;;  %v3236_v51 = vmul.f32 0.03125, %v3231_v49 }
 0xabd   : > { %v3234_v52 = vpop.xlane.xlu0 %3233 }
 0xabe   : > { %v3239_v53 = vsub.f32 %v8791_v13, %v3236_v51  ;;  %v3237_v54 = vmul.f32 0.03125, %v3234_v52  ;;  %v3241_v55 = vmul.f32 %v3238_v50, %v3238_v50  ;;  %v6985_v51 = vld [vmem:[%s9415_s8 + $0x8] sm:$0xff]   ;;  %v6986_v52 = vld [vmem:[%s9415_s8 + $0x10] sm:$0xff]  }
 0xac0   : > { %v3240_v56 = vsub.f32 %v8788_v42, %v3237_v54  ;;  %v3244_v57 = vsel %vm2627_vm3, %v3241_v55, 0.0  ;;  %v3242_v58 = vmul.f32 %v3239_v53, %v3239_v53  ;;  %v5992_v54 = vld [vmem:[#allocation23] ss:$0 sm:$0xff] }
 0xac1   : > { %3245 = vadd.xlane.f32.xlu0 %v3244_v57  ;;  %v3521_v59 = vpop.xlane.xlu0 %3520 }
 0xac2   : > { %v3523_v60 = vmul.f32 0.015625, %v3521_v59  ;;  %v3247_v61 = vsel %vm2627_vm3, %v3242_v58, 0.0  ;;  %v3243_v62 = vmul.f32 %v3240_v56, %v3240_v56 }
 0xac3   : > { %3248 = vadd.xlane.f32.xlu1 %v3247_v61 }
 0xac4   : > { %v3524_v63 = vsub.f32 %v8801_v47, %v3523_v60  ;;  %v3250_v1 = vsel %vm2634_vm4, %v3243_v62, 0.0 }
 0xac5   : > { %3251 = vadd.xlane.f32.xlu0 %v3250_v1 }
 0xac6   : > { %v3525_v2 = vmul.f32 %v3524_v63, %v3524_v63 }
 0xac8   : > { %v3526_v3 = vsel %vm3518_vm8, %v3525_v2, 0.0 }
 0xac9   : > { %3527 = vadd.xlane.f32.xlu1 %v3526_v3 }
 0xb4e   : > { %v3246_v6 = vpop.xlane.xlu0 %3245 }
 0xb4f   : > { %v3253_v7 = vmul.f32 0.03125, %v3246_v6 }
 0xb50   : > { %v3249_v8 = vpop.xlane.xlu1 %3248 }
 0xb51   : > { %v3256_v10 = vadd.f32 1e-05, %v3253_v7  ;;  %v3254_v11 = vmul.f32 0.03125, %v3249_v8 }
 0xb52   : > { %v3252_v12 = vpop.xlane.xlu0 %3251 }
 0xb53   : > { %7066 = vrsqrt.f32 %v3256_v10  ;;  %v3257_v14 = vadd.f32 1e-05, %v3254_v11  ;;  %v3255_v15 = vmul.f32 0.03125, %v3252_v12 }
 0xb55   : > { %7068 = vrsqrt.f32 %v3257_v14  ;;  %v3258_v16 = vadd.f32 1e-05, %v3255_v15 }
 0xb56   : > { %v3528_v17 = vpop.xlane.xlu1 %3527 }
 0xb57   : > { %7070 = vrsqrt.f32 %v3258_v16  ;;  %v3529_v18 = vmul.f32 0.015625, %v3528_v17 }
 0xb59   : > { %v3530_v19 = vadd.f32 1e-05, %v3529_v18 }
 0xb5b   : > { %7072 = vrsqrt.f32 %v3530_v19 }
 0xb5d   : > { %v7067_v20 = vpop.eup %7066 }
 0xb5e   : > { %v3262_v23 = vmul.f32 %v7067_v20, %v3238_v50  ;;  %v6984_v50 = vld [vmem:[%s9414_s28] sm:$0xff]   ;;  %s9416_s28 = smov 96  }
 0xb5f   : > { %v7069_v25 = vpop.eup %7068  ;;  %6338 = vmatprep.subr.bf16.mxu0 %v6984_v50 }
 0xb60   : > { %v3263_v27 = vmul.f32 %v7069_v25, %v3239_v53  ;;  %v3271_v28 = vmul.f32 %v5990_v21, %v3262_v23  ;;  %6339 = vmatpush3.bf16.msra.mxu0 %v6984_v50  ;;  %v6987_v53 = vld [vmem:[%s9415_s8 + $0x18] sm:$0xff]   ;;  %s9434_s8 = sld [smem:[#allocation67_spill]] }
 0xb61   : > { %v7071_v29 = vpop.eup %7070  ;;  %6340 = vmatprep.subr.bf16.mxu0 %v6985_v51 }
 0xb62   : > { %v3264_v31 = vmul.f32 %v7071_v29, %v3240_v56  ;;  %v3272_v32 = vmul.f32 %v5990_v21, %v3263_v27  ;;  %v3280_v33 = vadd.f32 %v5991_v30, %v3271_v28 }
 0xb64   : > { %v3281_v34 = vadd.f32 %v5991_v30, %v3272_v32  ;;  %v3273_v35 = vmul.f32 %v5990_v21, %v3264_v31  ;;  %6341 = vmatpush3.bf16.msra.mxu0 %v6985_v51  ;;  %v8859_v31 = vld [vmem:[#allocation25] ss:$0 sm:$0xff] }
 0xb65   : > { %v7073_v41 = vpop.eup %7072  ;;  %6342 = vmatprep.subr.bf16.mxu0 %v6986_v52 }
 0xb66   : > { %v3283_v36 = vpack.c.bf16 %v3281_v34, %v3280_v33  ;;  %v3282_v37 = vadd.f32 %v5991_v30, %v3273_v35  ;;  %v3532_v44 = vmul.f32 %v7073_v41, %v3524_v63 }
 0xb68   : > { %6334 = vmatprep.mubr.msk.bf16.mxu1 %vm2627_vm3, %v3283_v36  ;;  %v3284_v40 = vpack.c.bf16 %v3282_v37, %v3282_v37  ;;  %v3539_v22 = vmul.f32 %v6006_v45, %v3532_v44  ;;  %6343 = vmatpush3.bf16.msra.mxu0 %v6986_v52 }
 0xb69   : > { %6344 = vmatprep.subr.bf16.mxu0 %v6987_v53 }
 0xb6a   : > { %6335 = vmatmul.mubr.msk.bf16.vlgmr.msra.gmra.mrb[20].mxu1 %vm2627_vm3, %v3284_v40  ;;  %v3546_v48 = vadd.f32 %v6007_v24, %v3539_v22 }
 0xb6b   : > { %6351 = vmatpush3.bf16.msra.mxu1 %v6980_v38  ;;  %6358 = vmatprep.mubr.msk.bf16.mxu1 %vm7939_vm0, %v7938_v0 }
 0xb6c   : > { %6352 = vmatprep.subr.bf16.mxu1 %v7938_v0  ;;  %v3547_v49 = vpack.c.bf16 %v3546_v48, %v3546_v48  ;;  %6345 = vmatpush3.bf16.msra.mxu0 %v6987_v53  ;;  %v7946_v48 = vmov 65535  }
 0xb6d   : > { %6362 = vmatprep.subr.bf16.mxu0 %v7938_v0 }
 0xb6f   : > { %6353 = vmatpush3.bf16.msra.mxu1 %v6981_v43 }
 0xb70   : > { %6354 = vmatprep.subr.bf16.mxu1 %v7938_v0 }
 0xb73   : > { %6355 = vmatpush3.bf16.msra.mxu1 %v6982_v46 }
 0xb74   : > { %6356 = vmatprep.subr.bf16.mxu1 %v7938_v0 }
 0xb77   : > { %6357 = vmatpush3.bf16.msra.mxu1 %v6983_v26 }
 0xb78   : > { %6368 = vmatprep.subr.bf16.mxu1 %v7938_v0 }
 0xb7a   : > { %6359 = vmatmul.mubr.msk.bf16.vlgmr.msra.gmra.mrb[24].mxu1 %vm2416_vm1, %v3547_v49  ;;  %v3686_v49 = vsel %vm3684_vm10, 4294967295, %v7946_v48 }
 0xb7b   : > { %6370 = vmatprep.mubr.msk.bf16.mxu1 %vm7939_vm0, %v7938_v0  ;;  %v8873_v52 = vsel %vm3685_vm11, %v3686_v49, 0 }
 0xc3d   : > { %v6336_v55 = vpop.f32.mrb[20].mxu1 }
 0xc3e   : > { %v3352_v56 = vadd.f32 %v6336_v55, %v5992_v54  ;;  %v3343_v57 = vpop.f32.mrb[21].mxu1 }
 0xc3f   : > { %v3344_v58 = vadd.f32 %v5992_v54, %v3343_v57  ;;  %v6337_v59 = vpop.f32.mrb[22].mxu1 }
 0xc40   : > { %v3362_v60 = vmul.f32 0.70710677, %v3352_v56  ;;  %v3346_v61 = vpop.f32.mrb[23].mxu1  ;;  %v3359_v11 = vmul.f32 0.5, %v3352_v56 }
 0xc41   : > { %v3360_v62 = vmul.f32 0.70710677, %v3344_v58  ;;  %v3347_v63 = vadd.f32 %v5992_v54, %v3346_v61  ;;  %v3357_v14 = vmul.f32 0.5, %v3344_v58 }
 0xc42   : > { %7074 = verf.f32 %v3362_v60 }
 0xc43   : > { %7076 = verf.f32 %v3360_v62  ;;  %v3361_v1 = vmul.f32 0.70710677, %v3347_v63  ;;  %v3358_v15 = vmul.f32 0.5, %v3347_v63 }
 0xc45   : > { %7078 = verf.f32 %v3361_v1 }
 0xc4c   : > { %v7075_v2 = vpop.eup %7074 }
 0xc4d   : > { %v7077_v3 = vpop.eup %7076  ;;  %v3368_v4 = vadd.f32 1.0, %v7075_v2  ;;  %v3609_v5 = vpop.f32.mrb[24].mxu1 }
 0xc4e   : > { %v3366_v6 = vadd.f32 1.0, %v7077_v3  ;;  %v8836_v7 = vpack.c.bf16 %v3609_v5, %v3609_v5  ;;  %v6360_v8 = vpop.f32.mrb[25].mxu1 }
 0xc4f   : > { %v7079_v10 = vpop.eup %7078  ;;  %v3612_v12 = vpop.f32.mrb[26].mxu1  ;;  %v3371_v18 = vmul.f32 %v3368_v4, %v3359_v11  ;;  %v6988_v11 = vld [vmem:[%s9420_s3] sm:$0xff]  }
 0xc50   : > { %v3367_v16 = vadd.f32 1.0, %v7079_v10  ;;  %3734 = vrot.lane.b32.xlu1 %v8836_v7, %s9278_s11  ;;  %3617 = vrot.lane.b32.xlu0 %v8836_v7, %s9416_s28  ;;  %v6361_v17 = vpop.f32.mrb[27].mxu1  ;;  %v3369_v19 = vmul.f32 %v3366_v6, %v3357_v14  ;;  %s9418_s11 = smov 64   ;;  %v6989_v12 = vld [vmem:[%s9420_s3 + $0x8] sm:$0xff]   ;;  %s9422_s3 = sld [smem:[#allocation87_spill]] }
 0xc51   : > { %v3373_v23 = vpack.c.bf16 %v3371_v18, %v3371_v18 }
 0xc52   : > { %v3370_v20 = vmul.f32 %v3367_v16, %v3358_v15 }
 0xc54   : > { %v3372_v21 = vpack.c.bf16 %v3370_v20, %v3369_v19  ;;  %3732 = vrot.lane.b32.xlu1 %v8836_v7, %s9417_s0 }
 0xc56   : > { %6346 = vmatprep.mubr.msk.bf16.mxu0 %vm2416_vm1, %v3372_v21 }
 0xc57   : > { %6347 = vmatmul.mubr.msk.bf16.vlgmr.msra.gmra.mrb[16].mxu0 %vm2416_vm1, %v3373_v23 }
 0xc58   : > { %6364 = vmatprep.mubr.msk.bf16.mxu0 %vm7939_vm0, %v7938_v0 }
 0xcc2   : > { %v3618_v25 = vpop.permute.xlu0 %3617  ;;  %v3735_v28 = vpop.permute.xlu1 %3734 }
 0xcc3   : > { %v3623_v27 = vsel %vm2763_vm5, %v3618_v25, 0  ;;  %v3740_v29 = vsel %vm2763_vm5, %v3735_v28, 0 }
 0xcc4   : > { %6363 = vmatpush3.bf16.xpose.msra.mxu0 %v3623_v27 }
 0xcc5   : > { %6374 = vmatprep.subr.bf16.mxu0 %v7938_v0 }
 0xcc6   : > { %v3733_v30 = vpop.permute.xlu1 %3732 }
 0xccb   : > { %6365 = vmatmul.mubr.msk.bf16.vlgmr.msra.gmra.mrb[20].mxu0 %vm2763_vm5, %v8836_v7 }
 0xccc   : > { %6375 = vmatpush3.bf16.xpose.msra.mxu0 %v3740_v29  ;;  %6376 = vmatprep.mubr.msk.bf16.mxu0 %vm7939_vm0, %v7938_v0 }
 0xccd   : > { %6386 = vmatprep.subr.bf16.mxu0 %v7938_v0 }
 0xcd3   : > { %6377 = vmatmul.mubr.msk.bf16.vlgmr.msra.gmra.mrb[24].mxu0 %vm2763_vm5, %v3733_v30 }
 0xcd4   : > { %6388 = vmatprep.mubr.msk.bf16.mxu0 %vm7939_vm0, %v7938_v0  ;;  %6387 = vmatpush3.bf16.msra.mxu0 %v6989_v12 }
 0xcd5   : > { %6398 = vmatprep.subr.bf16.mxu0 %v7938_v0 }
 0xd2a   : > { %v6348_v32 = vpop.f32.mrb[16].mxu0 }
 0xd2b   : > { %v8862_v33 = vadd.f32 %v6348_v32, %v8859_v31  ;;  %v8864_v34 = vpop.f32.mrb[17].mxu0  ;;  %v6021_v32 = vld [vmem:[#allocation5] ss:$0 sm:$0xff] }
 0xd2c   : > { %v6349_v35 = vpop.f32.mrb[18].mxu0 }
 0xd2d   : > { %v3447_v36 = vpop.f32.mrb[19].mxu0 }
 0xd2e   : > { %v8867_v37 = vadd.f32 %v8859_v31, %v3447_v36 }
 0xd9e   : > { %v3659_v38 = vpop.f32.mrb[20].mxu0 }
 0xd9f   : > { %v6366_v40 = vpop.f32.mrb[21].mxu0  ;;  %v3666_v41 = vsel %vm3665_vm9, %v3659_v38, -inf }
 0xda0   : > { %3667 = vmax.xlane.f32.xlu1 %v3666_v41  ;;  %v3662_v43 = vpop.f32.mrb[22].mxu0  ;;  %v3445_v41 = vadd.f32 %v8859_v31, %v8864_v34 }
 0xda1   : > { %v6367_v44 = vpop.f32.mrb[23].mxu0 }
 0xda6   : > { %v3776_v45 = vpop.f32.mrb[24].mxu0 }
 0xda7   : > { %v6378_v46 = vpop.f32.mrb[25].mxu0  ;;  %v3782_v22 = vsel %vm3665_vm9, %v3776_v45, -inf }
 0xda8   : > { %3783 = vmax.xlane.f32.xlu0 %v3782_v22  ;;  %v3779_v24 = vpop.f32.mrb[26].mxu0  ;;  %v3458_v22 = vadd.f32 %v3445_v41, %v8784_v39 }
 0xda9   : > { %v6379_v26 = vpop.f32.mrb[27].mxu0 }
 0xdaa   : > { %v3461_v24 = vsel %vm2627_vm3, %v3458_v22, 0.0 }
 0xdb1   : > { %3678 = vrot.lane.b32.xlu1 %v8836_v7, %s9418_s11  ;;  %s9419_s11 = smov 48  }
 0xe2d   : > { %v3668_v50 = vpop.xlane.xlu1 %3667 }
 0xe2e   : > { %v3669_v51 = vsub.f32 %v3659_v38, %v3668_v50 }
 0xe30   : > { %v3670_v53 = vmul.f32 1.442695, %v3669_v51 }
 0xe31   : > { %v3679_v54 = vpop.permute.xlu1 %3678 }
 0xe32   : > { %7080 = vpow2.f32 %v3670_v53  ;;  %v3689_v55 = vand.u32 %v8873_v52, %v3679_v54 }
 0xe34   : > { %6369 = vmatpush3.bf16.msra.mxu1 %v3689_v55 }
 0xe35   : > { %v3784_v56 = vpop.xlane.xlu0 %3783  ;;  %6380 = vmatprep.subr.bf16.mxu1 %v7938_v0 }
 0xe36   : > { %v3785_v57 = vsub.f32 %v3776_v45, %v3784_v56 }
 0xe38   : > { %v3786_v58 = vmul.f32 1.442695, %v3785_v57 }
 0xe3a   : > { %7082 = vpow2.f32 %v3786_v58  ;;  %v6996_v58 = vld [vmem:[%s9422_s3] sm:$0xff]  }
 0xe3c   : > { %v7081_v59 = vpop.eup %7080 }
 0xe3d   : > { %v3672_v60 = vsel %vm3665_vm9, %v7081_v59, 0.0 }
 0xe3e   : > { %3673 = vadd.xlane.f32.xlu0 %v3672_v60  ;;  %v6998_v60 = vld [vmem:[%s9422_s3 + $0x10] sm:$0xff]  }
 0xe44   : > { %v7083_v61 = vpop.eup %7082 }
 0xe45   : > { %v3788_v62 = vsel %vm3665_vm9, %v7083_v61, 0.0 }
 0xe46   : > { %3789 = vadd.xlane.f32.xlu0 %v3788_v62 }
 0xe5c   : > { %3794 = vrot.lane.b32.xlu0 %v8836_v7, %s9419_s11  ;;  %s9421_s11 = sld [smem:[#allocation86_spill]] }
 0xe62   : > { %v6990_v54 = vld [vmem:[%s9421_s11] sm:$0xff]   ;;  %v6991_v55 = vld [vmem:[%s9421_s11 + $0x8] sm:$0xff]   ;;  %v6992_v56 = vld [vmem:[%s9421_s11 + $0x10] sm:$0xff]  }
 0xe63   : > { %v6993_v57 = vld [vmem:[%s9421_s11 + $0x18] sm:$0xff]  }
 0xecb   : > { %v3674_v63 = vpop.xlane.xlu0 %3673 }
 0xecc   : > { %7084 = vrcp.f32 %v3674_v63 }
 0xed3   : > { %v3790_v1 = vpop.xlane.xlu0 %3789 }
 0xed4   : > { %7086 = vrcp.f32 %v3790_v1 }
 0xed6   : > { %v7085_v2 = vpop.eup %7084 }
 0xed7   : > { %v3676_v3 = vmul.f32 %v7085_v2, %v7081_v59  ;;  %v3795_v4 = vpop.permute.xlu0 %3794  ;;  %v6997_v59 = vld [vmem:[%s9422_s3 + $0x8] sm:$0xff]  }
 0xed8   : > { %v3800_v5 = vand.u32 %v3795_v4, %v8873_v52 }
 0xed9   : > { %v3677_v6 = vpack.c.bf16 %v3676_v3, %v3676_v3 }
 0xedb   : > { %6371 = vmatmul.mubr.msk.bf16.vlgmr.msra.gmra.mrb[28].mxu1 %vm3680_vm12, %v3677_v6 }
 0xedc   : > { %6381 = vmatpush3.bf16.msra.mxu1 %v3800_v5  ;;  %6382 = vmatprep.mubr.msk.bf16.mxu1 %vm7939_vm0, %v7938_v0  ;;  %v6022_v5 = vld [vmem:[#allocation14] ss:$0 sm:$0xff] }
 0xedd   : > { %6392 = vmatprep.subr.bf16.mxu1 %v7938_v0 }
 0xede   : > { %v7087_v7 = vpop.eup %7086 }
 0xedf   : > { %v3792_v8 = vmul.f32 %v7087_v7, %v7083_v61  ;;  %v6023_v7 = vld [vmem:[#allocation13] ss:$0 sm:$0xff] }
 0xee1   : > { %v3793_v10 = vpack.c.bf16 %v3792_v8, %v3792_v8 }
 0xee3   : > { %6383 = vmatmul.mubr.msk.bf16.vlgmr.msra.gmra.mrb[32].mxu1 %vm3680_vm12, %v3793_v10 }
 0xee4   : > { %6394 = vmatprep.mubr.msk.bf16.mxu1 %vm7939_vm0, %v7938_v0  ;;  %6393 = vmatpush3.bf16.msra.mxu1 %v6988_v11  ;;  %v8925_v11 = vld [vmem:[#allocation17] ss:$0 sm:$0xff] }
 0xee5   : > { %6410 = vmatprep.subr.bf16.mxu1 %v7938_v0 }
 0xfae   : > { %v3725_v14 = vpop.f32.mrb[28].mxu1 }
 0xfaf   : > { %v3731_v15 = vpack.c.bf16 %v3725_v14, %v3725_v14  ;;  %v6372_v16 = vpop.f32.mrb[29].mxu1 }
 0xfb0   : > { %v3728_v17 = vpop.f32.mrb[30].mxu1 }
 0xfb1   : > { %v6373_v18 = vpop.f32.mrb[31].mxu1  ;;  %6395 = vmatmul.mubr.msk.bf16.vlgmr.msra.gmra.mrb[36].mxu1 %vm2763_vm5, %v3731_v15  ;;  %v6994_v15 = vld [vmem:[%s9423_s4] sm:$0xff]  }
 0xfb2   : > { %6426 = vmatprep.mubr.msk.bf16.mxu1 %vm7939_vm0, %v7938_v0  ;;  %6411 = vmatpush3.bf16.msra.mxu1 %v6996_v58  ;;  %v8929_v18 = vld [vmem:[#allocation16] ss:$0 sm:$0xff] }
 0xfb3   : > { %6412 = vmatprep.subr.bf16.mxu1 %v7938_v0 }
 0xfb6   : > { %v3836_v19 = vpop.f32.mrb[32].mxu1  ;;  %6413 = vmatpush3.bf16.msra.mxu1 %v6997_v59 }
 0xfb7   : > { %v3842_v20 = vpack.c.bf16 %v3836_v19, %v3836_v19  ;;  %v6384_v21 = vpop.f32.mrb[33].mxu1  ;;  %6414 = vmatprep.subr.bf16.mxu1 %v7938_v0  ;;  %v6995_v19 = vld [vmem:[%s9423_s4 + $0x8] sm:$0xff]   ;;  %s9424_s4 = sld [smem:[#allocation77_spill]] }
 0xfb8   : > { %v3839_v23 = vpop.f32.mrb[34].mxu1 }
 0xfb9   : > { %v6385_v25 = vpop.f32.mrb[35].mxu1  ;;  %6389 = vmatmul.mubr.msk.bf16.vlgmr.msra.gmra.mrb[28].mxu0 %vm2763_vm5, %v3842_v20  ;;  %v6999_v23 = vld [vmem:[%s9422_s3 + $0x18] sm:$0xff]  }
 0xfba   : > { %6406 = vmatprep.mubr.msk.bf16.mxu0 %vm7939_vm0, %v7938_v0  ;;  %6399 = vmatpush3.bf16.msra.mxu0 %v6990_v54  ;;  %v7000_v25 = vld [vmem:[%s9422_s3 + $0x20] sm:$0xff]  }
 0xfbb   : > { %6400 = vmatprep.subr.bf16.mxu0 %v7938_v0  ;;  %6415 = vmatpush3.bf16.msra.mxu1 %v6998_v60  ;;  %v6030_v60 = vld [vmem:[#allocation11] ss:$0 sm:$0xff] }
 0xfbc   : > { %6416 = vmatprep.subr.bf16.mxu1 %v7938_v0 }
 0xfbe   : > { %6401 = vmatpush3.bf16.msra.mxu0 %v6991_v55 }
 0xfbf   : > { %6402 = vmatprep.subr.bf16.mxu0 %v7938_v0  ;;  %6417 = vmatpush3.bf16.msra.mxu1 %v6999_v23 }
 0xfc0   : > { %6418 = vmatprep.subr.bf16.mxu1 %v7938_v0 }
 0xfc2   : > { %6403 = vmatpush3.bf16.msra.mxu0 %v6992_v56 }
 0xfc3   : > { %6404 = vmatprep.subr.bf16.mxu0 %v7938_v0  ;;  %6419 = vmatpush3.bf16.msra.mxu1 %v7000_v25 }
 0xfc4   : > { %6420 = vmatprep.subr.bf16.mxu1 %v7938_v0 }
 0xfc6   : > { %6405 = vmatpush3.bf16.msra.mxu0 %v6993_v57 }
 0xfc7   : > { %6430 = vmatprep.subr.bf16.mxu0 %v7938_v0 }
0x1084   : > { %v3935_v27 = vpop.f32.mrb[36].mxu1 }
0x1085   : > { %v6396_v28 = vpop.f32.mrb[37].mxu1 }
0x1086   : > { %v3938_v29 = vpop.f32.mrb[38].mxu1  ;;  %v7002_v28 = vld [vmem:[%s9422_s3 + $0x30] sm:$0xff]  }
0x1087   : > { %v6397_v30 = vpop.f32.mrb[39].mxu1  ;;  %v7003_v29 = vld [vmem:[%s9422_s3 + $0x38] sm:$0xff]  }
0x1088   : > { %v6024_v30 = vld [vmem:[#allocation10] ss:$0 sm:$0xff] }
0x108c   : > { %v3886_v35 = vpop.f32.mrb[28].mxu0 }
0x108d   : > { %v3936_v36 = vadd.f32 %v3935_v27, %v3886_v35  ;;  %v6390_v38 = vpop.f32.mrb[29].mxu0  ;;  %v7001_v27 = vld [vmem:[%s9422_s3 + $0x28] sm:$0xff]   ;;  %s9425_s3 = sld [smem:[#allocation76_spill]] }
0x108e   : > { %v3889_v40 = vpop.f32.mrb[30].mxu0  ;;  %6421 = vmatpush3.bf16.msra.mxu1 %v7001_v27 }
0x108f   : > { %v3947_v43 = vadd.f32 %v6021_v32, %v3936_v36  ;;  %v6391_v44 = vpop.f32.mrb[31].mxu0  ;;  %6422 = vmatprep.subr.bf16.mxu1 %v7938_v0 }
0x1091   : > { %v8902_v45 = vadd.f32 %v3947_v43, %v8801_v47  ;;  %v2275_v43 = vld [vmem:[%s9424_s4] sm:$0x1]  ;;  %s9426_s4 = sld [smem:[#allocation73_spill]] }
0x1092   : > { %6423 = vmatpush3.bf16.msra.mxu1 %v7002_v28 }
0x1093   : > { %v3949_v46 = vsel %vm3518_vm8, %v8902_v45, 0.0  ;;  %6424 = vmatprep.subr.bf16.mxu1 %v7938_v0  ;;  %v7004_v56 = vld [vmem:[%s9425_s3] sm:$0xff]   ;;  %v7005_v57 = vld [vmem:[%s9425_s3 + $0x8] sm:$0xff]   ;;  %v7006_v58 = vld [vmem:[%s9425_s3 + $0x10] sm:$0xff]  }
0x1094   : > { %3950 = vadd.xlane.f32.xlu1 %v3949_v46  ;;  %v7007_v59 = vld [vmem:[%s9425_s3 + $0x18] sm:$0xff]   ;;  %s9428_s3 = sld [smem:[#allocation74_spill]] }
0x1096   : > { %6425 = vmatpush3.bf16.msra.mxu1 %v7003_v29 }
0x1097   : > { %6450 = vmatprep.subr.bf16.mxu1 %v7938_v0 }
0x1098   : > { %3462 = vadd.xlane.f32.xlu1 %v3461_v24 }
0x109a   : > { %v7008_v27 = vld [vmem:[%s9428_s3] sm:$0xff]   ;;  %v7009_v28 = vld [vmem:[%s9428_s3 + $0x8] sm:$0xff]   ;;  %v7010_v29 = vld [vmem:[%s9428_s3 + $0x10] sm:$0xff]  }
0x1121   : > { %v3951_v26 = vpop.xlane.xlu1 %3950 }
0x1122   : > { %v3952_v48 = vmul.f32 0.015625, %v3951_v26 }
0x1124   : > { %v3953_v31 = vsub.f32 %v8902_v45, %v3952_v48 }
0x1125   : > { %v3463_v34 = vpop.xlane.xlu1 %3462 }
0x1126   : > { %v3470_v49 = vmul.f32 0.03125, %v3463_v34  ;;  %v3954_v47 = vmul.f32 %v3953_v31, %v3953_v31 }
0x1128   : > { %v3473_v50 = vsub.f32 %v3458_v22, %v3470_v49  ;;  %v3955_v51 = vsel %vm3518_vm8, %v3954_v47, 0.0 }
0x1129   : > { %3956 = vadd.xlane.f32.xlu0 %v3955_v51 }
0x112a   : > { %v3476_v39 = vmul.f32 %v3473_v50, %v3473_v50 }
0x112c   : > { %v3479_v53 = vsel %vm2627_vm3, %v3476_v39, 0.0 }
0x112d   : > { %3480 = vadd.xlane.f32.xlu0 %v3479_v53 }
0x11b6   : > { %v3957_v61 = vpop.xlane.xlu0 %3956 }
0x11b7   : > { %v3958_v62 = vmul.f32 0.015625, %v3957_v61 }
0x11b9   : > { %v3959_v63 = vadd.f32 1e-05, %v3958_v62 }
0x11ba   : > { %v3481_v1 = vpop.xlane.xlu0 %3480 }
0x11bb   : > { %7088 = vrsqrt.f32 %v3959_v63  ;;  %v3488_v2 = vmul.f32 0.03125, %v3481_v1 }
0x11bd   : > { %v3491_v3 = vadd.f32 1e-05, %v3488_v2 }
0x11bf   : > { %7090 = vrsqrt.f32 %v3491_v3 }
0x11c5   : > { %v7089_v4 = vpop.eup %7088 }
0x11c6   : > { %v3961_v6 = vmul.f32 %v7089_v4, %v3953_v31 }
0x11c8   : > { %v3968_v8 = vmul.f32 %v6022_v5, %v3961_v6 }
0x11c9   : > { %v7091_v10 = vpop.eup %7090 }
0x11ca   : > { %v3497_v12 = vmul.f32 %v7091_v10, %v3473_v50  ;;  %v3975_v14 = vadd.f32 %v6023_v7, %v3968_v8  ;;  %v2254_v10 = vld [vmem:[%s9426_s4] sm:$0x1]  ;;  %s9430_s4 = sld [smem:[#allocation75_spill]] }
0x11cc   : > { %v3506_v16 = vmul.f32 %v8925_v11, %v3497_v12  ;;  %v3976_v17 = vpack.c.bf16 %v3975_v14, %v3975_v14  ;;  %v2253_v14 = vld [vmem:[%s9427_s5] sm:$0x1]  ;;  %s9429_s5 = sld [smem:[#allocation81_spill]] }
0x11ce   : > { %6407 = vmatmul.mubr.msk.bf16.vlgmr.msra.gmra.mrb[32].mxu0 %vm2416_vm1, %v3976_v17  ;;  %v8936_v20 = vadd.f32 %v8929_v18, %v3506_v16 }
0x11cf   : > { %6431 = vmatpush3.bf16.msra.mxu0 %v6994_v15  ;;  %6434 = vmatprep.mubr.msk.bf16.mxu0 %vm7939_vm0, %v7938_v0 }
0x11d0   : > { %6432 = vmatprep.subr.bf16.mxu0 %v7938_v0  ;;  %v4178_v21 = vpack.c.bf16 %v8936_v20, %v8936_v20 }
0x11d3   : > { %6433 = vmatpush3.bf16.msra.mxu0 %v6995_v19 }
0x11d4   : > { %6438 = vmatprep.subr.bf16.mxu0 %v7938_v0 }
0x11d6   : > { %6435 = vmatmul.mubr.msk.bf16.vlgmr.msra.gmra.mrb[36].mxu0 %vm2627_vm3, %v4178_v21 }
0x11d7   : > { %6446 = vmatprep.mubr.msk.bf16.mxu0 %vm7939_vm0, %v7938_v0  ;;  %6439 = vmatpush3.bf16.msra.mxu0 %v7004_v56 }
0x11d8   : > { %6440 = vmatprep.subr.bf16.mxu0 %v7938_v0 }
0x11db   : > { %6441 = vmatpush3.bf16.msra.mxu0 %v7005_v57 }
0x11dc   : > { %6442 = vmatprep.subr.bf16.mxu0 %v7938_v0 }
0x11df   : > { %6443 = vmatpush3.bf16.msra.mxu0 %v7006_v58 }
0x11e0   : > { %6444 = vmatprep.subr.bf16.mxu0 %v7938_v0 }
0x11e3   : > { %6445 = vmatpush3.bf16.msra.mxu0 %v7007_v59 }
0x11e4   : > { %6462 = vmatprep.subr.bf16.mxu0 %v7938_v0 }
0x12a1   : > { %v4044_v32 = vpop.f32.mrb[32].mxu0 }
0x12a2   : > { %v4045_v35 = vadd.f32 %v6024_v30, %v4044_v32  ;;  %v6408_v36 = vpop.f32.mrb[33].mxu0  ;;  %v7011_v30 = vld [vmem:[%s9428_s3 + $0x18] sm:$0xff]   ;;  %s9432_s3 = sld [smem:[#allocation68_spill]] }
0x12a3   : > { %v4047_v38 = vpop.f32.mrb[34].mxu0 }
0x12a4   : > { %v4051_v40 = vmul.f32 0.70710677, %v4045_v35  ;;  %v6409_v41 = vpop.f32.mrb[35].mxu0  ;;  %v4050_v34 = vmul.f32 0.5, %v4045_v35 }
0x12a6   : > { %7092 = verf.f32 %v4051_v40 }
0x12a9   : > { %v4228_v44 = vpop.f32.mrb[36].mxu0 }
0x12aa   : > { %v4229_v46 = vadd.f32 %v4228_v44, %v2275_v43  ;;  %v6436_v22 = vpop.f32.mrb[37].mxu0 }
0x12ab   : > { %v4231_v24 = vpop.f32.mrb[38].mxu0  ;;  %v6039_v22 = vld [vmem:[#allocation2] ss:$0 sm:$0xff] }
0x12ac   : > { %v6437_v26 = vpop.f32.mrb[39].mxu0  ;;  %v4235_v48 = vsel %vm4234_vm13, %v4229_v46, 0.0 }
0x12ad   : > { %4236 = vadd.xlane.f32.xlu0 %v4235_v48  ;;  %v6040_v26 = vld [vmem:[%s9429_s5] ss:$0 sm:$0xff]  ;;  %s9431_s5 = smov 80  }
0x12b0   : > { %v7093_v31 = vpop.eup %7092 }
0x12b1   : > { %v4053_v49 = vadd.f32 1.0, %v7093_v31 }
0x12b3   : > { %v4054_v47 = vmul.f32 %v4053_v49, %v4050_v34 }
0x12b5   : > { %v4055_v50 = vpack.c.bf16 %v4054_v47, %v4054_v47 }
0x12b7   : > { %6427 = vmatmul.mubr.bf16.vlgmr.msra.gmra.mrb[40].mxu1 %v4055_v50 }
0x12b8   : > { %6458 = vmatprep.mubr.msk.bf16.mxu1 %vm7939_vm0, %v7938_v0  ;;  %6451 = vmatpush3.bf16.msra.mxu1 %v7008_v27 }
0x12b9   : > { %6452 = vmatprep.subr.bf16.mxu1 %v7938_v0 }
0x12bc   : > { %6453 = vmatpush3.bf16.msra.mxu1 %v7009_v28  ;;  %v9017_v28 = vadd.f32 %v8867_v37, %v8791_v13  ;;  %v7013_v37 = vld [vmem:[%s9432_s3] sm:$0xff]  }
0x12bd   : > { %6454 = vmatprep.subr.bf16.mxu1 %v7938_v0 }
0x12c0   : > { %6455 = vmatpush3.bf16.msra.mxu1 %v7010_v29  ;;  %v3464_v29 = vsel %vm2627_vm3, %v9017_v28, 0.0 }
0x12c1   : > { %6456 = vmatprep.subr.bf16.mxu1 %v7938_v0 }
0x12c4   : > { %6457 = vmatpush3.bf16.msra.mxu1 %v7011_v30 }
0x12c5   : > { %6474 = vmatprep.subr.bf16.mxu1 %v7938_v0 }
0x133a   : > { %v4237_v51 = vpop.xlane.xlu0 %4236 }
0x133b   : > { %v4238_v39 = vmul.f32 0.015625, %v4237_v51 }
0x133d   : > { %v4239_v53 = vsub.f32 %v4229_v46, %v4238_v39 }
0x133f   : > { %v4240_v54 = vmul.f32 %v4239_v53, %v4239_v53 }
0x1341   : > { %v4241_v55 = vsel %vm4234_vm13, %v4240_v54, 0.0 }
0x1342   : > { %4242 = vadd.xlane.f32.xlu0 %v4241_v55 }
0x138a   : > { %v4144_v61 = vpop.f32.mrb[40].mxu1 }
0x138b   : > { %v4145_v62 = vadd.f32 %v6030_v60, %v4144_v61  ;;  %v6428_v63 = vpop.f32.mrb[41].mxu1 }
0x138c   : > { %v4147_v1 = vpop.f32.mrb[42].mxu1 }
0x138d   : > { %v6429_v2 = vpop.f32.mrb[43].mxu1  ;;  %v4150_v3 = vadd.f32 %v4145_v62, %v8902_v45 }
0x138f   : > { %v4151_v4 = vsel %vm3518_vm8, %v4150_v3, 0.0 }
0x1390   : > { %4152 = vadd.xlane.f32.xlu1 %v4151_v4 }
0x13cf   : > { %v4243_v5 = vpop.xlane.xlu0 %4242 }
0x13d0   : > { %v4244_v6 = vmul.f32 0.015625, %v4243_v5 }
0x13d2   : > { %v4245_v7 = vadd.f32 1e-05, %v4244_v6 }
0x13d4   : > { %7094 = vrsqrt.f32 %v4245_v7 }
0x13de   : > { %v7095_v8 = vpop.eup %7094 }
0x13df   : > { %v4247_v12 = vmul.f32 %v7095_v8, %v4239_v53 }
0x13e1   : > { %v4248_v15 = vmul.f32 %v4247_v12, %v2254_v10 }
0x13e3   : > { %v4249_v16 = vadd.f32 %v4248_v15, %v2253_v14 }
0x13e5   : > { %v4251_v17 = vpack.c.bf16 %v4249_v16, %v4249_v16 }
0x13e7   : > { %6447 = vmatmul.mubr.msk.bf16.vlgmr.msra.gmra.mrb[40].mxu0 %vm2416_vm1, %v4251_v17 }
0x13e8   : > { %6464 = vmatprep.mubr.msk.bf16.mxu0 %vm7939_vm0, %v7938_v0 }
0x141d   : > { %v4153_v45 = vpop.xlane.xlu1 %4152 }
0x141e   : > { %v4154_v19 = vmul.f32 0.015625, %v4153_v45 }
0x1420   : > { %v4155_v21 = vsub.f32 %v4150_v3, %v4154_v19 }
0x1422   : > { %v4156_v23 = vmul.f32 %v4155_v21, %v4155_v21 }
0x1424   : > { %v4157_v25 = vsel %vm3518_vm8, %v4156_v23, 0.0 }
0x1425   : > { %4158 = vadd.xlane.f32.xlu1 %v4157_v25 }
0x14b2   : > { %v4159_v32 = vpop.xlane.xlu1 %4158 }
0x14b3   : > { %v4160_v35 = vmul.f32 0.015625, %v4159_v32 }
0x14b5   : > { %v4161_v36 = vadd.f32 1e-05, %v4160_v35 }
0x14b7   : > { %7096 = vrsqrt.f32 %v4161_v36 }
0x14ba   : > { %v4313_v38 = vpop.f32.mrb[40].mxu0 }
0x14bb   : > { %v4387_v40 = vpack.c.bf16 %v4313_v38, %v4313_v38  ;;  %v6448_v41 = vpop.f32.mrb[41].mxu0 }
0x14bc   : > { %v4316_v43 = vpop.f32.mrb[42].mxu0 }
0x14bd   : > { %4499 = vrot.lane.b32.xlu0 %v4387_v40, %s9417_s0  ;;  %v6449_v44 = vpop.f32.mrb[43].mxu0 }
0x14c1   : > { %v7097_v46 = vpop.eup %7096 }
0x14c2   : > { %v4163_v24 = vmul.f32 %v7097_v46, %v4155_v21 }
0x14c4   : > { %v4170_v48 = vmul.f32 %v6039_v22, %v4163_v24  ;;  %v7014_v22 = vld [vmem:[%s9432_s3 + $0x8] sm:$0xff]   ;;  %v7015_v24 = vld [vmem:[%s9432_s3 + $0x10] sm:$0xff]  }
0x14c6   : > { %v8986_v31 = vadd.f32 %v6040_v26, %v4170_v48  ;;  %v7016_v26 = vld [vmem:[%s9432_s3 + $0x18] sm:$0xff]   ;;  %s9435_s3 = sld [smem:[#allocation71_spill]] }
0x14c8   : > { %v4250_v34 = vsel %vm2463_vm2, %v4249_v16, %v8986_v31  ;;  %v4778_v48 = vpack.c.bf16 %v8986_v31, %v8986_v31 }
0x14c9   : > { %v4319_v49 = vpack.c.bf16 %v4250_v34, %v4250_v34  ;;  %v7017_v34 = vld [vmem:[%s9430_s4 + $0x8] sm:$0xff]  }
0x14cb   : > { %6459 = vmatmul.mubr.msk.bf16.vlgmr.msra.gmra.mrb[44].mxu1 %vm2416_vm1, %v4319_v49 }
0x14cc   : > { %6476 = vmatprep.mubr.msk.bf16.mxu1 %vm7939_vm0, %v7938_v0 }
0x152f   : > { %v4500_v57 = vpop.permute.xlu0 %4499 }
0x159e   : > { %v4381_v47 = vpop.f32.mrb[44].mxu1 }
0x159f   : > { %v4388_v50 = vpack.c.bf16 %v4381_v47, %v4381_v47  ;;  %v6460_v51 = vpop.f32.mrb[45].mxu1  ;;  %v7018_v47 = vld [vmem:[%s9433_s6] sm:$0xff]  }
0x15a0   : > { %v4384_v39 = vpop.f32.mrb[46].mxu1 }
0x15a1   : > { %4501 = vrot.lane.b32.xlu1 %v4388_v50, %s9417_s0  ;;  %v6461_v53 = vpop.f32.mrb[47].mxu1  ;;  %v4393_v54 = vsel %vm2763_vm5, %v4388_v50, 0 }
0x15a2   : > { %6463 = vmatpush3.bf16.xpose.msra.mxu0 %v4393_v54  ;;  %v7019_v54 = vld [vmem:[%s9433_s6 + $0x8] sm:$0xff]  }
0x15a3   : > { %6468 = vmatprep.subr.bf16.mxu0 %v7938_v0 }
0x15a9   : > { %6465 = vmatmul.mubr.msk.bf16.vlgmr.msra.gmra.mrb[44].mxu0 %vm2763_vm5, %v4387_v40  ;;  %v7012_v40 = vld [vmem:[%s9430_s4] sm:$0xff]   ;;  %s9437_s4 = sld [smem:[#allocation64_spill]] }
0x15aa   : > { %6470 = vmatprep.mubr.msk.bf16.mxu0 %vm7939_vm0, %v7938_v0 }
0x1613   : > { %v4502_v55 = vpop.permute.xlu1 %4501 }
0x1614   : > { %v4507_v56 = vsel %vm2763_vm5, %v4502_v55, 0 }
0x1615   : > { %6475 = vmatpush3.bf16.xpose.msra.mxu1 %v4507_v56 }
0x1616   : > { %6486 = vmatprep.subr.bf16.mxu1 %v7938_v0 }
0x161c   : > { %6477 = vmatmul.mubr.msk.bf16.vlgmr.msra.gmra.mrb[48].mxu1 %vm2763_vm5, %v4500_v57 }
0x161d   : > { %6488 = vmatprep.mubr.msk.bf16.mxu1 %vm7939_vm0, %v7938_v0  ;;  %6487 = vmatpush3.bf16.msra.mxu1 %v7017_v34 }
0x161e   : > { %6498 = vmatprep.subr.bf16.mxu1 %v7938_v0 }
0x167c   : > { %v4429_v58 = vpop.f32.mrb[44].mxu0 }
0x167d   : > { %v6466_v59 = vpop.f32.mrb[45].mxu0  ;;  %v4436_v60 = vsel %vm4435_vm14, %v4429_v58, -inf }
0x167e   : > { %4437 = vmax.xlane.f32.xlu1 %v4436_v60  ;;  %v4432_v61 = vpop.f32.mrb[46].mxu0  ;;  %v2238_v59 = vld [vmem:[%s9434_s8] sm:$0x1]  ;;  %s9436_s8 = sld [smem:[#allocation66_spill]] }
0x167f   : > { %v6467_v62 = vpop.f32.mrb[47].mxu0 }
0x168f   : > { %4449 = vrot.lane.b32.xlu1 %v4388_v50, %s9416_s28 }
0x16ef   : > { %v4543_v63 = vpop.f32.mrb[48].mxu1 }
0x16f0   : > { %v6478_v1 = vpop.f32.mrb[49].mxu1  ;;  %v4549_v14 = vsel %vm4435_vm14, %v4543_v63, -inf }
0x16f1   : > { %v4546_v2 = vpop.f32.mrb[50].mxu1 }
0x16f2   : > { %v6479_v3 = vpop.f32.mrb[51].mxu1 }
0x16f3   : > { %v3460_v3 = vadd.f32 %v8862_v33, %v8788_v42 }
0x170b   : > { %v4438_v4 = vpop.xlane.xlu1 %4437 }
0x170c   : > { %v4439_v5 = vsub.f32 %v4429_v58, %v4438_v4  ;;  %v3467_v4 = vsel %vm2634_vm4, %v3460_v3, 0.0 }
0x170e   : > { %v4440_v6 = vmul.f32 1.442695, %v4439_v5  ;;  %v7020_v5 = vld [vmem:[%s9433_s6 + $0x10] sm:$0xff]  }
0x170f   : > { %v4450_v7 = vpop.permute.xlu1 %4449 }
0x1710   : > { %7098 = vpow2.f32 %v4440_v6  ;;  %v4455_v8 = vand.u32 %v4450_v7, %v8873_v52  ;;  %v7021_v6 = vld [vmem:[%s9433_s6 + $0x18] sm:$0xff]   ;;  %s9439_s6 = sld [smem:[#allocation62_spill]] }
0x1712   : > { %6469 = vmatpush3.bf16.msra.mxu0 %v4455_v8 }
0x1713   : > { %6480 = vmatprep.subr.bf16.mxu0 %v7938_v0 }
0x171a   : > { %v7099_v10 = vpop.eup %7098 }
0x171b   : > { %v4442_v12 = vsel %vm4435_vm14, %v7099_v10, 0.0 }
0x171c   : > { %4443 = vadd.xlane.f32.xlu0 %v4442_v12 }
0x1720   : > { %4550 = vmax.xlane.f32.xlu0 %v4549_v14  ;;  %v2252_v14 = vld [vmem:[%s9435_s3] sm:$0x1]  ;;  %s9438_s3 = sld [smem:[#allocation63_spill]] }
0x17a9   : > { %v4444_v15 = vpop.xlane.xlu0 %4443 }
0x17aa   : > { %7100 = vrcp.f32 %v4444_v15 }
0x17ad   : > { %v4551_v16 = vpop.xlane.xlu0 %4550 }
0x17ae   : > { %v4552_v17 = vsub.f32 %v4543_v63, %v4551_v16 }
0x17b0   : > { %v4553_v45 = vmul.f32 1.442695, %v4552_v17 }
0x17b2   : > { %7102 = vpow2.f32 %v4553_v45 }
0x17b4   : > { %v7101_v19 = vpop.eup %7100 }
0x17b5   : > { %v4446_v21 = vmul.f32 %v7101_v19, %v7099_v10 }
0x17b7   : > { %v4447_v23 = vpack.c.bf16 %v4446_v21, %v4446_v21 }
0x17b9   : > { %6471 = vmatmul.mubr.msk.bf16.vlgmr.msra.gmra.mrb[48].mxu0 %vm3680_vm12, %v4447_v23 }
0x17ba   : > { %6482 = vmatprep.mubr.msk.bf16.mxu0 %vm7939_vm0, %v7938_v0 }
0x17bc   : > { %v7103_v25 = vpop.eup %7102 }
0x17bd   : > { %v4555_v27 = vsel %vm4435_vm14, %v7103_v25, 0.0 }
0x17be   : > { %4556 = vadd.xlane.f32.xlu0 %v4555_v27 }
0x17d4   : > { %4561 = vrot.lane.b32.xlu0 %v4388_v50, %s9431_s5 }
0x17f3   : > { %3465 = vadd.xlane.f32.xlu0 %v3464_v29 }
0x184b   : > { %v4557_v30 = vpop.xlane.xlu0 %4556 }
0x184c   : > { %7104 = vrcp.f32 %v4557_v30 }
0x184f   : > { %v4562_v32 = vpop.permute.xlu0 %4561 }
0x1850   : > { %v4567_v35 = vand.u32 %v4562_v32, %v8873_v52 }
0x1852   : > { %6481 = vmatpush3.bf16.msra.mxu0 %v4567_v35 }
0x1853   : > { %6492 = vmatprep.subr.bf16.mxu0 %v7938_v0 }
0x1856   : > { %v7105_v36 = vpop.eup %7104 }
0x1857   : > { %v4559_v38 = vmul.f32 %v7105_v36, %v7103_v25 }
0x1859   : > { %v4560_v41 = vpack.c.bf16 %v4559_v38, %v4559_v38 }
0x185b   : > { %6483 = vmatmul.mubr.msk.bf16.vlgmr.msra.gmra.mrb[52].mxu0 %vm3680_vm12, %v4560_v41  ;;  %v7023_v41 = vld [vmem:[%s9436_s8 + $0x8] sm:$0xff]  }
0x185c   : > { %6493 = vmatpush3.bf16.msra.mxu0 %v7012_v40  ;;  %6494 = vmatprep.mubr.msk.bf16.mxu0 %vm7939_vm0, %v7938_v0  ;;  %v7022_v40 = vld [vmem:[%s9436_s8] sm:$0xff]  }
0x185d   : > { %6510 = vmatprep.subr.bf16.mxu0 %v7938_v0 }
0x1880   : > { %v3466_v7 = vpop.xlane.xlu0 %3465 }
0x1881   : > { %v3471_v8 = vmul.f32 0.03125, %v3466_v7 }
0x1883   : > { %v3474_v33 = vsub.f32 %v9017_v28, %v3471_v8 }
0x1885   : > { %v3477_v35 = vmul.f32 %v3474_v33, %v3474_v33 }
0x1887   : > { %v3482_v38 = vsel %vm2627_vm3, %v3477_v35, 0.0 }
0x188c   : > { %v4491_v13 = vpop.f32.mrb[48].mxu0 }
0x188d   : > { %v4497_v52 = vpack.c.bf16 %v4491_v13, %v4491_v13  ;;  %v6472_v43 = vpop.f32.mrb[49].mxu0  ;;  %v7024_v13 = vld [vmem:[%s9437_s4] sm:$0xff]  }
0x188e   : > { %v4494_v44 = vpop.f32.mrb[50].mxu0 }
0x188f   : > { %v6473_v46 = vpop.f32.mrb[51].mxu0  ;;  %6495 = vmatmul.mubr.msk.bf16.vlgmr.msra.gmra.mrb[56].mxu0 %vm2763_vm5, %v4497_v52 }
0x1890   : > { %6511 = vmatpush3.bf16.msra.mxu0 %v7013_v37  ;;  %6518 = vmatprep.mubr.msk.bf16.mxu0 %vm7939_vm0, %v7938_v0  ;;  %v7025_v37 = vld [vmem:[%s9437_s4 + $0x8] sm:$0xff]   ;;  %s9446_s4 = sld [smem:[#allocation60_spill]] }
0x1891   : > { %6512 = vmatprep.subr.bf16.mxu0 %v7938_v0 }
0x1894   : > { %6513 = vmatpush3.bf16.msra.mxu0 %v7014_v22 }
0x1895   : > { %6514 = vmatprep.subr.bf16.mxu0 %v7938_v0 }
0x1898   : > { %6515 = vmatpush3.bf16.msra.mxu0 %v7015_v24 }
0x1899   : > { %6516 = vmatprep.subr.bf16.mxu0 %v7938_v0 }
0x189c   : > { %6517 = vmatpush3.bf16.msra.mxu0 %v7016_v26 }
0x189d   : > { %6530 = vmatprep.subr.bf16.mxu0 %v7024_v13 }
0x189f   : > { %6519 = vmatmul.mubr.msk.bf16.vlgmr.msra.gmra.mrb[60].mxu0 %vm2416_vm1, %v4778_v48 }
0x18a0   : > { %6531 = vmatpush3.bf16.msra.mxu0 %v7024_v13 }
0x18a1   : > { %6532 = vmatprep.subr.bf16.mxu0 %v7025_v37 }
0x18a4   : > { %6533 = vmatpush3.bf16.msra.mxu0 %v7025_v37 }
0x18a5   : > { %6546 = vmatprep.subr.bf16.mxu0 %v7938_v0 }
0x192e   : > { %v4603_v49 = vpop.f32.mrb[52].mxu0 }
0x192f   : > { %v4609_v50 = vpack.c.bf16 %v4603_v49, %v4603_v49  ;;  %v6484_v51 = vpop.f32.mrb[53].mxu0 }
0x1930   : > { %v4606_v39 = vpop.f32.mrb[54].mxu0  ;;  %v2224_v51 = vld [vmem:[%s9439_s6] sm:$0x1]  ;;  %s9440_s6 = sld [smem:[#allocation65_spill]] }
0x1931   : > { %v6485_v53 = vpop.f32.mrb[55].mxu0  ;;  %6489 = vmatmul.mubr.msk.bf16.vlgmr.msra.gmra.mrb[52].mxu1 %vm2763_vm5, %v4609_v50 }
0x1932   : > { %6499 = vmatpush3.bf16.msra.mxu1 %v7018_v47  ;;  %6506 = vmatprep.mubr.msk.bf16.mxu1 %vm7939_vm0, %v7938_v0  ;;  %v2225_v47 = vld [vmem:[%s9438_s3] sm:$0x1]  ;;  %s9444_s3 = sld [smem:[#allocation61_spill]] }
0x1933   : > { %6500 = vmatprep.subr.bf16.mxu1 %v7938_v0 }
0x1936   : > { %6501 = vmatpush3.bf16.msra.mxu1 %v7019_v54 }
0x1937   : > { %6502 = vmatprep.subr.bf16.mxu1 %v7938_v0 }
0x193a   : > { %6503 = vmatpush3.bf16.msra.mxu1 %v7020_v5 }
0x193b   : > { %6504 = vmatprep.subr.bf16.mxu1 %v7938_v0 }
0x193e   : > { %6505 = vmatpush3.bf16.msra.mxu1 %v7021_v6 }
0x193f   : > { %6522 = vmatprep.subr.bf16.mxu1 %v7938_v0 }
0x1962   : > { %v4702_v55 = vpop.f32.mrb[56].mxu0 }
0x1963   : > { %v6496_v56 = vpop.f32.mrb[57].mxu0 }
0x1964   : > { %v4705_v57 = vpop.f32.mrb[58].mxu0 }
0x1965   : > { %v6497_v58 = vpop.f32.mrb[59].mxu0 }
0x1972   : > { %v4840_v60 = vpop.f32.mrb[60].mxu0 }
0x1973   : > { %v4841_v61 = vadd.f32 %v4840_v60, %v2238_v59  ;;  %v6520_v62 = vpop.f32.mrb[61].mxu0 }
0x1974   : > { %v4843_v63 = vpop.f32.mrb[62].mxu0 }
0x1975   : > { %v6521_v1 = vpop.f32.mrb[63].mxu0  ;;  %v4846_v2 = vsel %vm2634_vm4, %v4841_v61, 0.0 }
0x1976   : > { %4847 = vadd.xlane.f32.xlu1 %v4846_v2 }
0x197a   : > { %3468 = vadd.xlane.f32.xlu1 %v3467_v4 }
0x1a03   : > { %v4848_v10 = vpop.xlane.xlu1 %4847 }
0x1a04   : > { %v4849_v12 = vmul.f32 0.03125, %v4848_v10  ;;  %v4653_v15 = vpop.f32.mrb[52].mxu1 }
0x1a05   : > { %v4703_v16 = vadd.f32 %v4702_v55, %v4653_v15  ;;  %v6490_v42 = vpop.f32.mrb[53].mxu1 }
0x1a06   : > { %v4850_v17 = vsub.f32 %v4841_v61, %v4849_v12  ;;  %v4656_v45 = vpop.f32.mrb[54].mxu1 }
0x1a07   : > { %v4708_v19 = vadd.f32 %v4703_v16, %v2252_v14  ;;  %v3469_v21 = vpop.xlane.xlu1 %3468  ;;  %v6491_v23 = vpop.f32.mrb[55].mxu1 }
0x1a08   : > { %v3472_v25 = vmul.f32 0.03125, %v3469_v21  ;;  %v4851_v27 = vmul.f32 %v4850_v17, %v4850_v17 }
0x1a09   : > { %v4709_v29 = vpack.c.bf16 %v4708_v19, %v4708_v19 }
0x1a0a   : > { %v3475_v30 = vsub.f32 %v3460_v3, %v3472_v25  ;;  %v4852_v32 = vsel %vm2634_vm4, %v4851_v27, 0.0 }
0x1a0b   : > { %4853 = vadd.xlane.f32.xlu1 %v4852_v32  ;;  %6507 = vmatmul.mubr.msk.bf16.vlgmr.msra.gmra.mrb[56].mxu1 %vm2416_vm1, %v4709_v29 }
0x1a0c   : > { %v3478_v28 = vmul.f32 %v3475_v30, %v3475_v30  ;;  %6526 = vmatprep.mubr.msk.bf16.mxu1 %vm7939_vm0, %v7938_v0  ;;  %6523 = vmatpush3.bf16.msra.mxu1 %v7022_v40 }
0x1a0d   : > { %6524 = vmatprep.subr.bf16.mxu1 %v7938_v0 }
0x1a0e   : > { %v3485_v36 = vsel %vm2634_vm4, %v3478_v28, 0.0 }
0x1a0f   : > { %3486 = vadd.xlane.f32.xlu0 %v3485_v36  ;;  %3483 = vadd.xlane.f32.xlu1 %v3482_v38 }
0x1a10   : > { %6525 = vmatpush3.bf16.msra.mxu1 %v7023_v41 }
0x1a11   : > { %6538 = vmatprep.subr.bf16.mxu1 %v7938_v0 }
0x1a98   : > { %v4854_v52 = vpop.xlane.xlu1 %4853 }
0x1a99   : > { %v4855_v43 = vmul.f32 0.03125, %v4854_v52 }
0x1a9b   : > { %v4856_v44 = vadd.f32 1e-05, %v4855_v43 }
0x1a9c   : > { %v3484_v46 = vpop.xlane.xlu1 %3483  ;;  %v3487_v22 = vpop.xlane.xlu0 %3486 }
0x1a9d   : > { %7106 = vrsqrt.f32 %v4856_v44  ;;  %v3489_v24 = vmul.f32 0.03125, %v3484_v46  ;;  %v3490_v26 = vmul.f32 0.03125, %v3487_v22 }
0x1a9f   : > { %v3492_v48 = vadd.f32 1e-05, %v3489_v24  ;;  %v3493_v34 = vadd.f32 1e-05, %v3490_v26  ;;  %v7026_v26 = vld [vmem:[%s9440_s6] sm:$0xff]  }
0x1aa1   : > { %7108 = vrsqrt.f32 %v3492_v48 }
0x1aa2   : > { %7110 = vrsqrt.f32 %v3493_v34 }
0x1aa7   : > { %v7107_v49 = vpop.eup %7106 }
0x1aa8   : > { %v4858_v50 = vmul.f32 %v7107_v49, %v4850_v17 }
0x1aaa   : > { %v4859_v39 = vmul.f32 %v4858_v50, %v2225_v47 }
0x1aab   : > { %v7109_v53 = vpop.eup %7108 }
0x1aac   : > { %v7111_v54 = vpop.eup %7110  ;;  %v3498_v55 = vmul.f32 %v7109_v53, %v3474_v33  ;;  %v4860_v56 = vadd.f32 %v4859_v39, %v2224_v51 }
0x1aad   : > { %v3499_v57 = vmul.f32 %v7111_v54, %v3475_v30 }
0x1aae   : > { %v4862_v58 = vpack.c.bf16 %v4860_v56, %v4860_v56  ;;  %v3507_v59 = vmul.f32 %v8925_v11, %v3498_v55  ;;  %v4861_v62 = vsel %vm2463_vm2, %v4860_v56, %v8936_v20 }
0x1aaf   : > { %v3508_v60 = vmul.f32 %v8925_v11, %v3499_v57 }
0x1ab0   : > { %6527 = vmatmul.mubr.msk.bf16.vlgmr.msra.gmra.mrb[60].mxu1 %vm2627_vm3, %v4862_v58  ;;  %v3516_v61 = vadd.f32 %v8929_v18, %v3507_v59 }
0x1ab1   : > { %v3517_v63 = vadd.f32 %v8929_v18, %v3508_v60  ;;  %6542 = vmatprep.mubr.msk.bf16.mxu1 %vm7939_vm0, %v7938_v0 }
0x1ab2   : > { %v4918_v1 = vpack.c.bf16 %v3516_v61, %v4861_v62 }
0x1ab3   : > { %v4919_v2 = vpack.c.bf16 %v3517_v63, %v3517_v63 }
0x1ab4   : > { %6534 = vmatprep.mubr.msk.bf16.mxu0 %vm2627_vm3, %v4918_v1 }
0x1ab5   : > { %6535 = vmatmul.mubr.msk.bf16.vlgmr.msra.gmra.mrb[64].mxu0 %vm2627_vm3, %v4919_v2 }
0x1ab6   : > { %6550 = vmatprep.mubr.msk.bf16.mxu0 %vm7939_vm0, %v7938_v0 }
0x1ade   : > { %v9089_v11 = vpop.f32.mrb[56].mxu1 }
0x1adf   : > { %v6508_v3 = vpop.f32.mrb[57].mxu1 }
0x1ae0   : > { %v4774_v4 = vpop.f32.mrb[58].mxu1 }
0x1ae1   : > { %v6509_v5 = vpop.f32.mrb[59].mxu1 }
0x1b83   : > { %v4912_v6 = vpop.f32.mrb[60].mxu1 }
0x1b84   : > { %v6528_v7 = vpop.f32.mrb[61].mxu1  ;;  %v4986_v45 = vpack.c.bf16 %v4912_v6, %v4912_v6 }
0x1b85   : > { %v4915_v18 = vpop.f32.mrb[62].mxu1 }
0x1b86   : > { %v6529_v8 = vpop.f32.mrb[63].mxu1 }
0x1b88   : > { %v6536_v10 = vpop.f32.mrb[64].mxu0 }
0x1b89   : > { %v4972_v12 = vpop.f32.mrb[65].mxu0  ;;  %v9096_v33 = vpack.c.bf16 %v6536_v10, %v6536_v10 }
0x1b8a   : > { %v6537_v14 = vpop.f32.mrb[66].mxu0 }
0x1b8b   : > { %v4975_v15 = vpop.f32.mrb[67].mxu0  ;;  %v4996_v17 = vsel %vm2763_vm5, %v9096_v33, 0  ;;  %v7028_v14 = vld [vmem:[%s8271_s25 + $0x8] sm:$0xff]  }
0x1b8c   : > { %v9091_v16 = vpack.c.bf16 %v4975_v15, %v4972_v12  ;;  %v7027_v12 = vld [vmem:[%s8271_s25] sm:$0xff]  }
0x1b8e   : > { %v4993_v42 = vsel %vm2763_vm5, %v9091_v16, 0 }
0x1b8f   : > { %6539 = vmatpush3.bf16.xpose.msra.mxu1 %v4993_v42 }
0x1b90   : > { %6540 = vmatprep.subr.bf16.mxu1 %v7938_v0 }
0x1b97   : > { %6541 = vmatpush3.bf16.xpose.msra.mxu1 %v4996_v17 }
0x1b98   : > { %6562 = vmatprep.subr.bf16.mxu1 %v7938_v0 }
0x1b9e   : > { %6543 = vmatmul.mubr.msk.bf16.vlgmr.msra.gmra.mrb[64].mxu1 %vm2763_vm5, %v4986_v45 }
0x1b9f   : > { %6566 = vmatprep.mubr.msk.bf16.mxu1 %vm7939_vm0, %v7938_v0 }
0x1c71   : > { %v5032_v19 = vpop.f32.mrb[64].mxu1 }
0x1c72   : > { %v6544_v21 = vpop.f32.mrb[65].mxu1  ;;  %v5038_v23 = vsel %vm2831_vm7, %v5032_v19, -inf }
0x1c73   : > { %5039 = vmax.xlane.f32.xlu1 %v5038_v23  ;;  %v5035_v25 = vpop.f32.mrb[66].mxu1 }
0x1c74   : > { %v6545_v27 = vpop.f32.mrb[67].mxu1 }
0x1c75   : > { %v2378_v27 = vld [vmem:[#allocation35] sm:$0x1] }
0x1c84   : > { %5052 = vrot.lane.b32.xlu1 %v9091_v16, %s9416_s28 }
0x1c88   : > { %5107 = vrot.lane.b32.xlu1 %v9091_v16, %s9417_s0 }
0x1c8c   : > { %5109 = vrot.lane.b32.xlu1 %v9096_v33, %s9417_s0 }
0x1c90   : > { %5105 = vrot.lane.b32.xlu1 %v4986_v45, %s9417_s0  ;;  %s9441_s0 = sld [smem:[#allocation79_spill]]  ;;  %v7029_v45 = vld [vmem:[%s9440_s6 + $0x8] sm:$0xff]  }
0x1c96   : > { %v2280_v56 = vld [vmem:[%s9441_s0] sm:$0x1]  ;;  %s9445_s0 = sld [smem:[#allocation69_spill]] }
0x1c97   : > { %v4772_v57 = vadd.f32 %v9089_v11, %v2280_v56 }
0x1c99   : > { %v4777_v58 = vadd.f32 %v4772_v57, %v8936_v20 }
0x1c9b   : > { %v5380_v59 = vsel %vm2463_vm2, %v4777_v58, %v8936_v20 }
0x1c9c   : > { %v5382_v60 = vsel %vm2634_vm4, %v5380_v59, 0.0 }
0x1d00   : > { %v5040_v29 = vpop.xlane.xlu1 %5039 }
0x1d01   : > { %v5041_v30 = vsub.f32 %v5032_v19, %v5040_v29 }
0x1d03   : > { %v5042_v32 = vmul.f32 1.442695, %v5041_v30  ;;  %v2377_v30 = vld [vmem:[#allocation34] sm:$0x1] }
0x1d04   : > { %v5053_v35 = vpop.permute.xlu1 %5052 }
0x1d05   : > { %7112 = vpow2.f32 %v5042_v32  ;;  %6547 = vmatpush3.bf16.msra.mxu0 %v5053_v35 }
0x1d06   : > { %6548 = vmatprep.subr.bf16.mxu0 %v7938_v0 }
0x1d08   : > { %v5108_v52 = vpop.permute.xlu1 %5107 }
0x1d09   : > { %v5115_v44 = vsel %vm2763_vm5, %v5108_v52, 0 }
0x1d0c   : > { %v5110_v46 = vpop.permute.xlu1 %5109 }
0x1d0d   : > { %v5118_v22 = vsel %vm2763_vm5, %v5110_v46, 0 }
0x1d0f   : > { %v7113_v28 = vpop.eup %7112 }
0x1d10   : > { %v5044_v36 = vsel %vm2831_vm7, %v7113_v28, 0.0  ;;  %v5106_v24 = vpop.permute.xlu1 %5105 }
0x1d11   : > { %5045 = vadd.xlane.f32.xlu0 %v5044_v36 }
0x1d27   : > { %5054 = vrot.lane.b32.xlu0 %v9096_v33, %s9416_s28  ;;  %s9442_s28 = sld [smem:[#allocation70_spill]] }
0x1d9e   : > { %v5046_v38 = vpop.xlane.xlu0 %5045 }
0x1d9f   : > { %7114 = vrcp.f32 %v5046_v38 }
0x1da2   : > { %v5055_v40 = vpop.permute.xlu0 %5054 }
0x1da3   : > { %v5061_v41 = vand.u32 %v5055_v40, %v8764_v9 }
0x1da5   : > { %6549 = vmatpush3.bf16.msra.mxu0 %v5061_v41 }
0x1da6   : > { %6554 = vmatprep.subr.bf16.mxu0 %v7938_v0 }
0x1da9   : > { %v7115_v13 = vpop.eup %7114 }
0x1daa   : > { %v5048_v37 = vmul.f32 %v7115_v13, %v7113_v28 }
0x1dac   : > { %v5049_v43 = vpack.c.bf16 %v5048_v37, %v5048_v37  ;;  %v7030_v37 = vld [vmem:[%s9442_s28] sm:$0xff]  }
0x1dae   : > { %6551 = vmatmul.mubr.msk.bf16.vlgmr.msra.gmra.mrb[68].mxu0 %vm2824_vm6, %v5049_v43  ;;  %v2223_v43 = vld [vmem:[%s9444_s3] sm:$0x1]  ;;  %s9448_s3 = sld [smem:[#allocation58_spill]] }
0x1daf   : > { %6555 = vmatpush3.bf16.xpose.msra.mxu0 %v5115_v44  ;;  %6558 = vmatprep.mubr.msk.bf16.mxu0 %vm7939_vm0, %v7938_v0 }
0x1db0   : > { %6556 = vmatprep.subr.bf16.mxu0 %v7938_v0 }
0x1db7   : > { %6557 = vmatpush3.bf16.xpose.msra.mxu0 %v5118_v22 }
0x1db8   : > { %6576 = vmatprep.subr.bf16.mxu0 %v7938_v0 }
0x1dbe   : > { %6559 = vmatmul.mubr.msk.bf16.vlgmr.msra.gmra.mrb[72].mxu0 %vm2763_vm5, %v5106_v24 }
0x1dbf   : > { %6578 = vmatprep.mubr.msk.bf16.mxu0 %vm7939_vm0, %v7938_v0  ;;  %6577 = vmatpush3.bf16.msra.mxu0 %v7026_v26 }
0x1dc0   : > { %6590 = vmatprep.subr.bf16.mxu0 %v7938_v0 }
0x1e81   : > { %v5097_v48 = vpop.f32.mrb[68].mxu0 }
0x1e82   : > { %v5103_v34 = vpack.c.bf16 %v5097_v48, %v5097_v48  ;;  %v6552_v49 = vpop.f32.mrb[69].mxu0 }
0x1e83   : > { %v5100_v47 = vpop.f32.mrb[70].mxu0  ;;  %v2247_v49 = vld [vmem:[%s9445_s0] sm:$0x1]  ;;  %s9449_s0 = sld [smem:[#allocation57_spill]] }
0x1e84   : > { %v6553_v50 = vpop.f32.mrb[71].mxu0  ;;  %6579 = vmatmul.mubr.msk.bf16.vlgmr.msra.gmra.mrb[76].mxu0 %vm2763_vm5, %v5103_v34 }
0x1e85   : > { %6594 = vmatprep.mubr.msk.bf16.mxu0 %vm7939_vm0, %v7938_v0  ;;  %6591 = vmatpush3.bf16.msra.mxu0 %v7027_v12 }
0x1e86   : > { %6592 = vmatprep.subr.bf16.mxu0 %v7938_v0 }
0x1e89   : > { %6593 = vmatpush3.bf16.msra.mxu0 %v7028_v14 }
0x1e8a   : > { %6598 = vmatprep.subr.bf16.mxu0 %v7938_v0 }
0x1e91   : > { %v5154_v51 = vpop.f32.mrb[72].mxu0 }
0x1e92   : > { %v6560_v39 = vpop.f32.mrb[73].mxu0  ;;  %v5160_v53 = vsel %vm2831_vm7, %v5154_v51, -inf }
0x1e93   : > { %5161 = vmax.xlane.f32.xlu0 %v5160_v53  ;;  %v5157_v54 = vpop.f32.mrb[74].mxu0 }
0x1e94   : > { %v6561_v55 = vpop.f32.mrb[75].mxu0 }
0x1ea9   : > { %5172 = vrot.lane.b32.xlu0 %v9091_v16, %s9431_s5 }
0x1ec8   : > { %5383 = vadd.xlane.f32.xlu0 %v5382_v60 }
0x1f20   : > { %v5162_v61 = vpop.xlane.xlu0 %5161 }
0x1f21   : > { %v5163_v62 = vsub.f32 %v5154_v51, %v5162_v61 }
0x1f23   : > { %v5164_v63 = vmul.f32 1.442695, %v5163_v62  ;;  %v7032_v62 = vld [vmem:[%s9446_s4] sm:$0xff]  }
0x1f24   : > { %v5173_v1 = vpop.permute.xlu0 %5172 }
0x1f25   : > { %7116 = vpow2.f32 %v5164_v63  ;;  %6563 = vmatpush3.bf16.msra.mxu1 %v5173_v1  ;;  %v7033_v63 = vld [vmem:[%s9446_s4 + $0x8] sm:$0xff]   ;;  %v7035_v1 = vld [vmem:[%s9446_s4 + $0x18] sm:$0xff]  }
0x1f26   : > { %6564 = vmatprep.subr.bf16.mxu1 %v7938_v0 }
0x1f2f   : > { %v7117_v2 = vpop.eup %7116 }
0x1f30   : > { %v5166_v11 = vsel %vm2831_vm7, %v7117_v2, 0.0 }
0x1f31   : > { %5167 = vadd.xlane.f32.xlu1 %v5166_v11 }
0x1f42   : > { %5174 = vrot.lane.b32.xlu1 %v9096_v33, %s9431_s5  ;;  %s9443_s5 = smov %s9442_s28  ;;  %s9447_s28 = sld [smem:[#allocation59_spill]] }
0x1f43   : > { %v7031_v52 = vld [vmem:[%s9443_s5 + $0x8] sm:$0xff]   ;;  %s2164_s5 = sand.u32 1, %s7842_s1  }
0x1f44   : > { %s2165_s6 = scalar_lea.vmem [#allocation37], %s2164_s5 }
0x1f45   : > { %s5551_s8 = sshll.u32 %s2165_s6, 4  ;;  %s9191_s8 = int_to_ptr.vmem [resolvable:$true] %s5551_s8 }
0x1f55   : > { %v5384_v20 = vpop.xlane.xlu0 %5383 }
0x1f56   : > { %v5385_v3 = vmul.f32 0.03125, %v5384_v20 }
0x1f57   : > { %v5316_v4 = vpop.f32.mrb[76].mxu0 }
0x1f58   : > { %v5386_v5 = vsub.f32 %v5380_v59, %v5385_v3  ;;  %v6580_v6 = vpop.f32.mrb[77].mxu0 }
0x1f59   : > { %v5319_v7 = vpop.f32.mrb[78].mxu0  ;;  %v2213_v6 = vld [vmem:[%s9448_s3] sm:$0x1]  ;;  %s5539_s3 = scalar_lea.sflag [#allocation4], %s2164_s5 }
0x1f5a   : > { %v6581_v18 = vpop.f32.mrb[79].mxu0  ;;  %v5387_v8 = vmul.f32 %v5386_v5, %v5386_v5 }
0x1f5c   : > { %v5388_v10 = vsel %vm2634_vm4, %v5387_v8, 0.0 }
0x1f5d   : > { %5389 = vadd.xlane.f32.xlu0 %v5388_v10  ;;  %v2376_v10 = vld [vmem:[#allocation32] sm:$0x1] }
0x1fbe   : > { %v5168_v15 = vpop.xlane.xlu1 %5167 }
0x1fbf   : > { %7118 = vrcp.f32 %v5168_v15 }
0x1fc2   : > { %v5175_v16 = vpop.permute.xlu1 %5174 }
0x1fc3   : > { %v5181_v42 = vand.u32 %v5175_v16, %v8764_v9 }
0x1fc5   : > { %6565 = vmatpush3.bf16.msra.mxu1 %v5181_v42 }
0x1fc6   : > { %6570 = vmatprep.subr.bf16.mxu1 %v7938_v0 }
0x1fc9   : > { %v7119_v33 = vpop.eup %7118 }
0x1fca   : > { %v5170_v17 = vmul.f32 %v7119_v33, %v7117_v2 }
0x1fcc   : > { %v5171_v19 = vpack.c.bf16 %v5170_v17, %v5170_v17 }
0x1fce   : > { %6567 = vmatmul.mubr.msk.bf16.vlgmr.msra.gmra.mrb[68].mxu1 %vm2824_vm6, %v5171_v19 }
0x1fcf   : > { %6571 = vmatpush3.bf16.msra.mxu1 %v7029_v45  ;;  %6572 = vmatprep.mubr.msk.bf16.mxu1 %vm7939_vm0, %v7938_v0 }
0x1fd0   : > { %6582 = vmatprep.subr.bf16.mxu1 %v7938_v0 }
0x1fea   : > { %v5390_v21 = vpop.xlane.xlu0 %5389 }
0x1feb   : > { %v5391_v23 = vmul.f32 0.03125, %v5390_v21 }
0x1fed   : > { %v5392_v25 = vadd.f32 1e-05, %v5391_v23 }
0x1fef   : > { %7120 = vrsqrt.f32 %v5392_v25 }
0x1ff9   : > { %v7121_v9 = vpop.eup %7120 }
0x1ffa   : > { %v5394_v29 = vmul.f32 %v7121_v9, %v5386_v5 }
0x1ffc   : > { %v5395_v32 = vmul.f32 %v5394_v29, %v2378_v27 }
0x1ffe   : > { %v5396_v35 = vadd.f32 %v5395_v32, %v2377_v30 }
0x2000   : > { %v5397_v28 = vpack.c.bf16 %v5396_v35, %v5396_v35 }
0x2002   : > { %6595 = vmatmul.mubr.msk.bf16.vlgmr.msra.gmra.mrb[80].mxu0 %vm2627_vm3, %v5397_v28 }
0x2003   : > { %6606 = vmatprep.mubr.msk.bf16.mxu0 %vm7939_vm0, %v7938_v0  ;;  %6599 = vmatpush3.bf16.msra.mxu0 %v7032_v62 }
0x2004   : > { %6600 = vmatprep.subr.bf16.mxu0 %v7938_v0 }
0x2007   : > { %6601 = vmatpush3.bf16.msra.mxu0 %v7033_v63 }
0x2008   : > { %6602 = vmatprep.subr.bf16.mxu0 %v7938_v0 }
0x20a1   : > { %v5217_v36 = vpop.f32.mrb[68].mxu1 }
0x20a2   : > { %v5223_v38 = vpack.c.bf16 %v5217_v36, %v5217_v36  ;;  %v6568_v40 = vpop.f32.mrb[69].mxu1 }
0x20a3   : > { %v5220_v41 = vpop.f32.mrb[70].mxu1 }
0x20a4   : > { %v6569_v13 = vpop.f32.mrb[71].mxu1  ;;  %6573 = vmatmul.mubr.msk.bf16.vlgmr.msra.gmra.mrb[72].mxu1 %vm2763_vm5, %v5223_v38 }
0x20a5   : > { %6586 = vmatprep.mubr.msk.bf16.mxu1 %vm7939_vm0, %v7938_v0  ;;  %6583 = vmatpush3.bf16.msra.mxu1 %v7030_v37 }
0x20a6   : > { %6584 = vmatprep.subr.bf16.mxu1 %v7938_v0 }
0x20a9   : > { %6585 = vmatpush3.bf16.msra.mxu1 %v7031_v52 }
0x2177   : > { %v5267_v44 = vpop.f32.mrb[72].mxu1 }
0x2178   : > { %v5317_v46 = vadd.f32 %v5316_v4, %v5267_v44  ;;  %v6574_v22 = vpop.f32.mrb[73].mxu1  ;;  %v2214_v4 = vld [vmem:[%s9447_s28] sm:$0x1] }
0x2179   : > { %v5270_v24 = vpop.f32.mrb[74].mxu1 }
0x217a   : > { %v5322_v26 = vadd.f32 %v5317_v46, %v2223_v43  ;;  %v6575_v48 = vpop.f32.mrb[75].mxu1 }
0x217c   : > { %v5323_v34 = vpack.c.bf16 %v5322_v26, %v5322_v26 }
0x217e   : > { %6587 = vmatmul.mubr.msk.bf16.vlgmr.msra.gmra.mrb[76].mxu1 %vm2627_vm3, %v5323_v34 }
0x2251   : > { %v5373_v47 = vpop.f32.mrb[76].mxu1 }
0x2252   : > { %v5374_v50 = vadd.f32 %v5373_v47, %v2247_v49  ;;  %v6588_v51 = vpop.f32.mrb[77].mxu1 }
0x2253   : > { %v5376_v39 = vpop.f32.mrb[78].mxu1 }
0x2254   : > { %v5379_v53 = vadd.f32 %v5374_v50, %v8986_v31  ;;  %v6589_v54 = vpop.f32.mrb[79].mxu1 }
0x2256   : > { %v5381_v55 = vsel %vm2463_vm2, %v5379_v53, %v8986_v31  ;;  %v7034_v31 = vld [vmem:[%s9446_s4 + $0x10] sm:$0xff]   ;;  %s6098_s4 = sshll.u32 %s8299_s7, 4  ;;  %s7947_s7 = smov [#allocation37]  }
0x2257   : > { %v5453_v56 = vsel %vm4234_vm13, %v5381_v55, 0.0  ;;  %6603 = vmatpush3.bf16.msra.mxu0 %v7034_v31  ;;  %s9189_s28 = scalar_lea.hbm %s8276_s14, %s6098_s4  ;;  %s7744_s9 = sshll.u32 %s7947_s7, 4  ;;  %s7745_s9 = int_to_ptr.vmem [resolvable:$false] %s7744_s9 }
0x2258   : > { %5454 = vadd.xlane.f32.xlu1 %v5453_v56  ;;  %6604 = vmatprep.subr.bf16.mxu0 %v7938_v0  ;;  %v2212_v0 = vld [vmem:[%s9449_s0] sm:$0x1]  ;;  %s7740_s0 = scalar_lea.vmem %s9191_s8, 16  ;;  %s7746_s10 = scalar_lea.vmem %s7745_s9, 32 }
0x2259   : > { %v6610_v12 = vadd.f32 %v2376_v10, %v2212_v0  ;;  %p7741_p8 = scmp.ne.s32.totalorder %s9191_s8, %s7740_s0  ;;  %p7747_p2 = scmp.lt.s32.totalorder %s9191_s8, %s7745_s9 }
0x225a   : > { %p7748_p0 = scmp.lt.s32.totalorder %s7746_s10, %s7740_s0 }
0x225b   : > { %6605 = vmatpush3.bf16.msra.mxu0 %v7035_v1  ;;  %p7742_p13 = pnand %p7741_p8, %p9450_p11 }
0x225c   : > { %p7749_p3 = por %p7748_p0, %p7747_p2 }
0x225d   : > { %p7743_p1 = pneg %p7742_p13 }
0x225f   : > { %p7750_p4 = pnand %p7749_p3, %p7743_p1 }
0x22e5   : > { %v5455_v57 = vpop.xlane.xlu1 %5454 }
0x22e6   : > { %v5456_v58 = vmul.f32 0.015625, %v5455_v57 }
0x22e8   : > { %v5457_v59 = vsub.f32 %v5381_v55, %v5456_v58 }
0x22ea   : > { %v5458_v60 = vmul.f32 %v5457_v59, %v5457_v59 }
0x22ec   : > { %v5459_v61 = vsel %vm4234_vm13, %v5458_v60, 0.0 }
0x22ed   : > { %5460 = vadd.xlane.f32.xlu0 %v5459_v61 }
0x237a   : > { %v5461_v2 = vpop.xlane.xlu0 %5460 }
0x237b   : > { %v5462_v11 = vmul.f32 0.015625, %v5461_v2 }
0x237d   : > { %v5463_v20 = vadd.f32 1e-05, %v5462_v11 }
0x237f   : > { %7122 = vrsqrt.f32 %v5463_v20 }
0x2389   : > { %v7123_v3 = vpop.eup %7122 }
0x238a   : > { %v5465_v5 = vmul.f32 %v7123_v3, %v5457_v59 }
0x238c   : > { %v5466_v7 = vmul.f32 %v5465_v5, %v2214_v4 }
0x238e   : > { %v5467_v18 = vadd.f32 %v5466_v7, %v2213_v6 }
0x2390   : > { %v5468_v8 = vpack.c.bf16 %v5467_v18, %v5467_v18 }
0x2392   : > { %6607 = vmatmul.mubr.msk.bf16.vlgmr.msra.gmra.mrb[80].mxu0 %vm2416_vm1, %v5468_v8 }
0x2465   : > { %v5530_v14 = vpop.f32.mrb[80].mxu0 }
0x2466   : > { %v6611_v15 = vadd.f32 %v6610_v12, %v5530_v14  ;;  %v6608_v16 = vpop.f32.mrb[81].mxu0 }
0x2467   : > { %v5533_v42 = vpop.f32.mrb[82].mxu0 }
0x2468   : > { %5537 = vst [vmem:[%s2165_s6] sm:$0x1] %v6611_v15  ;;  %v6609_v33 = vpop.f32.mrb[83].mxu0 }
0x2469   : > { %7753 = shalt.err (!%p7750_p4)
}
0x246a   : > { %s7754_s4 = scalar_lea.hbm %s9189_s28, 16  ;;  %s7758_s6 = scalar_lea.hbm %s8276_s14, 32 }
0x246b   : > { %p7755_p12 = scmp.ne.s32.totalorder %s9189_s28, %s7754_s4  ;;  %p7759_p9 = scmp.lt.u32.totalorder %s9189_s28, %s8276_s14 }
0x246c   : > { %p7760_p10 = scmp.lt.u32.totalorder %s7758_s6, %s7754_s4  ;;  %p7762_p8 = scmp.lt.u32.totalorder %s7754_s4, %s9189_s28 }
0x246d   : > { %p7756_p5 = pnand %p7755_p12, %p9450_p11 }
0x246e   : > { %p7761_p7 = por %p7760_p10, %p7759_p9 }
0x246f   : > { %p7757_p6 = pneg %p7756_p5 }
0x2470   : > { %p7763_p13 = por %p7762_p8, %p7761_p7 }
0x2472   : > { %p7764_p1 = pnand %p7763_p13, %p7757_p6 }
0x2474   : > { %7767 = shalt.err (!%p7764_p1)
}
0x2475   : > { %6708 = dma.vmem_to_hbm [thread:$0]  (%p9450_p11), %s9191_s8, 16, %s9189_s28, %s5539_s3  }
0x2476 PF: > { %s9451_s9 = sld [smem:[#allocation104_spill]]  ;;  %s9452_s10 = sld [smem:[#allocation108_spill]] }
0x2477   : > { %p6825_p2 = scmp.ge.s32.totalorder %s7850_s2, 2 }
0x247c   : > { %s5563_s5 = sand.u32 1, %s9451_s9   ;;  %p9453_p0 = scmp.ne.s32.totalorder %s9452_s10, 0 }
0x247d   : > { %s5564_s0 = scalar_lea.sflag [#allocation4], %s5563_s5 }
0x247e   : > { %p6778_p3 = pnand %p6825_p2, %p9453_p0 }
0x2480   : > { %7833 = dma.done.wait (!%p6778_p3), %s5564_s0, 16  }
0x2481   : > { %7835 = vsyncadd (!%p6778_p3), %s5564_s0, 4294967280  ;;  %s9454_s2 = sld [smem:[#allocation106_spill]]  ;;  %s9455_s7 = sld [smem:[#allocation105_spill]] }
0x2482   : > { %s9456_s0 = sld [smem:[#allocation107_spill]]  ;;  %s9457_s28 = smov %s7842_s1 }
0x2487   : > { %p151_p4 = scmp.ge.s32.totalorder %s9454_s2, 4   ;;  %s9458_s1 = smov %s9455_s7 }
0x2489   :  { %153 = sbr.rel (!%p151_p4) target bundleno = 134 (0x86), region = 467 }
0x2490   :  { %5568 = vsyncpa [#allocation3], 1 }
0x2491   :  { %5570 = vsyncpa [#allocation3 + $0x1], 1 }
0x2492   :  { %5571 = vsyncpa [#allocation6], 1 }
0x2493   :  { %5572 = vsyncpa [#allocation9], 1 }
0x2494   :  { %5573 = vsyncpa [#allocation12], 1 }
0x2495   :  { %5574 = vsyncpa [#allocation15], 1 }
0x2496   :  { %5575 = vsyncpa [#allocation18], 1 }
0x2497   :  { %5576 = vsyncpa [#allocation21], 1 }
0x2498   :  { %5577 = vsyncpa [#allocation24], 1 }
0x2499   :  { %5578 = vsyncpa [#allocation27], 1 }
0x249a   :  { %5579 = vsyncpa [#allocation30], 1 }
0x249b   :  { %5580 = vsyncpa [#allocation33], 1 }
0x249c   :  { %5581 = vsyncpa [#allocation36], 1 }
0x249d   :  { %5582 = vsyncpa [#allocation4], 1 }
0x249e   :  { %5584 = vsyncpa [#allocation4 + $0x1], 1 }

</bundles_post_ra>
